<compile_context>
chip_gen: v6e
topology: v6e:2x2x1
jax: 0.10.0
libtpu: 0.0.40
codegen_flags: <defaults>
</compile_context>

<pallas_src>
import functools

import jax
import jax.numpy as jnp
from jax.experimental import pallas as pl
from jax.experimental.pallas import tpu as pltpu

num_channels = 3
num_points = 121

# Static pipeline lengths for the assumed ResNet1D.
_L_STEM = (num_points + 2 * 3 - 7) // 2 + 1          # 61  (stem conv7 stride2 pad3)
_L_POOL = (_L_STEM + 2 * 1 - 3) // 2 + 1             # 31  (maxpool3 stride2 pad1)
_A1 = 64   # per-sample row allotment at the stem / pool stage (>= _L_STEM + 2)
_A2 = 32   # per-sample row allotment at the layer1 stage (>= _L_POOL, mult. of 16)

_VMEM = pl.BlockSpec(memory_space=pltpu.MemorySpace.VMEM)


# --------------------------------------------------------------------------- #
# The fused forward kernel: whole network, one pallas_call, everything in VMEM.
# --------------------------------------------------------------------------- #
def _fused_forward_kernel(x_ref, w_ref, b_ref, out_ref, rep_ref,
                          slab_ref, pad_ref, *, meta, n_batch):
    w_offs = meta["w"]          # name -> (row, K, Cout) in the bf16 weight slab
    b_offs = meta["b"]          # name -> (row, Cout)    in the f32  bias slab
    n_hidden = meta["n_hidden"]

    def wmat(name):
        r, K, cout = w_offs[name]
        return w_ref[r:r + K, 0:cout]                       # bf16 (K, Cout)

    def bias(name):
        i, cout = b_offs[name]
        return b_ref[i:i + 1, 0:cout]                       # f32 (1, Cout)

    def matmul(lhs_bf16, name):
        # single MXU matmul, f32 accumulation, f32 bias epilogue
        return jnp.dot(lhs_bf16, wmat(name),
                       preferred_element_type=jnp.float32) + bias(name)

    def dense(v, name):
        return matmul(v.astype(jnp.bfloat16), name)

    # ---- stride-1 'same' conv on the batch-stacked activation ---------------- #
    # h: (n_batch*A, cin) f32, rows [s*A : s*A+L] are sample s.  Builds one bf16
    # im2col slab (k aligned full-tile stores per sample) and does ONE matmul.
    def conv_same(h, L, A, cin, name, relu):
        _, K, _ = w_offs[name]
        k = K // cin
        p = k // 2
        ztop = jnp.zeros((p, cin), jnp.float32)
        ztail = jnp.zeros((A + p - L, cin), jnp.float32)
        for s in range(n_batch):
            B = s * A
            vpad = jnp.concatenate([ztop, h[B:B + L], ztail],
                                   axis=0).astype(jnp.bfloat16)   # (A+2p, cin)
            for t in range(k):
                # aligned (A, cin) store per tap; boundary zeros come from vpad
                slab_ref[B:B + A, t * cin:(t + 1) * cin] = vpad[t:t + A]
        out = matmul(slab_ref[0:n_batch * A, 0:K], name)
        return jnp.maximum(out, 0.0) if relu else out

    # ---- stride-2 conv (layer2 block 0 conv1) via strided pl.ds reads -------- #
    def conv_stride2(h, L_in, A_in, cin, name):
        _, K, _ = w_offs[name]
        k = K // cin
        p = k // 2
        L_out = (L_in + 2 * p - k) // 2 + 1                  # 16
        for s in range(n_batch):
            Bp = s * _A1                                     # pad scratch base
            Bo = s * L_out                                   # slab base
            pad_ref[Bp:Bp + p, 0:cin] = jnp.zeros((p, cin), jnp.float32)
            pad_ref[Bp + p:Bp + p + L_in, 0:cin] = h[s * A_in:s * A_in + L_in]
            pad_ref[Bp + p + L_in:Bp + p + L_in + p, 0:cin] = (
                jnp.zeros((p, cin), jnp.float32))
            for t in range(k):
                tap = pad_ref[pl.ds(Bp + t, L_out, stride=2), 0:cin]
                slab_ref[Bo:Bo + L_out, t * cin:(t + 1) * cin] = (
                    tap.astype(jnp.bfloat16))
        out = matmul(slab_ref[0:n_batch * L_out, 0:K], name)
        return jnp.maximum(out, 0.0), L_out, p

    # 1x1/stride-2 downsample: its operand h[::2] is exactly the centre-tap column
    # block of the stride-2 conv's im2col slab -> reuse it, no extra reads.
    def downsample_from_slab(cin, L_out, p, name):
        lhs = slab_ref[0:n_batch * L_out, p * cin:(p + 1) * cin]
        return matmul(lhs, name)

    # ---------------- stem: one matmul (stride-2 + im2col folded in wrapper) -- #
    y = jnp.maximum(matmul(x_ref[...].astype(jnp.bfloat16), "stem"), 0.0)
    # y: (n_batch*_A1, 64) f32; rows [s*_A1 : s*_A1+_L_STEM] are real.

    # ---------------- maxpool k=3 s=2 p=1 via strided reads ------------------- #
    # zero padding == -inf padding because y >= 0 (post-ReLU)
    pooled = []
    for s in range(n_batch):
        B = s * _A1
        pad_ref[B:B + 1, 0:64] = jnp.zeros((1, 64), jnp.float32)
        pad_ref[B + 1:B + 1 + _L_STEM, 0:64] = y[B:B + _L_STEM]
        pad_ref[B + 1 + _L_STEM:B + 2 + _L_STEM, 0:64] = jnp.zeros((1, 64),
                                                                   jnp.float32)
        m = pad_ref[pl.ds(B, _L_POOL, stride=2), 0:64]
        m = jnp.maximum(m, pad_ref[pl.ds(B + 1, _L_POOL, stride=2), 0:64])
        m = jnp.maximum(m, pad_ref[pl.ds(B + 2, _L_POOL, stride=2), 0:64])
        pooled.append(jnp.concatenate(
            [m, jnp.zeros((_A2 - _L_POOL, 64), jnp.float32)], axis=0))
    h = jnp.concatenate(pooled, axis=0)                      # (n_batch*_A2, 64)

    # ---------------- layer1: 2 BasicBlocks, width 64, stride 1 --------------- #
    for bi in range(2):
        h1 = conv_same(h, _L_POOL, _A2, 64, f"l1b{bi}c1", relu=True)
        h2 = conv_same(h1, _L_POOL, _A2, 64, f"l1b{bi}c2", relu=False)
        h = jnp.maximum(h2 + h, 0.0)

    # ---------------- layer2 block 0: width 128, stride 2, 1x1 downsample ----- #
    h1, l2, p2 = conv_stride2(h, _L_POOL, _A2, 64, "l2b0c1")     # (n*16, 128)
    idn = downsample_from_slab(64, l2, p2, "l2down")             # (n*16, 128)
    h2 = conv_same(h1, l2, l2, 128, "l2b0c2", relu=False)
    h = jnp.maximum(h2 + idn, 0.0)

    # ---------------- layer2 block 1: stride 1 --------------------------------- #
    h1 = conv_same(h, l2, l2, 128, "l2b1c1", relu=True)
    h2 = conv_same(h1, l2, l2, 128, "l2b1c2", relu=False)
    h = jnp.maximum(h2 + h, 0.0)

    # ---------------- global average pool + head ------------------------------- #
    feats = [jnp.mean(h[s * l2:(s + 1) * l2], axis=0, keepdims=True)
             for s in range(n_batch)]
    feat = jnp.concatenate(feats, axis=0)                    # (n_batch, 128)
    ctx = dense(feat, "fc")                                  # (n, 100)
    rep = dense(ctx, "con")                                  # (n, num_dim)
    rep_ref[...] = rep
    z = jnp.tanh(dense(rep, "exp"))                          # (n, 20)
    for i in range(n_hidden):
        z = jnp.tanh(dense(z, f"h{i}"))
    out_ref[...] = dense(z, "fin")                           # (n, num_dim_final)


# --------------------------------------------------------------------------- #
# Wrapper
# --------------------------------------------------------------------------- #
def _stem_im2col(x):
    """x: (N, 3, 121) (PyTorch NCL) -> (N*64, 21) f32 slab.

    Folds the stem conv's stride-2 + padding + im2col (k=7, Cin=3) into plain XLA,
    with each sample's 61 output rows padded to a 64-row (8-aligned) region."""
    n = x.shape[0]
    x_lc = jnp.transpose(x, (0, 2, 1)).astype(jnp.float32)        # (N, 121, 3)
    xp = jnp.pad(x_lc, ((0, 0), (3, 3), (0, 0)))                  # (N, 127, 3)
    cols = [xp[:, t:t + 2 * _L_STEM - 1:2, :] for t in range(7)]  # (N, 61, 3) each
    im = jnp.concatenate(cols, axis=-1)                           # (N, 61, 21)
    im = jnp.pad(im, ((0, 0), (0, _A1 - _L_STEM), (0, 0)))        # (N, 64, 21)
    return im.reshape(n * _A1, 7 * num_channels)


def similarity_embedding_forward(w_slab, b_slab, x, *, meta):
    """x: (N, 3, 121) f32.  Returns (out: (N, num_dim_final), rep: (N, num_dim))."""
    n = x.shape[0]
    assert x.shape[1] == num_channels and x.shape[2] == num_points
    k = meta["kernel_size"]
    num_dim = meta["num_dim"]
    num_dim_final = meta["num_dim_final"]

    x_stem = _stem_im2col(x)                                  # (N*64, 21)

    kernel = functools.partial(_fused_forward_kernel, meta=meta, n_batch=n)
    out, rep = pl.pallas_call(
        kernel,
        out_shape=(jax.ShapeDtypeStruct((n, num_dim_final), jnp.float32),
                   jax.ShapeDtypeStruct((n, num_dim), jnp.float32)),
        in_specs=[_VMEM, _VMEM, _VMEM],
        out_specs=(_VMEM, _VMEM),
        scratch_shapes=[
            pltpu.VMEM((n * _A2, k * 128), jnp.bfloat16),     # shared im2col slab
            pltpu.VMEM((n * _A1, 128), jnp.float32),          # padded-activation pad
        ],
    )(x_stem, w_slab, b_slab)
    return out, rep


# --------------------------------------------------------------------------- #
# Parameter initialization (deterministic, synthetic) + inference-time prep
# --------------------------------------------------------------------------- #
def _conv_w(key, cout, cin, k):
    fan_in = cin * k
    return jax.random.normal(key, (cout, cin, k), jnp.float32) * jnp.sqrt(2.0 / fan_in)


def _linear_wb(key, fin, fout):
    k1, k2 = jax.random.split(key)
    bound = 1.0 / jnp.sqrt(fin)
    w = jax.random.uniform(k1, (fin, fout), jnp.float32, -bound, bound)
    b = jax.random.uniform(k2, (fout,), jnp.float32, -bound, bound)
    return w, b


def _bn_eval_affine(c, eps=1e-5):
    # PyTorch defaults in eval mode: gamma=1, beta=0, running_mean=0, running_var=1
    scale = jnp.full((c,), 1.0 / jnp.sqrt(1.0 + eps), jnp.float32)
    shift = jnp.zeros((c,), jnp.float32)
    return scale, shift


def init_params(key, kernel_size=5, num_dim=3, num_dim_final=10, num_hidden_layers_h=1):
    keys = iter(jax.random.split(key, 32))

    def make_block(cin, cout, downsample):
        blk = {
            "conv1_w": _conv_w(next(keys), cout, cin, kernel_size),
            "bn1": _bn_eval_affine(cout),
            "conv2_w": _conv_w(next(keys), cout, cout, kernel_size),
            "bn2": _bn_eval_affine(cout),
        }
        if downsample:
            blk["down_w"] = _conv_w(next(keys), cout, cin, 1)
            blk["downbn"] = _bn_eval_affine(cout)
        return blk

    resnet = {
        "conv1_w": _conv_w(next(keys), 64, num_channels, 7),
        "bn1": _bn_eval_affine(64),
        "layer1": [make_block(64, 64, False), make_block(64, 64, False)],
        "layer2": [make_block(64, 128, True), make_block(128, 128, False)],
    }
    resnet["fc_w"], resnet["fc_b"] = _linear_wb(next(keys), 128, 100)

    params = {"resnet": resnet}
    params["contraction_w"], params["contraction_b"] = _linear_wb(next(keys), 100, num_dim)
    params["expander_w"], params["expander_b"] = _linear_wb(next(keys), num_dim, 20)
    params["layers_h"] = [_linear_wb(next(keys), 20, 20) for _ in range(num_hidden_layers_h)]
    params["final_w"], params["final_b"] = _linear_wb(next(keys), 20, num_dim_final)
    return params


def prepare_inference_params(params):
    """Fold eval-BN into the conv weights, concat conv taps into (k*Cin, Cout)
    matrices, and pack ALL weights / biases into two lane-aligned VMEM slabs:
      w_slab: (rows, 128) bf16, each weight at a 16-aligned row offset,
      b_slab: (rows, 128) f32,  one bias per row.
    Returns (w_slab, b_slab, meta) where meta holds the static row offsets."""
    p = params["resnet"]

    def fold_conv(w, bn):
        scale, shift = bn
        wf = w * scale[:, None, None]                         # (Cout, Cin, k)
        cout, cin, k = wf.shape
        wt = jnp.transpose(wf, (2, 1, 0)).reshape(k * cin, cout)   # row = t*Cin + c
        return wt, shift

    wl, bl = [], []

    def add(name, w, b):
        wl.append((name, w))
        bl.append((name, b))

    add("stem", *fold_conv(p["conv1_w"], p["bn1"]))
    for bi, blk in enumerate(p["layer1"]):
        add(f"l1b{bi}c1", *fold_conv(blk["conv1_w"], blk["bn1"]))
        add(f"l1b{bi}c2", *fold_conv(blk["conv2_w"], blk["bn2"]))
    b0, b1 = p["layer2"]
    add("l2b0c1", *fold_conv(b0["conv1_w"], b0["bn1"]))
    add("l2b0c2", *fold_conv(b0["conv2_w"], b0["bn2"]))
    add("l2down", *fold_conv(b0["down_w"], b0["downbn"]))
    add("l2b1c1", *fold_conv(b1["conv1_w"], b1["bn1"]))
    add("l2b1c2", *fold_conv(b1["conv2_w"], b1["bn2"]))
    add("fc", p["fc_w"], p["fc_b"])
    add("con", params["contraction_w"], params["contraction_b"])
    add("exp", params["expander_w"], params["expander_b"])
    for i, (w, b) in enumerate(params["layers_h"]):
        add(f"h{i}", w, b)
    add("fin", params["final_w"], params["final_b"])

    # ---- pack weights: one bf16 (rows, 128) slab, 16-aligned row offsets ----- #
    w_rows, w_offs, r = [], {}, 0
    for name, w in wl:
        K, cout = int(w.shape[0]), int(w.shape[1])
        assert cout <= 128
        Kp = ((K + 15) // 16) * 16
        block = jnp.zeros((Kp, 128), jnp.float32).at[:K, :cout].set(w)
        w_rows.append(block)
        w_offs[name] = (r, K, cout)
        r += Kp
    w_slab = jnp.concatenate(w_rows, axis=0).astype(jnp.bfloat16)

    # ---- pack biases: one f32 (rows, 128) slab, one bias per row ------------- #
    nb = ((len(bl) + 7) // 8) * 8
    b_slab = jnp.zeros((nb, 128), jnp.float32)
    b_offs = {}
    for i, (name, b) in enumerate(bl):
        cout = int(b.shape[0])
        b_slab = b_slab.at[i, :cout].set(b)
        b_offs[name] = (i, cout)

    kernel_size = int(p["layer1"][0]["conv1_w"].shape[2])
    assert kernel_size % 2 == 1, "odd block kernel sizes assumed ('same' padding)"

    meta = {
        "w": w_offs,
        "b": b_offs,
        "n_hidden": len(params["layers_h"]),
        "kernel_size": kernel_size,
        "num_dim": int(params["contraction_w"].shape[1]),
        "num_dim_final": int(params["final_w"].shape[1]),
    }
    return w_slab, b_slab, meta


# --------------------------------------------------------------------------- #
if __name__ == "__main__":
    key = jax.random.PRNGKey(0)
    kp, kx = jax.random.split(key)

    params = init_params(kp, kernel_size=5, num_dim=3, num_dim_final=10,
                         num_hidden_layers_h=1)
    w_slab, b_slab, meta = prepare_inference_params(params)

    # num_channels = 3, num_points = 121, small batch of 2
    x = jax.random.normal(kx, (2, num_channels, num_points), jnp.float32)

    fwd = jax.jit(functools.partial(similarity_embedding_forward, meta=meta))
    out, rep = fwd(w_slab, b_slab, x)
    jax.block_until_ready((out, rep))

    assert out.shape == (2, 10) and out.dtype == jnp.float32
    assert rep.shape == (2, 3) and rep.dtype == jnp.float32
    assert bool(jnp.all(jnp.isfinite(out))) and bool(jnp.all(jnp.isfinite(rep)))
    print("KERNEL_OK")
</pallas_src>

<mosaic_0001>
module attributes {stable_mosaic.version = 11 : i64} {
  func.func @_fused_forward_kernel(%arg0: memref<128x21xf32, #tpu.memory_space<vmem>>, %arg1: memref<3936x128xbf16, #tpu.memory_space<vmem>>, %arg2: memref<16x128xf32, #tpu.memory_space<vmem>>, %arg3: memref<2x10xf32, #tpu.memory_space<vmem>>, %arg4: memref<2x3xf32, #tpu.memory_space<vmem>>, %arg5: memref<64x640xbf16, #tpu.memory_space<vmem>>, %arg6: memref<128x128xf32, #tpu.memory_space<vmem>>) attributes {dimension_semantics = [], scalar_prefetch = 0 : i64, scratch_operands = 2 : i64, tpu.core_type = #tpu.core_type<tc>} {
    %c0 = arith.constant 0 : index
    %c0_0 = arith.constant 0 : index
    %0 = vector.load %arg0[%c0, %c0_0] : memref<128x21xf32, #tpu.memory_space<vmem>>, vector<128x21xf32>
    %1 = arith.truncf %0 : vector<128x21xf32> to vector<128x21xbf16>
    %c0_1 = arith.constant 0 : index
    %c0_2 = arith.constant 0 : index
    %2 = vector.load %arg1[%c0_1, %c0_2] : memref<3936x128xbf16, #tpu.memory_space<vmem>>, vector<21x64xbf16>
    %cst = arith.constant dense<0.000000e+00> : vector<128x64xf32>
    %3 = tpu.matmul %1, %2, %cst {dimension_numbers = #tpu.dot_dimension_numbers<[1], [0], [0], [1], [0, 0, 1, 1], [], []>} : vector<128x21xbf16>, vector<21x64xbf16>, vector<128x64xf32> -> vector<128x64xf32>
    %c0_3 = arith.constant 0 : index
    %c0_4 = arith.constant 0 : index
    %4 = vector.load %arg2[%c0_3, %c0_4] : memref<16x128xf32, #tpu.memory_space<vmem>>, vector<1x64xf32>
    %5 = vector.broadcast %4 : vector<1x64xf32> to vector<128x64xf32>
    %6 = arith.addf %3, %5 : vector<128x64xf32>
    %cst_5 = arith.constant 0.000000e+00 : f32
    %7 = vector.broadcast %cst_5 : f32 to vector<128x64xf32>
    %8 = arith.maximumf %6, %7 : vector<128x64xf32>
    %cst_6 = arith.constant 0.000000e+00 : f32
    %9 = vector.broadcast %cst_6 : f32 to vector<1x64xf32>
    %c0_7 = arith.constant 0 : index
    %c0_8 = arith.constant 0 : index
    %10 = vector.load %arg6[%c0_7, %c0_8] : memref<128x128xf32, #tpu.memory_space<vmem>>, vector<1x64xf32>
    tpu.vector_store %arg6[%c0_7, %c0_8], %9 {strides = array<i32>} : memref<128x128xf32, #tpu.memory_space<vmem>>, vector<1x64xf32>,
    %11 = vector.extract_strided_slice %8 {offsets = [0, 0], sizes = [61, 64], strides = [1, 1]} : vector<128x64xf32> to vector<61x64xf32>
    %c1 = arith.constant 1 : index
    %c0_9 = arith.constant 0 : index
    %12 = vector.load %arg6[%c1, %c0_9] : memref<128x128xf32, #tpu.memory_space<vmem>>, vector<61x64xf32>
    tpu.vector_store %arg6[%c1, %c0_9], %11 {strides = array<i32>} : memref<128x128xf32, #tpu.memory_space<vmem>>, vector<61x64xf32>,
    %cst_10 = arith.constant 0.000000e+00 : f32
    %13 = vector.broadcast %cst_10 : f32 to vector<1x64xf32>
    %c62 = arith.constant 62 : index
    %c0_11 = arith.constant 0 : index
    %14 = vector.load %arg6[%c62, %c0_11] : memref<128x128xf32, #tpu.memory_space<vmem>>, vector<1x64xf32>
    tpu.vector_store %arg6[%c62, %c0_11], %13 {strides = array<i32>} : memref<128x128xf32, #tpu.memory_space<vmem>>, vector<1x64xf32>,
    %c0_12 = arith.constant 0 : index
    %c0_13 = arith.constant 0 : index
    %15 = tpu.strided_load %arg6[%c0_12, %c0_13] {strides = array<i32: 2, 1>} : memref<128x128xf32, #tpu.memory_space<vmem>>, vector<31x64xf32>
    %c1_14 = arith.constant 1 : index
    %c0_15 = arith.constant 0 : index
    %16 = tpu.strided_load %arg6[%c1_14, %c0_15] {strides = array<i32: 2, 1>} : memref<128x128xf32, #tpu.memory_space<vmem>>, vector<31x64xf32>
    %17 = arith.maximumf %15, %16 : vector<31x64xf32>
    %c2 = arith.constant 2 : index
    %c0_16 = arith.constant 0 : index
    %18 = tpu.strided_load %arg6[%c2, %c0_16] {strides = array<i32: 2, 1>} : memref<128x128xf32, #tpu.memory_space<vmem>>, vector<31x64xf32>
    %19 = arith.maximumf %17, %18 : vector<31x64xf32>
    %cst_17 = arith.constant 0.000000e+00 : f32
    %20 = vector.broadcast %cst_17 : f32 to vector<1x64xf32>
    %21 = tpu.concatenate %19, %20 in 0 : vector<31x64xf32>, vector<1x64xf32> -> vector<32x64xf32>
    %cst_18 = arith.constant 0.000000e+00 : f32
    %22 = vector.broadcast %cst_18 : f32 to vector<1x64xf32>
    %c64 = arith.constant 64 : index
    %c0_19 = arith.constant 0 : index
    %23 = vector.load %arg6[%c64, %c0_19] : memref<128x128xf32, #tpu.memory_space<vmem>>, vector<1x64xf32>
    tpu.vector_store %arg6[%c64, %c0_19], %22 {strides = array<i32>} : memref<128x128xf32, #tpu.memory_space<vmem>>, vector<1x64xf32>,
    %24 = vector.extract_strided_slice %8 {offsets = [64, 0], sizes = [61, 64], strides = [1, 1]} : vector<128x64xf32> to vector<61x64xf32>
    %c65 = arith.constant 65 : index
    %c0_20 = arith.constant 0 : index
    %25 = vector.load %arg6[%c65, %c0_20] : memref<128x128xf32, #tpu.memory_space<vmem>>, vector<61x64xf32>
    tpu.vector_store %arg6[%c65, %c0_20], %24 {strides = array<i32>} : memref<128x128xf32, #tpu.memory_space<vmem>>, vector<61x64xf32>,
    %cst_21 = arith.constant 0.000000e+00 : f32
    %26 = vector.broadcast %cst_21 : f32 to vector<1x64xf32>
    %c126 = arith.constant 126 : index
    %c0_22 = arith.constant 0 : index
    %27 = vector.load %arg6[%c126, %c0_22] : memref<128x128xf32, #tpu.memory_space<vmem>>, vector<1x64xf32>
    tpu.vector_store %arg6[%c126, %c0_22], %26 {strides = array<i32>} : memref<128x128xf32, #tpu.memory_space<vmem>>, vector<1x64xf32>,
    %c64_23 = arith.constant 64 : index
    %c0_24 = arith.constant 0 : index
    %28 = tpu.strided_load %arg6[%c64_23, %c0_24] {strides = array<i32: 2, 1>} : memref<128x128xf32, #tpu.memory_space<vmem>>, vector<31x64xf32>
    %c65_25 = arith.constant 65 : index
    %c0_26 = arith.constant 0 : index
    %29 = tpu.strided_load %arg6[%c65_25, %c0_26] {strides = array<i32: 2, 1>} : memref<128x128xf32, #tpu.memory_space<vmem>>, vector<31x64xf32>
    %30 = arith.maximumf %28, %29 : vector<31x64xf32>
    %c66 = arith.constant 66 : index
    %c0_27 = arith.constant 0 : index
    %31 = tpu.strided_load %arg6[%c66, %c0_27] {strides = array<i32: 2, 1>} : memref<128x128xf32, #tpu.memory_space<vmem>>, vector<31x64xf32>
    %32 = arith.maximumf %30, %31 : vector<31x64xf32>
    %cst_28 = arith.constant 0.000000e+00 : f32
    %33 = vector.broadcast %cst_28 : f32 to vector<1x64xf32>
    %34 = tpu.concatenate %32, %33 in 0 : vector<31x64xf32>, vector<1x64xf32> -> vector<32x64xf32>
    %35 = tpu.concatenate %21, %34 in 0 : vector<32x64xf32>, vector<32x64xf32> -> vector<64x64xf32>
    %cst_29 = arith.constant 0.000000e+00 : f32
    %36 = vector.broadcast %cst_29 : f32 to vector<2x64xf32>
    %cst_30 = arith.constant 0.000000e+00 : f32
    %37 = vector.broadcast %cst_30 : f32 to vector<3x64xf32>
    %38 = vector.extract_strided_slice %35 {offsets = [0, 0], sizes = [31, 64], strides = [1, 1]} : vector<64x64xf32> to vector<31x64xf32>
    %39 = tpu.concatenate %36, %38, %37 in 0 : vector<2x64xf32>, vector<31x64xf32>, vector<3x64xf32> -> vector<36x64xf32>
    %40 = arith.truncf %39 : vector<36x64xf32> to vector<36x64xbf16>
    %41 = vector.extract_strided_slice %40 {offsets = [0, 0], sizes = [32, 64], strides = [1, 1]} : vector<36x64xbf16> to vector<32x64xbf16>
    %c0_31 = arith.constant 0 : index
    %c0_32 = arith.constant 0 : index
    %42 = vector.load %arg5[%c0_31, %c0_32] : memref<64x640xbf16, #tpu.memory_space<vmem>>, vector<32x64xbf16>
    tpu.vector_store %arg5[%c0_31, %c0_32], %41 {strides = array<i32>} : memref<64x640xbf16, #tpu.memory_space<vmem>>, vector<32x64xbf16>,
    %43 = vector.extract_strided_slice %40 {offsets = [1, 0], sizes = [32, 64], strides = [1, 1]} : vector<36x64xbf16> to vector<32x64xbf16>
    %c0_33 = arith.constant 0 : index
    %c64_34 = arith.constant 64 : index
    %44 = vector.load %arg5[%c0_33, %c64_34] : memref<64x640xbf16, #tpu.memory_space<vmem>>, vector<32x64xbf16>
    tpu.vector_store %arg5[%c0_33, %c64_34], %43 {strides = array<i32>} : memref<64x640xbf16, #tpu.memory_space<vmem>>, vector<32x64xbf16>,
    %45 = vector.extract_strided_slice %40 {offsets = [2, 0], sizes = [32, 64], strides = [1, 1]} : vector<36x64xbf16> to vector<32x64xbf16>
    %c0_35 = arith.constant 0 : index
    %c128 = arith.constant 128 : index
    %46 = vector.load %arg5[%c0_35, %c128] : memref<64x640xbf16, #tpu.memory_space<vmem>>, vector<32x64xbf16>
    tpu.vector_store %arg5[%c0_35, %c128], %45 {strides = array<i32>} : memref<64x640xbf16, #tpu.memory_space<vmem>>, vector<32x64xbf16>,
    %47 = vector.extract_strided_slice %40 {offsets = [3, 0], sizes = [32, 64], strides = [1, 1]} : vector<36x64xbf16> to vector<32x64xbf16>
    %c0_36 = arith.constant 0 : index
    %c192 = arith.constant 192 : index
    %48 = vector.load %arg5[%c0_36, %c192] : memref<64x640xbf16, #tpu.memory_space<vmem>>, vector<32x64xbf16>
    tpu.vector_store %arg5[%c0_36, %c192], %47 {strides = array<i32>} : memref<64x640xbf16, #tpu.memory_space<vmem>>, vector<32x64xbf16>,
    %49 = vector.extract_strided_slice %40 {offsets = [4, 0], sizes = [32, 64], strides = [1, 1]} : vector<36x64xbf16> to vector<32x64xbf16>
    %c0_37 = arith.constant 0 : index
    %c256 = arith.constant 256 : index
    %50 = vector.load %arg5[%c0_37, %c256] : memref<64x640xbf16, #tpu.memory_space<vmem>>, vector<32x64xbf16>
    tpu.vector_store %arg5[%c0_37, %c256], %49 {strides = array<i32>} : memref<64x640xbf16, #tpu.memory_space<vmem>>, vector<32x64xbf16>,
    %51 = vector.extract_strided_slice %35 {offsets = [32, 0], sizes = [31, 64], strides = [1, 1]} : vector<64x64xf32> to vector<31x64xf32>
    %52 = tpu.concatenate %36, %51, %37 in 0 : vector<2x64xf32>, vector<31x64xf32>, vector<3x64xf32> -> vector<36x64xf32>
    %53 = arith.truncf %52 : vector<36x64xf32> to vector<36x64xbf16>
    %54 = vector.extract_strided_slice %53 {offsets = [0, 0], sizes = [32, 64], strides = [1, 1]} : vector<36x64xbf16> to vector<32x64xbf16>
    %c32 = arith.constant 32 : index
    %c0_38 = arith.constant 0 : index
    %55 = vector.load %arg5[%c32, %c0_38] : memref<64x640xbf16, #tpu.memory_space<vmem>>, vector<32x64xbf16>
    tpu.vector_store %arg5[%c32, %c0_38], %54 {strides = array<i32>} : memref<64x640xbf16, #tpu.memory_space<vmem>>, vector<32x64xbf16>,
    %56 = vector.extract_strided_slice %53 {offsets = [1, 0], sizes = [32, 64], strides = [1, 1]} : vector<36x64xbf16> to vector<32x64xbf16>
    %c32_39 = arith.constant 32 : index
    %c64_40 = arith.constant 64 : index
    %57 = vector.load %arg5[%c32_39, %c64_40] : memref<64x640xbf16, #tpu.memory_space<vmem>>, vector<32x64xbf16>
    tpu.vector_store %arg5[%c32_39, %c64_40], %56 {strides = array<i32>} : memref<64x640xbf16, #tpu.memory_space<vmem>>, vector<32x64xbf16>,
    %58 = vector.extract_strided_slice %53 {offsets = [2, 0], sizes = [32, 64], strides = [1, 1]} : vector<36x64xbf16> to vector<32x64xbf16>
    %c32_41 = arith.constant 32 : index
    %c128_42 = arith.constant 128 : index
    %59 = vector.load %arg5[%c32_41, %c128_42] : memref<64x640xbf16, #tpu.memory_space<vmem>>, vector<32x64xbf16>
    tpu.vector_store %arg5[%c32_41, %c128_42], %58 {strides = array<i32>} : memref<64x640xbf16, #tpu.memory_space<vmem>>, vector<32x64xbf16>,
    %60 = vector.extract_strided_slice %53 {offsets = [3, 0], sizes = [32, 64], strides = [1, 1]} : vector<36x64xbf16> to vector<32x64xbf16>
    %c32_43 = arith.constant 32 : index
    %c192_44 = arith.constant 192 : index
    %61 = vector.load %arg5[%c32_43, %c192_44] : memref<64x640xbf16, #tpu.memory_space<vmem>>, vector<32x64xbf16>
    tpu.vector_store %arg5[%c32_43, %c192_44], %60 {strides = array<i32>} : memref<64x640xbf16, #tpu.memory_space<vmem>>, vector<32x64xbf16>,
    %62 = vector.extract_strided_slice %53 {offsets = [4, 0], sizes = [32, 64], strides = [1, 1]} : vector<36x64xbf16> to vector<32x64xbf16>
    %c32_45 = arith.constant 32 : index
    %c256_46 = arith.constant 256 : index
    %63 = vector.load %arg5[%c32_45, %c256_46] : memref<64x640xbf16, #tpu.memory_space<vmem>>, vector<32x64xbf16>
    tpu.vector_store %arg5[%c32_45, %c256_46], %62 {strides = array<i32>} : memref<64x640xbf16, #tpu.memory_space<vmem>>, vector<32x64xbf16>,
    %c0_47 = arith.constant 0 : index
    %c0_48 = arith.constant 0 : index
    %64 = vector.load %arg5[%c0_47, %c0_48] : memref<64x640xbf16, #tpu.memory_space<vmem>>, vector<64x320xbf16>
    %c32_49 = arith.constant 32 : index
    %c0_50 = arith.constant 0 : index
    %65 = vector.load %arg1[%c32_49, %c0_50] : memref<3936x128xbf16, #tpu.memory_space<vmem>>, vector<320x64xbf16>
    %cst_51 = arith.constant dense<0.000000e+00> : vector<64x64xf32>
    %66 = tpu.matmul %64, %65, %cst_51 {dimension_numbers = #tpu.dot_dimension_numbers<[1], [0], [0], [1], [0, 0, 1, 1], [], []>} : vector<64x320xbf16>, vector<320x64xbf16>, vector<64x64xf32> -> vector<64x64xf32>
    %c1_52 = arith.constant 1 : index
    %c0_53 = arith.constant 0 : index
    %67 = vector.load %arg2[%c1_52, %c0_53] : memref<16x128xf32, #tpu.memory_space<vmem>>, vector<1x64xf32>
    %68 = vector.broadcast %67 : vector<1x64xf32> to vector<64x64xf32>
    %69 = arith.addf %66, %68 : vector<64x64xf32>
    %cst_54 = arith.constant 0.000000e+00 : f32
    %70 = vector.broadcast %cst_54 : f32 to vector<64x64xf32>
    %71 = arith.maximumf %69, %70 : vector<64x64xf32>
    %cst_55 = arith.constant 0.000000e+00 : f32
    %72 = vector.broadcast %cst_55 : f32 to vector<2x64xf32>
    %cst_56 = arith.constant 0.000000e+00 : f32
    %73 = vector.broadcast %cst_56 : f32 to vector<3x64xf32>
    %74 = vector.extract_strided_slice %71 {offsets = [0, 0], sizes = [31, 64], strides = [1, 1]} : vector<64x64xf32> to vector<31x64xf32>
    %75 = tpu.concatenate %72, %74, %73 in 0 : vector<2x64xf32>, vector<31x64xf32>, vector<3x64xf32> -> vector<36x64xf32>
    %76 = arith.truncf %75 : vector<36x64xf32> to vector<36x64xbf16>
    %77 = vector.extract_strided_slice %76 {offsets = [0, 0], sizes = [32, 64], strides = [1, 1]} : vector<36x64xbf16> to vector<32x64xbf16>
    %c0_57 = arith.constant 0 : index
    %c0_58 = arith.constant 0 : index
    %78 = vector.load %arg5[%c0_57, %c0_58] : memref<64x640xbf16, #tpu.memory_space<vmem>>, vector<32x64xbf16>
    tpu.vector_store %arg5[%c0_57, %c0_58], %77 {strides = array<i32>} : memref<64x640xbf16, #tpu.memory_space<vmem>>, vector<32x64xbf16>,
    %79 = vector.extract_strided_slice %76 {offsets = [1, 0], sizes = [32, 64], strides = [1, 1]} : vector<36x64xbf16> to vector<32x64xbf16>
    %c0_59 = arith.constant 0 : index
    %c64_60 = arith.constant 64 : index
    %80 = vector.load %arg5[%c0_59, %c64_60] : memref<64x640xbf16, #tpu.memory_space<vmem>>, vector<32x64xbf16>
    tpu.vector_store %arg5[%c0_59, %c64_60], %79 {strides = array<i32>} : memref<64x640xbf16, #tpu.memory_space<vmem>>, vector<32x64xbf16>,
    %81 = vector.extract_strided_slice %76 {offsets = [2, 0], sizes = [32, 64], strides = [1, 1]} : vector<36x64xbf16> to vector<32x64xbf16>
    %c0_61 = arith.constant 0 : index
    %c128_62 = arith.constant 128 : index
    %82 = vector.load %arg5[%c0_61, %c128_62] : memref<64x640xbf16, #tpu.memory_space<vmem>>, vector<32x64xbf16>
    tpu.vector_store %arg5[%c0_61, %c128_62], %81 {strides = array<i32>} : memref<64x640xbf16, #tpu.memory_space<vmem>>, vector<32x64xbf16>,
    %83 = vector.extract_strided_slice %76 {offsets = [3, 0], sizes = [32, 64], strides = [1, 1]} : vector<36x64xbf16> to vector<32x64xbf16>
    %c0_63 = arith.constant 0 : index
    %c192_64 = arith.constant 192 : index
    %84 = vector.load %arg5[%c0_63, %c192_64] : memref<64x640xbf16, #tpu.memory_space<vmem>>, vector<32x64xbf16>
    tpu.vector_store %arg5[%c0_63, %c192_64], %83 {strides = array<i32>} : memref<64x640xbf16, #tpu.memory_space<vmem>>, vector<32x64xbf16>,
    %85 = vector.extract_strided_slice %76 {offsets = [4, 0], sizes = [32, 64], strides = [1, 1]} : vector<36x64xbf16> to vector<32x64xbf16>
    %c0_65 = arith.constant 0 : index
    %c256_66 = arith.constant 256 : index
    %86 = vector.load %arg5[%c0_65, %c256_66] : memref<64x640xbf16, #tpu.memory_space<vmem>>, vector<32x64xbf16>
    tpu.vector_store %arg5[%c0_65, %c256_66], %85 {strides = array<i32>} : memref<64x640xbf16, #tpu.memory_space<vmem>>, vector<32x64xbf16>,
    %87 = vector.extract_strided_slice %71 {offsets = [32, 0], sizes = [31, 64], strides = [1, 1]} : vector<64x64xf32> to vector<31x64xf32>
    %88 = tpu.concatenate %72, %87, %73 in 0 : vector<2x64xf32>, vector<31x64xf32>, vector<3x64xf32> -> vector<36x64xf32>
    %89 = arith.truncf %88 : vector<36x64xf32> to vector<36x64xbf16>
    %90 = vector.extract_strided_slice %89 {offsets = [0, 0], sizes = [32, 64], strides = [1, 1]} : vector<36x64xbf16> to vector<32x64xbf16>
    %c32_67 = arith.constant 32 : index
    %c0_68 = arith.constant 0 : index
    %91 = vector.load %arg5[%c32_67, %c0_68] : memref<64x640xbf16, #tpu.memory_space<vmem>>, vector<32x64xbf16>
    tpu.vector_store %arg5[%c32_67, %c0_68], %90 {strides = array<i32>} : memref<64x640xbf16, #tpu.memory_space<vmem>>, vector<32x64xbf16>,
    %92 = vector.extract_strided_slice %89 {offsets = [1, 0], sizes = [32, 64], strides = [1, 1]} : vector<36x64xbf16> to vector<32x64xbf16>
    %c32_69 = arith.constant 32 : index
    %c64_70 = arith.constant 64 : index
    %93 = vector.load %arg5[%c32_69, %c64_70] : memref<64x640xbf16, #tpu.memory_space<vmem>>, vector<32x64xbf16>
    tpu.vector_store %arg5[%c32_69, %c64_70], %92 {strides = array<i32>} : memref<64x640xbf16, #tpu.memory_space<vmem>>, vector<32x64xbf16>,
    %94 = vector.extract_strided_slice %89 {offsets = [2, 0], sizes = [32, 64], strides = [1, 1]} : vector<36x64xbf16> to vector<32x64xbf16>
    %c32_71 = arith.constant 32 : index
    %c128_72 = arith.constant 128 : index
    %95 = vector.load %arg5[%c32_71, %c128_72] : memref<64x640xbf16, #tpu.memory_space<vmem>>, vector<32x64xbf16>
    tpu.vector_store %arg5[%c32_71, %c128_72], %94 {strides = array<i32>} : memref<64x640xbf16, #tpu.memory_space<vmem>>, vector<32x64xbf16>,
    %96 = vector.extract_strided_slice %89 {offsets = [3, 0], sizes = [32, 64], strides = [1, 1]} : vector<36x64xbf16> to vector<32x64xbf16>
    %c32_73 = arith.constant 32 : index
    %c192_74 = arith.constant 192 : index
    %97 = vector.load %arg5[%c32_73, %c192_74] : memref<64x640xbf16, #tpu.memory_space<vmem>>, vector<32x64xbf16>
    tpu.vector_store %arg5[%c32_73, %c192_74], %96 {strides = array<i32>} : memref<64x640xbf16, #tpu.memory_space<vmem>>, vector<32x64xbf16>,
    %98 = vector.extract_strided_slice %89 {offsets = [4, 0], sizes = [32, 64], strides = [1, 1]} : vector<36x64xbf16> to vector<32x64xbf16>
    %c32_75 = arith.constant 32 : index
    %c256_76 = arith.constant 256 : index
    %99 = vector.load %arg5[%c32_75, %c256_76] : memref<64x640xbf16, #tpu.memory_space<vmem>>, vector<32x64xbf16>
    tpu.vector_store %arg5[%c32_75, %c256_76], %98 {strides = array<i32>} : memref<64x640xbf16, #tpu.memory_space<vmem>>, vector<32x64xbf16>,
    %c0_77 = arith.constant 0 : index
    %c0_78 = arith.constant 0 : index
    %100 = vector.load %arg5[%c0_77, %c0_78] : memref<64x640xbf16, #tpu.memory_space<vmem>>, vector<64x320xbf16>
    %c352 = arith.constant 352 : index
    %c0_79 = arith.constant 0 : index
    %101 = vector.load %arg1[%c352, %c0_79] : memref<3936x128xbf16, #tpu.memory_space<vmem>>, vector<320x64xbf16>
    %cst_80 = arith.constant dense<0.000000e+00> : vector<64x64xf32>
    %102 = tpu.matmul %100, %101, %cst_80 {dimension_numbers = #tpu.dot_dimension_numbers<[1], [0], [0], [1], [0, 0, 1, 1], [], []>} : vector<64x320xbf16>, vector<320x64xbf16>, vector<64x64xf32> -> vector<64x64xf32>
    %c2_81 = arith.constant 2 : index
    %c0_82 = arith.constant 0 : index
    %103 = vector.load %arg2[%c2_81, %c0_82] : memref<16x128xf32, #tpu.memory_space<vmem>>, vector<1x64xf32>
    %104 = vector.broadcast %103 : vector<1x64xf32> to vector<64x64xf32>
    %105 = arith.addf %102, %104 : vector<64x64xf32>
    %106 = arith.addf %105, %35 : vector<64x64xf32>
    %cst_83 = arith.constant 0.000000e+00 : f32
    %107 = vector.broadcast %cst_83 : f32 to vector<64x64xf32>
    %108 = arith.maximumf %106, %107 : vector<64x64xf32>
    %cst_84 = arith.constant 0.000000e+00 : f32
    %109 = vector.broadcast %cst_84 : f32 to vector<2x64xf32>
    %cst_85 = arith.constant 0.000000e+00 : f32
    %110 = vector.broadcast %cst_85 : f32 to vector<3x64xf32>
    %111 = vector.extract_strided_slice %108 {offsets = [0, 0], sizes = [31, 64], strides = [1, 1]} : vector<64x64xf32> to vector<31x64xf32>
    %112 = tpu.concatenate %109, %111, %110 in 0 : vector<2x64xf32>, vector<31x64xf32>, vector<3x64xf32> -> vector<36x64xf32>
    %113 = arith.truncf %112 : vector<36x64xf32> to vector<36x64xbf16>
    %114 = vector.extract_strided_slice %113 {offsets = [0, 0], sizes = [32, 64], strides = [1, 1]} : vector<36x64xbf16> to vector<32x64xbf16>
    %c0_86 = arith.constant 0 : index
    %c0_87 = arith.constant 0 : index
    %115 = vector.load %arg5[%c0_86, %c0_87] : memref<64x640xbf16, #tpu.memory_space<vmem>>, vector<32x64xbf16>
    tpu.vector_store %arg5[%c0_86, %c0_87], %114 {strides = array<i32>} : memref<64x640xbf16, #tpu.memory_space<vmem>>, vector<32x64xbf16>,
    %116 = vector.extract_strided_slice %113 {offsets = [1, 0], sizes = [32, 64], strides = [1, 1]} : vector<36x64xbf16> to vector<32x64xbf16>
    %c0_88 = arith.constant 0 : index
    %c64_89 = arith.constant 64 : index
    %117 = vector.load %arg5[%c0_88, %c64_89] : memref<64x640xbf16, #tpu.memory_space<vmem>>, vector<32x64xbf16>
    tpu.vector_store %arg5[%c0_88, %c64_89], %116 {strides = array<i32>} : memref<64x640xbf16, #tpu.memory_space<vmem>>, vector<32x64xbf16>,
    %118 = vector.extract_strided_slice %113 {offsets = [2, 0], sizes = [32, 64], strides = [1, 1]} : vector<36x64xbf16> to vector<32x64xbf16>
    %c0_90 = arith.constant 0 : index
    %c128_91 = arith.constant 128 : index
    %119 = vector.load %arg5[%c0_90, %c128_91] : memref<64x640xbf16, #tpu.memory_space<vmem>>, vector<32x64xbf16>
    tpu.vector_store %arg5[%c0_90, %c128_91], %118 {strides = array<i32>} : memref<64x640xbf16, #tpu.memory_space<vmem>>, vector<32x64xbf16>,
    %120 = vector.extract_strided_slice %113 {offsets = [3, 0], sizes = [32, 64], strides = [1, 1]} : vector<36x64xbf16> to vector<32x64xbf16>
    %c0_92 = arith.constant 0 : index
    %c192_93 = arith.constant 192 : index
    %121 = vector.load %arg5[%c0_92, %c192_93] : memref<64x640xbf16, #tpu.memory_space<vmem>>, vector<32x64xbf16>
    tpu.vector_store %arg5[%c0_92, %c192_93], %120 {strides = array<i32>} : memref<64x640xbf16, #tpu.memory_space<vmem>>, vector<32x64xbf16>,
    %122 = vector.extract_strided_slice %113 {offsets = [4, 0], sizes = [32, 64], strides = [1, 1]} : vector<36x64xbf16> to vector<32x64xbf16>
    %c0_94 = arith.constant 0 : index
    %c256_95 = arith.constant 256 : index
    %123 = vector.load %arg5[%c0_94, %c256_95] : memref<64x640xbf16, #tpu.memory_space<vmem>>, vector<32x64xbf16>
    tpu.vector_store %arg5[%c0_94, %c256_95], %122 {strides = array<i32>} : memref<64x640xbf16, #tpu.memory_space<vmem>>, vector<32x64xbf16>,
    %124 = vector.extract_strided_slice %108 {offsets = [32, 0], sizes = [31, 64], strides = [1, 1]} : vector<64x64xf32> to vector<31x64xf32>
    %125 = tpu.concatenate %109, %124, %110 in 0 : vector<2x64xf32>, vector<31x64xf32>, vector<3x64xf32> -> vector<36x64xf32>
    %126 = arith.truncf %125 : vector<36x64xf32> to vector<36x64xbf16>
    %127 = vector.extract_strided_slice %126 {offsets = [0, 0], sizes = [32, 64], strides = [1, 1]} : vector<36x64xbf16> to vector<32x64xbf16>
    %c32_96 = arith.constant 32 : index
    %c0_97 = arith.constant 0 : index
    %128 = vector.load %arg5[%c32_96, %c0_97] : memref<64x640xbf16, #tpu.memory_space<vmem>>, vector<32x64xbf16>
    tpu.vector_store %arg5[%c32_96, %c0_97], %127 {strides = array<i32>} : memref<64x640xbf16, #tpu.memory_space<vmem>>, vector<32x64xbf16>,
    %129 = vector.extract_strided_slice %126 {offsets = [1, 0], sizes = [32, 64], strides = [1, 1]} : vector<36x64xbf16> to vector<32x64xbf16>
    %c32_98 = arith.constant 32 : index
    %c64_99 = arith.constant 64 : index
    %130 = vector.load %arg5[%c32_98, %c64_99] : memref<64x640xbf16, #tpu.memory_space<vmem>>, vector<32x64xbf16>
    tpu.vector_store %arg5[%c32_98, %c64_99], %129 {strides = array<i32>} : memref<64x640xbf16, #tpu.memory_space<vmem>>, vector<32x64xbf16>,
    %131 = vector.extract_strided_slice %126 {offsets = [2, 0], sizes = [32, 64], strides = [1, 1]} : vector<36x64xbf16> to vector<32x64xbf16>
    %c32_100 = arith.constant 32 : index
    %c128_101 = arith.constant 128 : index
    %132 = vector.load %arg5[%c32_100, %c128_101] : memref<64x640xbf16, #tpu.memory_space<vmem>>, vector<32x64xbf16>
    tpu.vector_store %arg5[%c32_100, %c128_101], %131 {strides = array<i32>} : memref<64x640xbf16, #tpu.memory_space<vmem>>, vector<32x64xbf16>,
    %133 = vector.extract_strided_slice %126 {offsets = [3, 0], sizes = [32, 64], strides = [1, 1]} : vector<36x64xbf16> to vector<32x64xbf16>
    %c32_102 = arith.constant 32 : index
    %c192_103 = arith.constant 192 : index
    %134 = vector.load %arg5[%c32_102, %c192_103] : memref<64x640xbf16, #tpu.memory_space<vmem>>, vector<32x64xbf16>
    tpu.vector_store %arg5[%c32_102, %c192_103], %133 {strides = array<i32>} : memref<64x640xbf16, #tpu.memory_space<vmem>>, vector<32x64xbf16>,
    %135 = vector.extract_strided_slice %126 {offsets = [4, 0], sizes = [32, 64], strides = [1, 1]} : vector<36x64xbf16> to vector<32x64xbf16>
    %c32_104 = arith.constant 32 : index
    %c256_105 = arith.constant 256 : index
    %136 = vector.load %arg5[%c32_104, %c256_105] : memref<64x640xbf16, #tpu.memory_space<vmem>>, vector<32x64xbf16>
    tpu.vector_store %arg5[%c32_104, %c256_105], %135 {strides = array<i32>} : memref<64x640xbf16, #tpu.memory_space<vmem>>, vector<32x64xbf16>,
    %c0_106 = arith.constant 0 : index
    %c0_107 = arith.constant 0 : index
    %137 = vector.load %arg5[%c0_106, %c0_107] : memref<64x640xbf16, #tpu.memory_space<vmem>>, vector<64x320xbf16>
    %c672 = arith.constant 672 : index
    %c0_108 = arith.constant 0 : index
    %138 = vector.load %arg1[%c672, %c0_108] : memref<3936x128xbf16, #tpu.memory_space<vmem>>, vector<320x64xbf16>
    %cst_109 = arith.constant dense<0.000000e+00> : vector<64x64xf32>
    %139 = tpu.matmul %137, %138, %cst_109 {dimension_numbers = #tpu.dot_dimension_numbers<[1], [0], [0], [1], [0, 0, 1, 1], [], []>} : vector<64x320xbf16>, vector<320x64xbf16>, vector<64x64xf32> -> vector<64x64xf32>
    %c3 = arith.constant 3 : index
    %c0_110 = arith.constant 0 : index
    %140 = vector.load %arg2[%c3, %c0_110] : memref<16x128xf32, #tpu.memory_space<vmem>>, vector<1x64xf32>
    %141 = vector.broadcast %140 : vector<1x64xf32> to vector<64x64xf32>
    %142 = arith.addf %139, %141 : vector<64x64xf32>
    %cst_111 = arith.constant 0.000000e+00 : f32
    %143 = vector.broadcast %cst_111 : f32 to vector<64x64xf32>
    %144 = arith.maximumf %142, %143 : vector<64x64xf32>
    %cst_112 = arith.constant 0.000000e+00 : f32
    %145 = vector.broadcast %cst_112 : f32 to vector<2x64xf32>
    %cst_113 = arith.constant 0.000000e+00 : f32
    %146 = vector.broadcast %cst_113 : f32 to vector<3x64xf32>
    %147 = vector.extract_strided_slice %144 {offsets = [0, 0], sizes = [31, 64], strides = [1, 1]} : vector<64x64xf32> to vector<31x64xf32>
    %148 = tpu.concatenate %145, %147, %146 in 0 : vector<2x64xf32>, vector<31x64xf32>, vector<3x64xf32> -> vector<36x64xf32>
    %149 = arith.truncf %148 : vector<36x64xf32> to vector<36x64xbf16>
    %150 = vector.extract_strided_slice %149 {offsets = [0, 0], sizes = [32, 64], strides = [1, 1]} : vector<36x64xbf16> to vector<32x64xbf16>
    %c0_114 = arith.constant 0 : index
    %c0_115 = arith.constant 0 : index
    %151 = vector.load %arg5[%c0_114, %c0_115] : memref<64x640xbf16, #tpu.memory_space<vmem>>, vector<32x64xbf16>
    tpu.vector_store %arg5[%c0_114, %c0_115], %150 {strides = array<i32>} : memref<64x640xbf16, #tpu.memory_space<vmem>>, vector<32x64xbf16>,
    %152 = vector.extract_strided_slice %149 {offsets = [1, 0], sizes = [32, 64], strides = [1, 1]} : vector<36x64xbf16> to vector<32x64xbf16>
    %c0_116 = arith.constant 0 : index
    %c64_117 = arith.constant 64 : index
    %153 = vector.load %arg5[%c0_116, %c64_117] : memref<64x640xbf16, #tpu.memory_space<vmem>>, vector<32x64xbf16>
    tpu.vector_store %arg5[%c0_116, %c64_117], %152 {strides = array<i32>} : memref<64x640xbf16, #tpu.memory_space<vmem>>, vector<32x64xbf16>,
    %154 = vector.extract_strided_slice %149 {offsets = [2, 0], sizes = [32, 64], strides = [1, 1]} : vector<36x64xbf16> to vector<32x64xbf16>
    %c0_118 = arith.constant 0 : index
    %c128_119 = arith.constant 128 : index
    %155 = vector.load %arg5[%c0_118, %c128_119] : memref<64x640xbf16, #tpu.memory_space<vmem>>, vector<32x64xbf16>
    tpu.vector_store %arg5[%c0_118, %c128_119], %154 {strides = array<i32>} : memref<64x640xbf16, #tpu.memory_space<vmem>>, vector<32x64xbf16>,
    %156 = vector.extract_strided_slice %149 {offsets = [3, 0], sizes = [32, 64], strides = [1, 1]} : vector<36x64xbf16> to vector<32x64xbf16>
    %c0_120 = arith.constant 0 : index
    %c192_121 = arith.constant 192 : index
    %157 = vector.load %arg5[%c0_120, %c192_121] : memref<64x640xbf16, #tpu.memory_space<vmem>>, vector<32x64xbf16>
    tpu.vector_store %arg5[%c0_120, %c192_121], %156 {strides = array<i32>} : memref<64x640xbf16, #tpu.memory_space<vmem>>, vector<32x64xbf16>,
    %158 = vector.extract_strided_slice %149 {offsets = [4, 0], sizes = [32, 64], strides = [1, 1]} : vector<36x64xbf16> to vector<32x64xbf16>
    %c0_122 = arith.constant 0 : index
    %c256_123 = arith.constant 256 : index
    %159 = vector.load %arg5[%c0_122, %c256_123] : memref<64x640xbf16, #tpu.memory_space<vmem>>, vector<32x64xbf16>
    tpu.vector_store %arg5[%c0_122, %c256_123], %158 {strides = array<i32>} : memref<64x640xbf16, #tpu.memory_space<vmem>>, vector<32x64xbf16>,
    %160 = vector.extract_strided_slice %144 {offsets = [32, 0], sizes = [31, 64], strides = [1, 1]} : vector<64x64xf32> to vector<31x64xf32>
    %161 = tpu.concatenate %145, %160, %146 in 0 : vector<2x64xf32>, vector<31x64xf32>, vector<3x64xf32> -> vector<36x64xf32>
    %162 = arith.truncf %161 : vector<36x64xf32> to vector<36x64xbf16>
    %163 = vector.extract_strided_slice %162 {offsets = [0, 0], sizes = [32, 64], strides = [1, 1]} : vector<36x64xbf16> to vector<32x64xbf16>
    %c32_124 = arith.constant 32 : index
    %c0_125 = arith.constant 0 : index
    %164 = vector.load %arg5[%c32_124, %c0_125] : memref<64x640xbf16, #tpu.memory_space<vmem>>, vector<32x64xbf16>
    tpu.vector_store %arg5[%c32_124, %c0_125], %163 {strides = array<i32>} : memref<64x640xbf16, #tpu.memory_space<vmem>>, vector<32x64xbf16>,
    %165 = vector.extract_strided_slice %162 {offsets = [1, 0], sizes = [32, 64], strides = [1, 1]} : vector<36x64xbf16> to vector<32x64xbf16>
    %c32_126 = arith.constant 32 : index
    %c64_127 = arith.constant 64 : index
    %166 = vector.load %arg5[%c32_126, %c64_127] : memref<64x640xbf16, #tpu.memory_space<vmem>>, vector<32x64xbf16>
    tpu.vector_store %arg5[%c32_126, %c64_127], %165 {strides = array<i32>} : memref<64x640xbf16, #tpu.memory_space<vmem>>, vector<32x64xbf16>,
    %167 = vector.extract_strided_slice %162 {offsets = [2, 0], sizes = [32, 64], strides = [1, 1]} : vector<36x64xbf16> to vector<32x64xbf16>
    %c32_128 = arith.constant 32 : index
    %c128_129 = arith.constant 128 : index
    %168 = vector.load %arg5[%c32_128, %c128_129] : memref<64x640xbf16, #tpu.memory_space<vmem>>, vector<32x64xbf16>
    tpu.vector_store %arg5[%c32_128, %c128_129], %167 {strides = array<i32>} : memref<64x640xbf16, #tpu.memory_space<vmem>>, vector<32x64xbf16>,
    %169 = vector.extract_strided_slice %162 {offsets = [3, 0], sizes = [32, 64], strides = [1, 1]} : vector<36x64xbf16> to vector<32x64xbf16>
    %c32_130 = arith.constant 32 : index
    %c192_131 = arith.constant 192 : index
    %170 = vector.load %arg5[%c32_130, %c192_131] : memref<64x640xbf16, #tpu.memory_space<vmem>>, vector<32x64xbf16>
    tpu.vector_store %arg5[%c32_130, %c192_131], %169 {strides = array<i32>} : memref<64x640xbf16, #tpu.memory_space<vmem>>, vector<32x64xbf16>,
    %171 = vector.extract_strided_slice %162 {offsets = [4, 0], sizes = [32, 64], strides = [1, 1]} : vector<36x64xbf16> to vector<32x64xbf16>
    %c32_132 = arith.constant 32 : index
    %c256_133 = arith.constant 256 : index
    %172 = vector.load %arg5[%c32_132, %c256_133] : memref<64x640xbf16, #tpu.memory_space<vmem>>, vector<32x64xbf16>
    tpu.vector_store %arg5[%c32_132, %c256_133], %171 {strides = array<i32>} : memref<64x640xbf16, #tpu.memory_space<vmem>>, vector<32x64xbf16>,
    %c0_134 = arith.constant 0 : index
    %c0_135 = arith.constant 0 : index
    %173 = vector.load %arg5[%c0_134, %c0_135] : memref<64x640xbf16, #tpu.memory_space<vmem>>, vector<64x320xbf16>
    %c992 = arith.constant 992 : index
    %c0_136 = arith.constant 0 : index
    %174 = vector.load %arg1[%c992, %c0_136] : memref<3936x128xbf16, #tpu.memory_space<vmem>>, vector<320x64xbf16>
    %cst_137 = arith.constant dense<0.000000e+00> : vector<64x64xf32>
    %175 = tpu.matmul %173, %174, %cst_137 {dimension_numbers = #tpu.dot_dimension_numbers<[1], [0], [0], [1], [0, 0, 1, 1], [], []>} : vector<64x320xbf16>, vector<320x64xbf16>, vector<64x64xf32> -> vector<64x64xf32>
    %c4 = arith.constant 4 : index
    %c0_138 = arith.constant 0 : index
    %176 = vector.load %arg2[%c4, %c0_138] : memref<16x128xf32, #tpu.memory_space<vmem>>, vector<1x64xf32>
    %177 = vector.broadcast %176 : vector<1x64xf32> to vector<64x64xf32>
    %178 = arith.addf %175, %177 : vector<64x64xf32>
    %179 = arith.addf %178, %108 : vector<64x64xf32>
    %cst_139 = arith.constant 0.000000e+00 : f32
    %180 = vector.broadcast %cst_139 : f32 to vector<64x64xf32>
    %181 = arith.maximumf %179, %180 : vector<64x64xf32>
    %cst_140 = arith.constant 0.000000e+00 : f32
    %182 = vector.broadcast %cst_140 : f32 to vector<2x64xf32>
    %c0_141 = arith.constant 0 : index
    %c0_142 = arith.constant 0 : index
    %183 = vector.load %arg6[%c0_141, %c0_142] : memref<128x128xf32, #tpu.memory_space<vmem>>, vector<2x64xf32>
    tpu.vector_store %arg6[%c0_141, %c0_142], %182 {strides = array<i32>} : memref<128x128xf32, #tpu.memory_space<vmem>>, vector<2x64xf32>,
    %184 = vector.extract_strided_slice %181 {offsets = [0, 0], sizes = [31, 64], strides = [1, 1]} : vector<64x64xf32> to vector<31x64xf32>
    %c2_143 = arith.constant 2 : index
    %c0_144 = arith.constant 0 : index
    %185 = vector.load %arg6[%c2_143, %c0_144] : memref<128x128xf32, #tpu.memory_space<vmem>>, vector<31x64xf32>
    tpu.vector_store %arg6[%c2_143, %c0_144], %184 {strides = array<i32>} : memref<128x128xf32, #tpu.memory_space<vmem>>, vector<31x64xf32>,
    %cst_145 = arith.constant 0.000000e+00 : f32
    %186 = vector.broadcast %cst_145 : f32 to vector<2x64xf32>
    %c33 = arith.constant 33 : index
    %c0_146 = arith.constant 0 : index
    %187 = vector.load %arg6[%c33, %c0_146] : memref<128x128xf32, #tpu.memory_space<vmem>>, vector<2x64xf32>
    tpu.vector_store %arg6[%c33, %c0_146], %186 {strides = array<i32>} : memref<128x128xf32, #tpu.memory_space<vmem>>, vector<2x64xf32>,
    %c0_147 = arith.constant 0 : index
    %c0_148 = arith.constant 0 : index
    %188 = tpu.strided_load %arg6[%c0_147, %c0_148] {strides = array<i32: 2, 1>} : memref<128x128xf32, #tpu.memory_space<vmem>>, vector<16x64xf32>
    %189 = arith.truncf %188 : vector<16x64xf32> to vector<16x64xbf16>
    %c0_149 = arith.constant 0 : index
    %c0_150 = arith.constant 0 : index
    %190 = vector.load %arg5[%c0_149, %c0_150] : memref<64x640xbf16, #tpu.memory_space<vmem>>, vector<16x64xbf16>
    tpu.vector_store %arg5[%c0_149, %c0_150], %189 {strides = array<i32>} : memref<64x640xbf16, #tpu.memory_space<vmem>>, vector<16x64xbf16>,
    %c1_151 = arith.constant 1 : index
    %c0_152 = arith.constant 0 : index
    %191 = tpu.strided_load %arg6[%c1_151, %c0_152] {strides = array<i32: 2, 1>} : memref<128x128xf32, #tpu.memory_space<vmem>>, vector<16x64xf32>
    %192 = arith.truncf %191 : vector<16x64xf32> to vector<16x64xbf16>
    %c0_153 = arith.constant 0 : index
    %c64_154 = arith.constant 64 : index
    %193 = vector.load %arg5[%c0_153, %c64_154] : memref<64x640xbf16, #tpu.memory_space<vmem>>, vector<16x64xbf16>
    tpu.vector_store %arg5[%c0_153, %c64_154], %192 {strides = array<i32>} : memref<64x640xbf16, #tpu.memory_space<vmem>>, vector<16x64xbf16>,
    %c2_155 = arith.constant 2 : index
    %c0_156 = arith.constant 0 : index
    %194 = tpu.strided_load %arg6[%c2_155, %c0_156] {strides = array<i32: 2, 1>} : memref<128x128xf32, #tpu.memory_space<vmem>>, vector<16x64xf32>
    %195 = arith.truncf %194 : vector<16x64xf32> to vector<16x64xbf16>
    %c0_157 = arith.constant 0 : index
    %c128_158 = arith.constant 128 : index
    %196 = vector.load %arg5[%c0_157, %c128_158] : memref<64x640xbf16, #tpu.memory_space<vmem>>, vector<16x64xbf16>
    tpu.vector_store %arg5[%c0_157, %c128_158], %195 {strides = array<i32>} : memref<64x640xbf16, #tpu.memory_space<vmem>>, vector<16x64xbf16>,
    %c3_159 = arith.constant 3 : index
    %c0_160 = arith.constant 0 : index
    %197 = tpu.strided_load %arg6[%c3_159, %c0_160] {strides = array<i32: 2, 1>} : memref<128x128xf32, #tpu.memory_space<vmem>>, vector<16x64xf32>
    %198 = arith.truncf %197 : vector<16x64xf32> to vector<16x64xbf16>
    %c0_161 = arith.constant 0 : index
    %c192_162 = arith.constant 192 : index
    %199 = vector.load %arg5[%c0_161, %c192_162] : memref<64x640xbf16, #tpu.memory_space<vmem>>, vector<16x64xbf16>
    tpu.vector_store %arg5[%c0_161, %c192_162], %198 {strides = array<i32>} : memref<64x640xbf16, #tpu.memory_space<vmem>>, vector<16x64xbf16>,
    %c4_163 = arith.constant 4 : index
    %c0_164 = arith.constant 0 : index
    %200 = tpu.strided_load %arg6[%c4_163, %c0_164] {strides = array<i32: 2, 1>} : memref<128x128xf32, #tpu.memory_space<vmem>>, vector<16x64xf32>
    %201 = arith.truncf %200 : vector<16x64xf32> to vector<16x64xbf16>
    %c0_165 = arith.constant 0 : index
    %c256_166 = arith.constant 256 : index
    %202 = vector.load %arg5[%c0_165, %c256_166] : memref<64x640xbf16, #tpu.memory_space<vmem>>, vector<16x64xbf16>
    tpu.vector_store %arg5[%c0_165, %c256_166], %201 {strides = array<i32>} : memref<64x640xbf16, #tpu.memory_space<vmem>>, vector<16x64xbf16>,
    %cst_167 = arith.constant 0.000000e+00 : f32
    %203 = vector.broadcast %cst_167 : f32 to vector<2x64xf32>
    %c64_168 = arith.constant 64 : index
    %c0_169 = arith.constant 0 : index
    %204 = vector.load %arg6[%c64_168, %c0_169] : memref<128x128xf32, #tpu.memory_space<vmem>>, vector<2x64xf32>
    tpu.vector_store %arg6[%c64_168, %c0_169], %203 {strides = array<i32>} : memref<128x128xf32, #tpu.memory_space<vmem>>, vector<2x64xf32>,
    %205 = vector.extract_strided_slice %181 {offsets = [32, 0], sizes = [31, 64], strides = [1, 1]} : vector<64x64xf32> to vector<31x64xf32>
    %c66_170 = arith.constant 66 : index
    %c0_171 = arith.constant 0 : index
    %206 = vector.load %arg6[%c66_170, %c0_171] : memref<128x128xf32, #tpu.memory_space<vmem>>, vector<31x64xf32>
    tpu.vector_store %arg6[%c66_170, %c0_171], %205 {strides = array<i32>} : memref<128x128xf32, #tpu.memory_space<vmem>>, vector<31x64xf32>,
    %cst_172 = arith.constant 0.000000e+00 : f32
    %207 = vector.broadcast %cst_172 : f32 to vector<2x64xf32>
    %c97 = arith.constant 97 : index
    %c0_173 = arith.constant 0 : index
    %208 = vector.load %arg6[%c97, %c0_173] : memref<128x128xf32, #tpu.memory_space<vmem>>, vector<2x64xf32>
    tpu.vector_store %arg6[%c97, %c0_173], %207 {strides = array<i32>} : memref<128x128xf32, #tpu.memory_space<vmem>>, vector<2x64xf32>,
    %c64_174 = arith.constant 64 : index
    %c0_175 = arith.constant 0 : index
    %209 = tpu.strided_load %arg6[%c64_174, %c0_175] {strides = array<i32: 2, 1>} : memref<128x128xf32, #tpu.memory_space<vmem>>, vector<16x64xf32>
    %210 = arith.truncf %209 : vector<16x64xf32> to vector<16x64xbf16>
    %c16 = arith.constant 16 : index
    %c0_176 = arith.constant 0 : index
    %211 = vector.load %arg5[%c16, %c0_176] : memref<64x640xbf16, #tpu.memory_space<vmem>>, vector<16x64xbf16>
    tpu.vector_store %arg5[%c16, %c0_176], %210 {strides = array<i32>} : memref<64x640xbf16, #tpu.memory_space<vmem>>, vector<16x64xbf16>,
    %c65_177 = arith.constant 65 : index
    %c0_178 = arith.constant 0 : index
    %212 = tpu.strided_load %arg6[%c65_177, %c0_178] {strides = array<i32: 2, 1>} : memref<128x128xf32, #tpu.memory_space<vmem>>, vector<16x64xf32>
    %213 = arith.truncf %212 : vector<16x64xf32> to vector<16x64xbf16>
    %c16_179 = arith.constant 16 : index
    %c64_180 = arith.constant 64 : index
    %214 = vector.load %arg5[%c16_179, %c64_180] : memref<64x640xbf16, #tpu.memory_space<vmem>>, vector<16x64xbf16>
    tpu.vector_store %arg5[%c16_179, %c64_180], %213 {strides = array<i32>} : memref<64x640xbf16, #tpu.memory_space<vmem>>, vector<16x64xbf16>,
    %c66_181 = arith.constant 66 : index
    %c0_182 = arith.constant 0 : index
    %215 = tpu.strided_load %arg6[%c66_181, %c0_182] {strides = array<i32: 2, 1>} : memref<128x128xf32, #tpu.memory_space<vmem>>, vector<16x64xf32>
    %216 = arith.truncf %215 : vector<16x64xf32> to vector<16x64xbf16>
    %c16_183 = arith.constant 16 : index
    %c128_184 = arith.constant 128 : index
    %217 = vector.load %arg5[%c16_183, %c128_184] : memref<64x640xbf16, #tpu.memory_space<vmem>>, vector<16x64xbf16>
    tpu.vector_store %arg5[%c16_183, %c128_184], %216 {strides = array<i32>} : memref<64x640xbf16, #tpu.memory_space<vmem>>, vector<16x64xbf16>,
    %c67 = arith.constant 67 : index
    %c0_185 = arith.constant 0 : index
    %218 = tpu.strided_load %arg6[%c67, %c0_185] {strides = array<i32: 2, 1>} : memref<128x128xf32, #tpu.memory_space<vmem>>, vector<16x64xf32>
    %219 = arith.truncf %218 : vector<16x64xf32> to vector<16x64xbf16>
    %c16_186 = arith.constant 16 : index
    %c192_187 = arith.constant 192 : index
    %220 = vector.load %arg5[%c16_186, %c192_187] : memref<64x640xbf16, #tpu.memory_space<vmem>>, vector<16x64xbf16>
    tpu.vector_store %arg5[%c16_186, %c192_187], %219 {strides = array<i32>} : memref<64x640xbf16, #tpu.memory_space<vmem>>, vector<16x64xbf16>,
    %c68 = arith.constant 68 : index
    %c0_188 = arith.constant 0 : index
    %221 = tpu.strided_load %arg6[%c68, %c0_188] {strides = array<i32: 2, 1>} : memref<128x128xf32, #tpu.memory_space<vmem>>, vector<16x64xf32>
    %222 = arith.truncf %221 : vector<16x64xf32> to vector<16x64xbf16>
    %c16_189 = arith.constant 16 : index
    %c256_190 = arith.constant 256 : index
    %223 = vector.load %arg5[%c16_189, %c256_190] : memref<64x640xbf16, #tpu.memory_space<vmem>>, vector<16x64xbf16>
    tpu.vector_store %arg5[%c16_189, %c256_190], %222 {strides = array<i32>} : memref<64x640xbf16, #tpu.memory_space<vmem>>, vector<16x64xbf16>,
    %c0_191 = arith.constant 0 : index
    %c0_192 = arith.constant 0 : index
    %224 = vector.load %arg5[%c0_191, %c0_192] : memref<64x640xbf16, #tpu.memory_space<vmem>>, vector<32x320xbf16>
    %c1312 = arith.constant 1312 : index
    %c0_193 = arith.constant 0 : index
    %225 = vector.load %arg1[%c1312, %c0_193] : memref<3936x128xbf16, #tpu.memory_space<vmem>>, vector<320x128xbf16>
    %cst_194 = arith.constant dense<0.000000e+00> : vector<32x128xf32>
    %226 = tpu.matmul %224, %225, %cst_194 {dimension_numbers = #tpu.dot_dimension_numbers<[1], [0], [0], [1], [0, 0, 1, 1], [], []>} : vector<32x320xbf16>, vector<320x128xbf16>, vector<32x128xf32> -> vector<32x128xf32>
    %c5 = arith.constant 5 : index
    %c0_195 = arith.constant 0 : index
    %227 = vector.load %arg2[%c5, %c0_195] : memref<16x128xf32, #tpu.memory_space<vmem>>, vector<1x128xf32>
    %228 = vector.broadcast %227 : vector<1x128xf32> to vector<32x128xf32>
    %229 = arith.addf %226, %228 : vector<32x128xf32>
    %cst_196 = arith.constant 0.000000e+00 : f32
    %230 = vector.broadcast %cst_196 : f32 to vector<32x128xf32>
    %231 = arith.maximumf %229, %230 : vector<32x128xf32>
    %c0_197 = arith.constant 0 : index
    %c128_198 = arith.constant 128 : index
    %232 = vector.load %arg5[%c0_197, %c128_198] : memref<64x640xbf16, #tpu.memory_space<vmem>>, vector<32x64xbf16>
    %c2272 = arith.constant 2272 : index
    %c0_199 = arith.constant 0 : index
    %233 = vector.load %arg1[%c2272, %c0_199] : memref<3936x128xbf16, #tpu.memory_space<vmem>>, vector<64x128xbf16>
    %cst_200 = arith.constant dense<0.000000e+00> : vector<32x128xf32>
    %234 = tpu.matmul %232, %233, %cst_200 {dimension_numbers = #tpu.dot_dimension_numbers<[1], [0], [0], [1], [0, 0, 1, 1], [], []>} : vector<32x64xbf16>, vector<64x128xbf16>, vector<32x128xf32> -> vector<32x128xf32>
    %c7 = arith.constant 7 : index
    %c0_201 = arith.constant 0 : index
    %235 = vector.load %arg2[%c7, %c0_201] : memref<16x128xf32, #tpu.memory_space<vmem>>, vector<1x128xf32>
    %236 = vector.broadcast %235 : vector<1x128xf32> to vector<32x128xf32>
    %237 = arith.addf %234, %236 : vector<32x128xf32>
    %cst_202 = arith.constant 0.000000e+00 : f32
    %238 = vector.broadcast %cst_202 : f32 to vector<2x128xf32>
    %cst_203 = arith.constant 0.000000e+00 : f32
    %239 = vector.broadcast %cst_203 : f32 to vector<2x128xf32>
    %240 = vector.extract_strided_slice %231 {offsets = [0, 0], sizes = [16, 128], strides = [1, 1]} : vector<32x128xf32> to vector<16x128xf32>
    %241 = tpu.concatenate %238, %240, %239 in 0 : vector<2x128xf32>, vector<16x128xf32>, vector<2x128xf32> -> vector<20x128xf32>
    %242 = arith.truncf %241 : vector<20x128xf32> to vector<20x128xbf16>
    %243 = vector.extract_strided_slice %242 {offsets = [0, 0], sizes = [16, 128], strides = [1, 1]} : vector<20x128xbf16> to vector<16x128xbf16>
    %c0_204 = arith.constant 0 : index
    %c0_205 = arith.constant 0 : index
    %244 = vector.load %arg5[%c0_204, %c0_205] : memref<64x640xbf16, #tpu.memory_space<vmem>>, vector<16x128xbf16>
    tpu.vector_store %arg5[%c0_204, %c0_205], %243 {strides = array<i32>} : memref<64x640xbf16, #tpu.memory_space<vmem>>, vector<16x128xbf16>,
    %245 = vector.extract_strided_slice %242 {offsets = [1, 0], sizes = [16, 128], strides = [1, 1]} : vector<20x128xbf16> to vector<16x128xbf16>
    %c0_206 = arith.constant 0 : index
    %c128_207 = arith.constant 128 : index
    %246 = vector.load %arg5[%c0_206, %c128_207] : memref<64x640xbf16, #tpu.memory_space<vmem>>, vector<16x128xbf16>
    tpu.vector_store %arg5[%c0_206, %c128_207], %245 {strides = array<i32>} : memref<64x640xbf16, #tpu.memory_space<vmem>>, vector<16x128xbf16>,
    %247 = vector.extract_strided_slice %242 {offsets = [2, 0], sizes = [16, 128], strides = [1, 1]} : vector<20x128xbf16> to vector<16x128xbf16>
    %c0_208 = arith.constant 0 : index
    %c256_209 = arith.constant 256 : index
    %248 = vector.load %arg5[%c0_208, %c256_209] : memref<64x640xbf16, #tpu.memory_space<vmem>>, vector<16x128xbf16>
    tpu.vector_store %arg5[%c0_208, %c256_209], %247 {strides = array<i32>} : memref<64x640xbf16, #tpu.memory_space<vmem>>, vector<16x128xbf16>,
    %249 = vector.extract_strided_slice %242 {offsets = [3, 0], sizes = [16, 128], strides = [1, 1]} : vector<20x128xbf16> to vector<16x128xbf16>
    %c0_210 = arith.constant 0 : index
    %c384 = arith.constant 384 : index
    %250 = vector.load %arg5[%c0_210, %c384] : memref<64x640xbf16, #tpu.memory_space<vmem>>, vector<16x128xbf16>
    tpu.vector_store %arg5[%c0_210, %c384], %249 {strides = array<i32>} : memref<64x640xbf16, #tpu.memory_space<vmem>>, vector<16x128xbf16>,
    %251 = vector.extract_strided_slice %242 {offsets = [4, 0], sizes = [16, 128], strides = [1, 1]} : vector<20x128xbf16> to vector<16x128xbf16>
    %c0_211 = arith.constant 0 : index
    %c512 = arith.constant 512 : index
    %252 = vector.load %arg5[%c0_211, %c512] : memref<64x640xbf16, #tpu.memory_space<vmem>>, vector<16x128xbf16>
    tpu.vector_store %arg5[%c0_211, %c512], %251 {strides = array<i32>} : memref<64x640xbf16, #tpu.memory_space<vmem>>, vector<16x128xbf16>,
    %253 = vector.extract_strided_slice %231 {offsets = [16, 0], sizes = [16, 128], strides = [1, 1]} : vector<32x128xf32> to vector<16x128xf32>
    %254 = tpu.concatenate %238, %253, %239 in 0 : vector<2x128xf32>, vector<16x128xf32>, vector<2x128xf32> -> vector<20x128xf32>
    %255 = arith.truncf %254 : vector<20x128xf32> to vector<20x128xbf16>
    %256 = vector.extract_strided_slice %255 {offsets = [0, 0], sizes = [16, 128], strides = [1, 1]} : vector<20x128xbf16> to vector<16x128xbf16>
    %c16_212 = arith.constant 16 : index
    %c0_213 = arith.constant 0 : index
    %257 = vector.load %arg5[%c16_212, %c0_213] : memref<64x640xbf16, #tpu.memory_space<vmem>>, vector<16x128xbf16>
    tpu.vector_store %arg5[%c16_212, %c0_213], %256 {strides = array<i32>} : memref<64x640xbf16, #tpu.memory_space<vmem>>, vector<16x128xbf16>,
    %258 = vector.extract_strided_slice %255 {offsets = [1, 0], sizes = [16, 128], strides = [1, 1]} : vector<20x128xbf16> to vector<16x128xbf16>
    %c16_214 = arith.constant 16 : index
    %c128_215 = arith.constant 128 : index
    %259 = vector.load %arg5[%c16_214, %c128_215] : memref<64x640xbf16, #tpu.memory_space<vmem>>, vector<16x128xbf16>
    tpu.vector_store %arg5[%c16_214, %c128_215], %258 {strides = array<i32>} : memref<64x640xbf16, #tpu.memory_space<vmem>>, vector<16x128xbf16>,
    %260 = vector.extract_strided_slice %255 {offsets = [2, 0], sizes = [16, 128], strides = [1, 1]} : vector<20x128xbf16> to vector<16x128xbf16>
    %c16_216 = arith.constant 16 : index
    %c256_217 = arith.constant 256 : index
    %261 = vector.load %arg5[%c16_216, %c256_217] : memref<64x640xbf16, #tpu.memory_space<vmem>>, vector<16x128xbf16>
    tpu.vector_store %arg5[%c16_216, %c256_217], %260 {strides = array<i32>} : memref<64x640xbf16, #tpu.memory_space<vmem>>, vector<16x128xbf16>,
    %262 = vector.extract_strided_slice %255 {offsets = [3, 0], sizes = [16, 128], strides = [1, 1]} : vector<20x128xbf16> to vector<16x128xbf16>
    %c16_218 = arith.constant 16 : index
    %c384_219 = arith.constant 384 : index
    %263 = vector.load %arg5[%c16_218, %c384_219] : memref<64x640xbf16, #tpu.memory_space<vmem>>, vector<16x128xbf16>
    tpu.vector_store %arg5[%c16_218, %c384_219], %262 {strides = array<i32>} : memref<64x640xbf16, #tpu.memory_space<vmem>>, vector<16x128xbf16>,
    %264 = vector.extract_strided_slice %255 {offsets = [4, 0], sizes = [16, 128], strides = [1, 1]} : vector<20x128xbf16> to vector<16x128xbf16>
    %c16_220 = arith.constant 16 : index
    %c512_221 = arith.constant 512 : index
    %265 = vector.load %arg5[%c16_220, %c512_221] : memref<64x640xbf16, #tpu.memory_space<vmem>>, vector<16x128xbf16>
    tpu.vector_store %arg5[%c16_220, %c512_221], %264 {strides = array<i32>} : memref<64x640xbf16, #tpu.memory_space<vmem>>, vector<16x128xbf16>,
    %c0_222 = arith.constant 0 : index
    %c0_223 = arith.constant 0 : index
    %266 = vector.load %arg5[%c0_222, %c0_223] : memref<64x640xbf16, #tpu.memory_space<vmem>>, vector<32x640xbf16>
    %c1632 = arith.constant 1632 : index
    %c0_224 = arith.constant 0 : index
    %267 = vector.load %arg1[%c1632, %c0_224] : memref<3936x128xbf16, #tpu.memory_space<vmem>>, vector<640x128xbf16>
    %cst_225 = arith.constant dense<0.000000e+00> : vector<32x128xf32>
    %268 = tpu.matmul %266, %267, %cst_225 {dimension_numbers = #tpu.dot_dimension_numbers<[1], [0], [0], [1], [0, 0, 1, 1], [], []>} : vector<32x640xbf16>, vector<640x128xbf16>, vector<32x128xf32> -> vector<32x128xf32>
    %c6 = arith.constant 6 : index
    %c0_226 = arith.constant 0 : index
    %269 = vector.load %arg2[%c6, %c0_226] : memref<16x128xf32, #tpu.memory_space<vmem>>, vector<1x128xf32>
    %270 = vector.broadcast %269 : vector<1x128xf32> to vector<32x128xf32>
    %271 = arith.addf %268, %270 : vector<32x128xf32>
    %272 = arith.addf %271, %237 : vector<32x128xf32>
    %cst_227 = arith.constant 0.000000e+00 : f32
    %273 = vector.broadcast %cst_227 : f32 to vector<32x128xf32>
    %274 = arith.maximumf %272, %273 : vector<32x128xf32>
    %cst_228 = arith.constant 0.000000e+00 : f32
    %275 = vector.broadcast %cst_228 : f32 to vector<2x128xf32>
    %cst_229 = arith.constant 0.000000e+00 : f32
    %276 = vector.broadcast %cst_229 : f32 to vector<2x128xf32>
    %277 = vector.extract_strided_slice %274 {offsets = [0, 0], sizes = [16, 128], strides = [1, 1]} : vector<32x128xf32> to vector<16x128xf32>
    %278 = tpu.concatenate %275, %277, %276 in 0 : vector<2x128xf32>, vector<16x128xf32>, vector<2x128xf32> -> vector<20x128xf32>
    %279 = arith.truncf %278 : vector<20x128xf32> to vector<20x128xbf16>
    %280 = vector.extract_strided_slice %279 {offsets = [0, 0], sizes = [16, 128], strides = [1, 1]} : vector<20x128xbf16> to vector<16x128xbf16>
    %c0_230 = arith.constant 0 : index
    %c0_231 = arith.constant 0 : index
    %281 = vector.load %arg5[%c0_230, %c0_231] : memref<64x640xbf16, #tpu.memory_space<vmem>>, vector<16x128xbf16>
    tpu.vector_store %arg5[%c0_230, %c0_231], %280 {strides = array<i32>} : memref<64x640xbf16, #tpu.memory_space<vmem>>, vector<16x128xbf16>,
    %282 = vector.extract_strided_slice %279 {offsets = [1, 0], sizes = [16, 128], strides = [1, 1]} : vector<20x128xbf16> to vector<16x128xbf16>
    %c0_232 = arith.constant 0 : index
    %c128_233 = arith.constant 128 : index
    %283 = vector.load %arg5[%c0_232, %c128_233] : memref<64x640xbf16, #tpu.memory_space<vmem>>, vector<16x128xbf16>
    tpu.vector_store %arg5[%c0_232, %c128_233], %282 {strides = array<i32>} : memref<64x640xbf16, #tpu.memory_space<vmem>>, vector<16x128xbf16>,
    %284 = vector.extract_strided_slice %279 {offsets = [2, 0], sizes = [16, 128], strides = [1, 1]} : vector<20x128xbf16> to vector<16x128xbf16>
    %c0_234 = arith.constant 0 : index
    %c256_235 = arith.constant 256 : index
    %285 = vector.load %arg5[%c0_234, %c256_235] : memref<64x640xbf16, #tpu.memory_space<vmem>>, vector<16x128xbf16>
    tpu.vector_store %arg5[%c0_234, %c256_235], %284 {strides = array<i32>} : memref<64x640xbf16, #tpu.memory_space<vmem>>, vector<16x128xbf16>,
    %286 = vector.extract_strided_slice %279 {offsets = [3, 0], sizes = [16, 128], strides = [1, 1]} : vector<20x128xbf16> to vector<16x128xbf16>
    %c0_236 = arith.constant 0 : index
    %c384_237 = arith.constant 384 : index
    %287 = vector.load %arg5[%c0_236, %c384_237] : memref<64x640xbf16, #tpu.memory_space<vmem>>, vector<16x128xbf16>
    tpu.vector_store %arg5[%c0_236, %c384_237], %286 {strides = array<i32>} : memref<64x640xbf16, #tpu.memory_space<vmem>>, vector<16x128xbf16>,
    %288 = vector.extract_strided_slice %279 {offsets = [4, 0], sizes = [16, 128], strides = [1, 1]} : vector<20x128xbf16> to vector<16x128xbf16>
    %c0_238 = arith.constant 0 : index
    %c512_239 = arith.constant 512 : index
    %289 = vector.load %arg5[%c0_238, %c512_239] : memref<64x640xbf16, #tpu.memory_space<vmem>>, vector<16x128xbf16>
    tpu.vector_store %arg5[%c0_238, %c512_239], %288 {strides = array<i32>} : memref<64x640xbf16, #tpu.memory_space<vmem>>, vector<16x128xbf16>,
    %290 = vector.extract_strided_slice %274 {offsets = [16, 0], sizes = [16, 128], strides = [1, 1]} : vector<32x128xf32> to vector<16x128xf32>
    %291 = tpu.concatenate %275, %290, %276 in 0 : vector<2x128xf32>, vector<16x128xf32>, vector<2x128xf32> -> vector<20x128xf32>
    %292 = arith.truncf %291 : vector<20x128xf32> to vector<20x128xbf16>
    %293 = vector.extract_strided_slice %292 {offsets = [0, 0], sizes = [16, 128], strides = [1, 1]} : vector<20x128xbf16> to vector<16x128xbf16>
    %c16_240 = arith.constant 16 : index
    %c0_241 = arith.constant 0 : index
    %294 = vector.load %arg5[%c16_240, %c0_241] : memref<64x640xbf16, #tpu.memory_space<vmem>>, vector<16x128xbf16>
    tpu.vector_store %arg5[%c16_240, %c0_241], %293 {strides = array<i32>} : memref<64x640xbf16, #tpu.memory_space<vmem>>, vector<16x128xbf16>,
    %295 = vector.extract_strided_slice %292 {offsets = [1, 0], sizes = [16, 128], strides = [1, 1]} : vector<20x128xbf16> to vector<16x128xbf16>
    %c16_242 = arith.constant 16 : index
    %c128_243 = arith.constant 128 : index
    %296 = vector.load %arg5[%c16_242, %c128_243] : memref<64x640xbf16, #tpu.memory_space<vmem>>, vector<16x128xbf16>
    tpu.vector_store %arg5[%c16_242, %c128_243], %295 {strides = array<i32>} : memref<64x640xbf16, #tpu.memory_space<vmem>>, vector<16x128xbf16>,
    %297 = vector.extract_strided_slice %292 {offsets = [2, 0], sizes = [16, 128], strides = [1, 1]} : vector<20x128xbf16> to vector<16x128xbf16>
    %c16_244 = arith.constant 16 : index
    %c256_245 = arith.constant 256 : index
    %298 = vector.load %arg5[%c16_244, %c256_245] : memref<64x640xbf16, #tpu.memory_space<vmem>>, vector<16x128xbf16>
    tpu.vector_store %arg5[%c16_244, %c256_245], %297 {strides = array<i32>} : memref<64x640xbf16, #tpu.memory_space<vmem>>, vector<16x128xbf16>,
    %299 = vector.extract_strided_slice %292 {offsets = [3, 0], sizes = [16, 128], strides = [1, 1]} : vector<20x128xbf16> to vector<16x128xbf16>
    %c16_246 = arith.constant 16 : index
    %c384_247 = arith.constant 384 : index
    %300 = vector.load %arg5[%c16_246, %c384_247] : memref<64x640xbf16, #tpu.memory_space<vmem>>, vector<16x128xbf16>
    tpu.vector_store %arg5[%c16_246, %c384_247], %299 {strides = array<i32>} : memref<64x640xbf16, #tpu.memory_space<vmem>>, vector<16x128xbf16>,
    %301 = vector.extract_strided_slice %292 {offsets = [4, 0], sizes = [16, 128], strides = [1, 1]} : vector<20x128xbf16> to vector<16x128xbf16>
    %c16_248 = arith.constant 16 : index
    %c512_249 = arith.constant 512 : index
    %302 = vector.load %arg5[%c16_248, %c512_249] : memref<64x640xbf16, #tpu.memory_space<vmem>>, vector<16x128xbf16>
    tpu.vector_store %arg5[%c16_248, %c512_249], %301 {strides = array<i32>} : memref<64x640xbf16, #tpu.memory_space<vmem>>, vector<16x128xbf16>,
    %c0_250 = arith.constant 0 : index
    %c0_251 = arith.constant 0 : index
    %303 = vector.load %arg5[%c0_250, %c0_251] : memref<64x640xbf16, #tpu.memory_space<vmem>>, vector<32x640xbf16>
    %c2336 = arith.constant 2336 : index
    %c0_252 = arith.constant 0 : index
    %304 = vector.load %arg1[%c2336, %c0_252] : memref<3936x128xbf16, #tpu.memory_space<vmem>>, vector<640x128xbf16>
    %cst_253 = arith.constant dense<0.000000e+00> : vector<32x128xf32>
    %305 = tpu.matmul %303, %304, %cst_253 {dimension_numbers = #tpu.dot_dimension_numbers<[1], [0], [0], [1], [0, 0, 1, 1], [], []>} : vector<32x640xbf16>, vector<640x128xbf16>, vector<32x128xf32> -> vector<32x128xf32>
    %c8 = arith.constant 8 : index
    %c0_254 = arith.constant 0 : index
    %306 = vector.load %arg2[%c8, %c0_254] : memref<16x128xf32, #tpu.memory_space<vmem>>, vector<1x128xf32>
    %307 = vector.broadcast %306 : vector<1x128xf32> to vector<32x128xf32>
    %308 = arith.addf %305, %307 : vector<32x128xf32>
    %cst_255 = arith.constant 0.000000e+00 : f32
    %309 = vector.broadcast %cst_255 : f32 to vector<32x128xf32>
    %310 = arith.maximumf %308, %309 : vector<32x128xf32>
    %cst_256 = arith.constant 0.000000e+00 : f32
    %311 = vector.broadcast %cst_256 : f32 to vector<2x128xf32>
    %cst_257 = arith.constant 0.000000e+00 : f32
    %312 = vector.broadcast %cst_257 : f32 to vector<2x128xf32>
    %313 = vector.extract_strided_slice %310 {offsets = [0, 0], sizes = [16, 128], strides = [1, 1]} : vector<32x128xf32> to vector<16x128xf32>
    %314 = tpu.concatenate %311, %313, %312 in 0 : vector<2x128xf32>, vector<16x128xf32>, vector<2x128xf32> -> vector<20x128xf32>
    %315 = arith.truncf %314 : vector<20x128xf32> to vector<20x128xbf16>
    %316 = vector.extract_strided_slice %315 {offsets = [0, 0], sizes = [16, 128], strides = [1, 1]} : vector<20x128xbf16> to vector<16x128xbf16>
    %c0_258 = arith.constant 0 : index
    %c0_259 = arith.constant 0 : index
    %317 = vector.load %arg5[%c0_258, %c0_259] : memref<64x640xbf16, #tpu.memory_space<vmem>>, vector<16x128xbf16>
    tpu.vector_store %arg5[%c0_258, %c0_259], %316 {strides = array<i32>} : memref<64x640xbf16, #tpu.memory_space<vmem>>, vector<16x128xbf16>,
    %318 = vector.extract_strided_slice %315 {offsets = [1, 0], sizes = [16, 128], strides = [1, 1]} : vector<20x128xbf16> to vector<16x128xbf16>
    %c0_260 = arith.constant 0 : index
    %c128_261 = arith.constant 128 : index
    %319 = vector.load %arg5[%c0_260, %c128_261] : memref<64x640xbf16, #tpu.memory_space<vmem>>, vector<16x128xbf16>
    tpu.vector_store %arg5[%c0_260, %c128_261], %318 {strides = array<i32>} : memref<64x640xbf16, #tpu.memory_space<vmem>>, vector<16x128xbf16>,
    %320 = vector.extract_strided_slice %315 {offsets = [2, 0], sizes = [16, 128], strides = [1, 1]} : vector<20x128xbf16> to vector<16x128xbf16>
    %c0_262 = arith.constant 0 : index
    %c256_263 = arith.constant 256 : index
    %321 = vector.load %arg5[%c0_262, %c256_263] : memref<64x640xbf16, #tpu.memory_space<vmem>>, vector<16x128xbf16>
    tpu.vector_store %arg5[%c0_262, %c256_263], %320 {strides = array<i32>} : memref<64x640xbf16, #tpu.memory_space<vmem>>, vector<16x128xbf16>,
    %322 = vector.extract_strided_slice %315 {offsets = [3, 0], sizes = [16, 128], strides = [1, 1]} : vector<20x128xbf16> to vector<16x128xbf16>
    %c0_264 = arith.constant 0 : index
    %c384_265 = arith.constant 384 : index
    %323 = vector.load %arg5[%c0_264, %c384_265] : memref<64x640xbf16, #tpu.memory_space<vmem>>, vector<16x128xbf16>
    tpu.vector_store %arg5[%c0_264, %c384_265], %322 {strides = array<i32>} : memref<64x640xbf16, #tpu.memory_space<vmem>>, vector<16x128xbf16>,
    %324 = vector.extract_strided_slice %315 {offsets = [4, 0], sizes = [16, 128], strides = [1, 1]} : vector<20x128xbf16> to vector<16x128xbf16>
    %c0_266 = arith.constant 0 : index
    %c512_267 = arith.constant 512 : index
    %325 = vector.load %arg5[%c0_266, %c512_267] : memref<64x640xbf16, #tpu.memory_space<vmem>>, vector<16x128xbf16>
    tpu.vector_store %arg5[%c0_266, %c512_267], %324 {strides = array<i32>} : memref<64x640xbf16, #tpu.memory_space<vmem>>, vector<16x128xbf16>,
    %326 = vector.extract_strided_slice %310 {offsets = [16, 0], sizes = [16, 128], strides = [1, 1]} : vector<32x128xf32> to vector<16x128xf32>
    %327 = tpu.concatenate %311, %326, %312 in 0 : vector<2x128xf32>, vector<16x128xf32>, vector<2x128xf32> -> vector<20x128xf32>
    %328 = arith.truncf %327 : vector<20x128xf32> to vector<20x128xbf16>
    %329 = vector.extract_strided_slice %328 {offsets = [0, 0], sizes = [16, 128], strides = [1, 1]} : vector<20x128xbf16> to vector<16x128xbf16>
    %c16_268 = arith.constant 16 : index
    %c0_269 = arith.constant 0 : index
    %330 = vector.load %arg5[%c16_268, %c0_269] : memref<64x640xbf16, #tpu.memory_space<vmem>>, vector<16x128xbf16>
    tpu.vector_store %arg5[%c16_268, %c0_269], %329 {strides = array<i32>} : memref<64x640xbf16, #tpu.memory_space<vmem>>, vector<16x128xbf16>,
    %331 = vector.extract_strided_slice %328 {offsets = [1, 0], sizes = [16, 128], strides = [1, 1]} : vector<20x128xbf16> to vector<16x128xbf16>
    %c16_270 = arith.constant 16 : index
    %c128_271 = arith.constant 128 : index
    %332 = vector.load %arg5[%c16_270, %c128_271] : memref<64x640xbf16, #tpu.memory_space<vmem>>, vector<16x128xbf16>
    tpu.vector_store %arg5[%c16_270, %c128_271], %331 {strides = array<i32>} : memref<64x640xbf16, #tpu.memory_space<vmem>>, vector<16x128xbf16>,
    %333 = vector.extract_strided_slice %328 {offsets = [2, 0], sizes = [16, 128], strides = [1, 1]} : vector<20x128xbf16> to vector<16x128xbf16>
    %c16_272 = arith.constant 16 : index
    %c256_273 = arith.constant 256 : index
    %334 = vector.load %arg5[%c16_272, %c256_273] : memref<64x640xbf16, #tpu.memory_space<vmem>>, vector<16x128xbf16>
    tpu.vector_store %arg5[%c16_272, %c256_273], %333 {strides = array<i32>} : memref<64x640xbf16, #tpu.memory_space<vmem>>, vector<16x128xbf16>,
    %335 = vector.extract_strided_slice %328 {offsets = [3, 0], sizes = [16, 128], strides = [1, 1]} : vector<20x128xbf16> to vector<16x128xbf16>
    %c16_274 = arith.constant 16 : index
    %c384_275 = arith.constant 384 : index
    %336 = vector.load %arg5[%c16_274, %c384_275] : memref<64x640xbf16, #tpu.memory_space<vmem>>, vector<16x128xbf16>
    tpu.vector_store %arg5[%c16_274, %c384_275], %335 {strides = array<i32>} : memref<64x640xbf16, #tpu.memory_space<vmem>>, vector<16x128xbf16>,
    %337 = vector.extract_strided_slice %328 {offsets = [4, 0], sizes = [16, 128], strides = [1, 1]} : vector<20x128xbf16> to vector<16x128xbf16>
    %c16_276 = arith.constant 16 : index
    %c512_277 = arith.constant 512 : index
    %338 = vector.load %arg5[%c16_276, %c512_277] : memref<64x640xbf16, #tpu.memory_space<vmem>>, vector<16x128xbf16>
    tpu.vector_store %arg5[%c16_276, %c512_277], %337 {strides = array<i32>} : memref<64x640xbf16, #tpu.memory_space<vmem>>, vector<16x128xbf16>,
    %c0_278 = arith.constant 0 : index
    %c0_279 = arith.constant 0 : index
    %339 = vector.load %arg5[%c0_278, %c0_279] : memref<64x640xbf16, #tpu.memory_space<vmem>>, vector<32x640xbf16>
    %c2976 = arith.constant 2976 : index
    %c0_280 = arith.constant 0 : index
    %340 = vector.load %arg1[%c2976, %c0_280] : memref<3936x128xbf16, #tpu.memory_space<vmem>>, vector<640x128xbf16>
    %cst_281 = arith.constant dense<0.000000e+00> : vector<32x128xf32>
    %341 = tpu.matmul %339, %340, %cst_281 {dimension_numbers = #tpu.dot_dimension_numbers<[1], [0], [0], [1], [0, 0, 1, 1], [], []>} : vector<32x640xbf16>, vector<640x128xbf16>, vector<32x128xf32> -> vector<32x128xf32>
    %c9 = arith.constant 9 : index
    %c0_282 = arith.constant 0 : index
    %342 = vector.load %arg2[%c9, %c0_282] : memref<16x128xf32, #tpu.memory_space<vmem>>, vector<1x128xf32>
    %343 = vector.broadcast %342 : vector<1x128xf32> to vector<32x128xf32>
    %344 = arith.addf %341, %343 : vector<32x128xf32>
    %345 = arith.addf %344, %274 : vector<32x128xf32>
    %cst_283 = arith.constant 0.000000e+00 : f32
    %346 = vector.broadcast %cst_283 : f32 to vector<32x128xf32>
    %347 = arith.maximumf %345, %346 : vector<32x128xf32>
    %348 = vector.extract_strided_slice %347 {offsets = [0, 0], sizes = [16, 128], strides = [1, 1]} : vector<32x128xf32> to vector<16x128xf32>
    %cst_284 = arith.constant dense<0.000000e+00> : vector<128xf32>
    %349 = vector.multi_reduction <add>, %348, %cst_284 [0] : vector<16x128xf32> to vector<128xf32>
    %350 = vector.shape_cast %349 : vector<128xf32> to vector<1x128xf32>
    %cst_285 = arith.constant 1.600000e+01 : f32
    %351 = vector.broadcast %cst_285 : f32 to vector<1x128xf32>
    %352 = arith.divf %350, %351 : vector<1x128xf32>
    %353 = vector.extract_strided_slice %347 {offsets = [16, 0], sizes = [16, 128], strides = [1, 1]} : vector<32x128xf32> to vector<16x128xf32>
    %cst_286 = arith.constant dense<0.000000e+00> : vector<128xf32>
    %354 = vector.multi_reduction <add>, %353, %cst_286 [0] : vector<16x128xf32> to vector<128xf32>
    %355 = vector.shape_cast %354 : vector<128xf32> to vector<1x128xf32>
    %cst_287 = arith.constant 1.600000e+01 : f32
    %356 = vector.broadcast %cst_287 : f32 to vector<1x128xf32>
    %357 = arith.divf %355, %356 : vector<1x128xf32>
    %358 = tpu.concatenate %352, %357 in 0 : vector<1x128xf32>, vector<1x128xf32> -> vector<2x128xf32>
    %359 = arith.truncf %358 : vector<2x128xf32> to vector<2x128xbf16>
    %c3616 = arith.constant 3616 : index
    %c0_288 = arith.constant 0 : index
    %360 = vector.load %arg1[%c3616, %c0_288] : memref<3936x128xbf16, #tpu.memory_space<vmem>>, vector<128x100xbf16>
    %cst_289 = arith.constant dense<0.000000e+00> : vector<2x100xf32>
    %361 = tpu.matmul %359, %360, %cst_289 {dimension_numbers = #tpu.dot_dimension_numbers<[1], [0], [0], [1], [0, 0, 1, 1], [], []>} : vector<2x128xbf16>, vector<128x100xbf16>, vector<2x100xf32> -> vector<2x100xf32>
    %c10 = arith.constant 10 : index
    %c0_290 = arith.constant 0 : index
    %362 = vector.load %arg2[%c10, %c0_290] : memref<16x128xf32, #tpu.memory_space<vmem>>, vector<1x100xf32>
    %363 = vector.broadcast %362 : vector<1x100xf32> to vector<2x100xf32>
    %364 = arith.addf %361, %363 : vector<2x100xf32>
    %365 = arith.truncf %364 : vector<2x100xf32> to vector<2x100xbf16>
    %c3744 = arith.constant 3744 : index
    %c0_291 = arith.constant 0 : index
    %366 = vector.load %arg1[%c3744, %c0_291] : memref<3936x128xbf16, #tpu.memory_space<vmem>>, vector<100x3xbf16>
    %cst_292 = arith.constant dense<0.000000e+00> : vector<2x3xf32>
    %367 = tpu.matmul %365, %366, %cst_292 {dimension_numbers = #tpu.dot_dimension_numbers<[1], [0], [0], [1], [0, 0, 1, 1], [], []>} : vector<2x100xbf16>, vector<100x3xbf16>, vector<2x3xf32> -> vector<2x3xf32>
    %c11 = arith.constant 11 : index
    %c0_293 = arith.constant 0 : index
    %368 = vector.load %arg2[%c11, %c0_293] : memref<16x128xf32, #tpu.memory_space<vmem>>, vector<1x3xf32>
    %369 = vector.broadcast %368 : vector<1x3xf32> to vector<2x3xf32>
    %370 = arith.addf %367, %369 : vector<2x3xf32>
    %c0_294 = arith.constant 0 : index
    %c0_295 = arith.constant 0 : index
    %371 = vector.load %arg4[%c0_294, %c0_295] : memref<2x3xf32, #tpu.memory_space<vmem>>, vector<2x3xf32>
    tpu.vector_store %arg4[%c0_294, %c0_295], %370 {strides = array<i32>} : memref<2x3xf32, #tpu.memory_space<vmem>>, vector<2x3xf32>,
    %372 = arith.truncf %370 : vector<2x3xf32> to vector<2x3xbf16>
    %c3856 = arith.constant 3856 : index
    %c0_296 = arith.constant 0 : index
    %373 = vector.load %arg1[%c3856, %c0_296] : memref<3936x128xbf16, #tpu.memory_space<vmem>>, vector<3x20xbf16>
    %cst_297 = arith.constant dense<0.000000e+00> : vector<2x20xf32>
    %374 = tpu.matmul %372, %373, %cst_297 {dimension_numbers = #tpu.dot_dimension_numbers<[1], [0], [0], [1], [0, 0, 1, 1], [], []>} : vector<2x3xbf16>, vector<3x20xbf16>, vector<2x20xf32> -> vector<2x20xf32>
    %c12 = arith.constant 12 : index
    %c0_298 = arith.constant 0 : index
    %375 = vector.load %arg2[%c12, %c0_298] : memref<16x128xf32, #tpu.memory_space<vmem>>, vector<1x20xf32>
    %376 = vector.broadcast %375 : vector<1x20xf32> to vector<2x20xf32>
    %377 = arith.addf %374, %376 : vector<2x20xf32>
    %378 = math.tanh %377 : vector<2x20xf32>
    %379 = arith.truncf %378 : vector<2x20xf32> to vector<2x20xbf16>
    %c3872 = arith.constant 3872 : index
    %c0_299 = arith.constant 0 : index
    %380 = vector.load %arg1[%c3872, %c0_299] : memref<3936x128xbf16, #tpu.memory_space<vmem>>, vector<20x20xbf16>
    %cst_300 = arith.constant dense<0.000000e+00> : vector<2x20xf32>
    %381 = tpu.matmul %379, %380, %cst_300 {dimension_numbers = #tpu.dot_dimension_numbers<[1], [0], [0], [1], [0, 0, 1, 1], [], []>} : vector<2x20xbf16>, vector<20x20xbf16>, vector<2x20xf32> -> vector<2x20xf32>
    %c13 = arith.constant 13 : index
    %c0_301 = arith.constant 0 : index
    %382 = vector.load %arg2[%c13, %c0_301] : memref<16x128xf32, #tpu.memory_space<vmem>>, vector<1x20xf32>
    %383 = vector.broadcast %382 : vector<1x20xf32> to vector<2x20xf32>
    %384 = arith.addf %381, %383 : vector<2x20xf32>
    %385 = math.tanh %384 : vector<2x20xf32>
    %386 = arith.truncf %385 : vector<2x20xf32> to vector<2x20xbf16>
    %c3904 = arith.constant 3904 : index
    %c0_302 = arith.constant 0 : index
    %387 = vector.load %arg1[%c3904, %c0_302] : memref<3936x128xbf16, #tpu.memory_space<vmem>>, vector<20x10xbf16>
    %cst_303 = arith.constant dense<0.000000e+00> : vector<2x10xf32>
    %388 = tpu.matmul %386, %387, %cst_303 {dimension_numbers = #tpu.dot_dimension_numbers<[1], [0], [0], [1], [0, 0, 1, 1], [], []>} : vector<2x20xbf16>, vector<20x10xbf16>, vector<2x10xf32> -> vector<2x10xf32>
    %c14 = arith.constant 14 : index
    %c0_304 = arith.constant 0 : index
    %389 = vector.load %arg2[%c14, %c0_304] : memref<16x128xf32, #tpu.memory_space<vmem>>, vector<1x10xf32>
    %390 = vector.broadcast %389 : vector<1x10xf32> to vector<2x10xf32>
    %391 = arith.addf %388, %390 : vector<2x10xf32>
    %c0_305 = arith.constant 0 : index
    %c0_306 = arith.constant 0 : index
    %392 = vector.load %arg3[%c0_305, %c0_306] : memref<2x10xf32, #tpu.memory_space<vmem>>, vector<2x10xf32>
    tpu.vector_store %arg3[%c0_305, %c0_306], %391 {strides = array<i32>} : memref<2x10xf32, #tpu.memory_space<vmem>>, vector<2x10xf32>,
    return
  }
}

</mosaic_0001>

<bundles_post_ra>
// kernel: similarity_embedding_forward.1
= control target key start
LH: loop header
LB: loop body
LE: loop exit
PB: predicated region body
PF: predicated region fallthrough
CT: control target
= control target key end

     0   :  { %10 = vsyncpa [#allocation5], 0  ;;  %s9744_s0 = inlined_call_operand.vmem [shape: f32[128,21], index: 0, kind: input, shape index: {}]   ;;  %s9745_s1 = inlined_call_operand.hbm [shape: bf16[3936,128], index: 1, kind: input, shape index: {}]   ;;  %s9746_s2 = inlined_call_operand.vmem [shape: f32[16,128], index: 2, kind: input, shape index: {}]   ;;  %s9747_s3 = inlined_call_operand.hbm [shape: f32[2,10], index: 3, kind: output, shape index: {0}]   ;;  %s9748_s4 = inlined_call_operand.hbm [shape: f32[2,3], index: 4, kind: output, shape index: {1}]  }
   0x1   :  { %11 = vsyncpa [#allocation6], 0 }
   0x2   :  { %12 = vsyncpa [#allocation9], 0  ;;  %s8269_s15 = smov [#allocation4]  }
   0x3   :  { %s20_s16 = sshll.u32 %s8269_s15, 4  ;;  %s21_s16 = int_to_ptr.vmem [resolvable:$true] %s20_s16 }
   0x4   :  { %s8211_s17 = scalar_lea.vmem %s21_s16, 31488  ;;  %p8216_p1 = scmp.lt.s32.totalorder %s21_s16, %s21_s16 }
   0x5   :  { %p8212_p0 = scmp.ne.s32.totalorder %s21_s16, %s8211_s17  ;;  %p8217_p2 = scmp.lt.s32.totalorder %s8211_s17, %s8211_s17 }
   0x7   :  { %p8218_p3 = por %p8217_p2, %p8216_p1 }
   0x9   :  { %p8219_p4 = pnand %p8218_p3, %p8212_p0 }
   0xb   :  { %8222 = shalt.err (!%p8219_p4)
}
   0xc   :  { %s8270_s18 = smov 64   ;;  %s8271_s19 = smov 4  }
   0xd   :  { %26 = dma.hbm_to_vmem [thread:$0]  %s9745_s1, 31488, %s21_s16, [#allocation5], %s8270_s18, %s8270_s18, %s8271_s19  }
   0xe   :  { %8263 = dma.done.wait [#allocation5], 31488  }
   0xf   :  { %8264 = vsyncadd [#allocation5], 4294935808  ;;  %vm99_vm0 = vcmask 1041408   ;;  %vm100_vm1 = vcmask 1042432   ;;  %v8272_v0 = vmov 65535   ;;  %v33_v4 = vld [vmem:[%s9744_s0] sm:$0xff] }
  0x10   :  { %v101_v1 = vsel %vm99_vm0, 4294967295, %v8272_v0  ;;  %v7862_v3 = vld [vmem:[#allocation4 + $0x8] ss:$0 sps:$4 sm:$0x77]   ;;  %v7863_v6 = vld [vmem:[#allocation4] sm:$0xff]   ;;  %vm74_vm2 = vcmask 171008  }
  0x11   :  { %v102_v2 = vsel %vm100_vm1, %v101_v1, 0  ;;  %v34_v7 = vld [vmem:[%s9744_s0 + $0x8] sm:$0xff]  ;;  %v35_v9 = vld [vmem:[%s9744_s0 + $0x10] sm:$0xff]  ;;  %v36_v10 = vld [vmem:[%s9744_s0 + $0x18] sm:$0xff]  ;;  %vm219_vm3 = vcmask 516096   ;;  %v8273_v30 = vmov 0.0  }
  0x12   :  { %v104_v5 = vand.u32 %v7862_v3, %v102_v2  ;;  %v49_v8 = vpack.c.bf16 %v34_v7, %v33_v4  ;;  %v37_v11 = vld [vmem:[%s9744_s0 + $0x20] sm:$0xff]  ;;  %v38_v12 = vld [vmem:[%s9744_s0 + $0x28] sm:$0xff]  ;;  %v50_v13 = vpack.c.bf16 %v36_v10, %v35_v9  ;;  %v39_v15 = vld [vmem:[%s9744_s0 + $0x30] sm:$0xff]  ;;  %220 = vst.msk [vmem:[#allocation3] sm:$0x1] %vm219_vm3, %v8273_v30  ;;  %vm221_vm4 = vcmask 523264  }
  0x13   :  { %v51_v14 = vpack.c.bf16 %v38_v12, %v37_v11  ;;  %v40_v16 = vld [vmem:[%s9744_s0 + $0x38] sm:$0xff]  ;;  %v41_v17 = vld [vmem:[%s9744_s0 + $0x40] sm:$0xff]  ;;  %v42_v18 = vld [vmem:[%s9744_s0 + $0x48] sm:$0xff]  ;;  %231 = vst.msk [vmem:[#allocation3 + $0x3e] sm:$0x1] %vm219_vm3, %v8273_v30  ;;  %vm229_vm5 = vcmask 520192  }
  0x14   :  { %7626 = vmatprep.subr.bf16.mxu0 %v104_v5  ;;  %7630 = vmatprep.mubr.msk.bf16.mxu0 %vm74_vm2, %v49_v8  ;;  %v52_v19 = vpack.c.bf16 %v40_v16, %v39_v15  ;;  %v53_v20 = vpack.c.bf16 %v42_v18, %v41_v17  ;;  %v43_v21 = vld [vmem:[%s9744_s0 + $0x50] sm:$0xff]  ;;  %v44_v22 = vld [vmem:[%s9744_s0 + $0x58] sm:$0xff]  ;;  %v45_v23 = vld [vmem:[%s9744_s0 + $0x60] sm:$0xff]  ;;  %265 = vst.msk [vmem:[#allocation3 + $0x40] sm:$0x1] %vm219_vm3, %v8273_v30  ;;  %vm344_vm6 = vcmask 519168  }
  0x15   :  { %7627 = vmatpush3.bf16.msra.mxu0 %v104_v5  ;;  %v46_v24 = vld [vmem:[%s9744_s0 + $0x68] sm:$0xff]  ;;  %v54_v25 = vpack.c.bf16 %v44_v22, %v43_v21  ;;  %v47_v27 = vld [vmem:[%s9744_s0 + $0x70] sm:$0xff]  ;;  %v48_v28 = vld [vmem:[%s9744_s0 + $0x78] sm:$0xff]  ;;  %274 = vst.msk [vmem:[#allocation3 + $0x7e] sm:$0x1] %vm219_vm3, %v8273_v30  ;;  %vm485_vm7 = vcmask 1045508  }
  0x16   :  { %7628 = vmatprep.subr.bf16.mxu0 %v7863_v6  ;;  %v55_v26 = vpack.c.bf16 %v46_v24, %v45_v23  ;;  %v56_v29 = vpack.c.bf16 %v48_v28, %v47_v27  ;;  %v7864_v31 = vld [vmem:[#allocation4 + $0xa8] sm:$0xff]   ;;  %v7865_v32 = vld [vmem:[#allocation4 + $0xa0] sm:$0xff]   ;;  %v7866_v33 = vld [vmem:[#allocation4 + $0x98] sm:$0xff]   ;;  %vm440_vm8 = vsmask.f32 2304  ;;  %vm417_vm11 = vcmask 1046532  }
  0x17   :  { %v7867_v34 = vld [vmem:[#allocation4 + $0x90] sm:$0xff]   ;;  %v7872_v35 = vld [vmem:[#allocation4 + $0x88] sm:$0xff]   ;;  %v7874_v37 = vld [vmem:[#allocation4 + $0x80] sm:$0xff]   ;;  %vm441_vm9 = vsmask.f32 6416  ;;  %vm263_vm13 = vcmask 1046528  }
  0x18   :  { %v7873_v36 = vld [vmem:[#allocation4 + $0x48] sm:$0xff]   ;;  %7171 = vmatprep.subr.bf16.mxu1 %v7872_v35  ;;  %v7875_v38 = vld [vmem:[#allocation4 + $0x40] sm:$0xff]   ;;  %v7876_v39 = vld [vmem:[#allocation4 + $0x78] sm:$0xff]   ;;  %vm352_vm10 = vsmask.f32 3328  ;;  %vm325_vm15 = vcmask 1040384  }
  0x19   :  { %7629 = vmatpush3.bf16.msra.mxu0 %v7863_v6  ;;  %7172 = vmatpush3.bf16.msra.mxu1 %v7873_v36  ;;  %v7877_v40 = vld [vmem:[#allocation4 + $0x38] sm:$0xff]   ;;  %v7878_v41 = vld [vmem:[#allocation4 + $0x70] sm:$0xff]   ;;  %v8373_v43 = vld [vmem:[%s9746_s2] ss:$0 sm:$0xff]  ;;  %vm353_vm12 = vsmask.f32 7440 }
  0x1a   :  { %7646 = vmatprep.subr.bf16.mxu0 %v7864_v31  ;;  %7173 = vmatprep.subr.bf16.mxu1 %v7874_v37  ;;  %v7879_v42 = vld [vmem:[#allocation4 + $0x30] sm:$0xff]   ;;  %vm8421_vm14 = vmor %vm99_vm0, %vm485_vm7  ;;  %vm3383_vm7 = vcmask 517120   ;;  %s8275_s0 = smov [#allocation8]  }
  0x1b   :  { %vm8454_vm3 = vmor %vm352_vm10, %vm353_vm12  ;;  %vm6388_vm10 = vcmask 23552   ;;  %s6586_s27 = sshll.u32 %s8275_s0, 4  ;;  %s6587_s27 = int_to_ptr.vmem [resolvable:$true] %s6586_s27 }
  0x1c   :  { %7631 = vmatmul.mubr.msk.bf16.vlgmr.msra.gmra.mxu0 %vm74_vm2, %v50_v13  ;;  %s8223_s28 = scalar_lea.vmem %s6587_s27, 32  ;;  %p8228_p6 = scmp.lt.s32.totalorder %s6587_s27, %s6587_s27 }
  0x1d   :  { %7634 = vmatprep.mubr.msk.bf16.mxu0 %vm74_vm2, %v51_v14  ;;  %7647 = vmatpush3.bf16.msra.mxu0 %v7864_v31  ;;  %p8224_p5 = scmp.ne.s32.totalorder %s6587_s27, %s8223_s28  ;;  %p8229_p7 = scmp.lt.s32.totalorder %s8223_s28, %s8223_s28 }
  0x1e   :  { %7648 = vmatprep.subr.bf16.mxu0 %v7865_v32  ;;  %7174 = vmatpush3.bf16.msra.mxu1 %v7875_v38 }
  0x1f   :  { %7175 = vmatprep.subr.bf16.mxu1 %v7876_v39  ;;  %p8230_p8 = por %p8229_p7, %p8228_p6 }
  0x21   :  { %7649 = vmatpush3.bf16.msra.mxu0 %v7865_v32  ;;  %p8231_p9 = pnand %p8230_p8, %p8224_p5 }
  0x22   :  { %7650 = vmatprep.subr.bf16.mxu0 %v7866_v33  ;;  %7176 = vmatpush3.bf16.msra.mxu1 %v7877_v40 }
  0x23   :  { %7177 = vmatprep.subr.bf16.mxu1 %v7878_v41 }
  0x24   :  { %7635 = vmatmul.mubr.msk.bf16.gmra.mxu0 %vm74_vm2, %v52_v19 }
  0x25   :  { %7638 = vmatprep.mubr.msk.bf16.mxu0 %vm74_vm2, %v53_v20  ;;  %7651 = vmatpush3.bf16.msra.mxu0 %v7866_v33 }
  0x26   :  { %7652 = vmatprep.subr.bf16.mxu0 %v7867_v34  ;;  %7178 = vmatpush3.bf16.msra.mxu1 %v7879_v42 }
  0x29   :  { %7653 = vmatpush3.bf16.msra.mxu0 %v7867_v34 }
  0x2c   :  { %7639 = vmatmul.mubr.msk.bf16.gmra.mxu0 %vm74_vm2, %v54_v25 }
  0x2d   :  { %7642 = vmatprep.mubr.msk.bf16.mxu0 %vm74_vm2, %v55_v26 }
  0x34   :  { %7643 = vmatmul.mubr.msk.bf16.gmra.mxu0 %vm74_vm2, %v56_v29  ;;  %vm8441_vm2 = vmor %vm440_vm8, %vm441_vm9  ;;  %vm3388_vm8 = vcmask 522240   ;;  %vm6379_vm9 = vcmask 17408  }
  0xdc   :  { %v7632_v44 = vpop.f32.mrf.mxu0 }
  0xdd   :  { %v149_v45 = vadd.f32 %v7632_v44, %v8373_v43 }
  0xde   :  { %v140_v46 = vpop.f32.mrf.mxu0 }
  0xdf   :  { %v205_v47 = vmax.f32 %v149_v45, 0.0  ;;  %v141_v48 = vadd.f32 %v8373_v43, %v140_v46 }
  0xe0   :  { %v7633_v49 = vpop.f32.mrf.mxu0 }
  0xe1   :  { %224 = vst.msk [vmem:[#allocation3 + $0x11] sm:$0xff] %vm221_vm4, %v205_v47  ;;  %v203_v50 = vmax.f32 %v141_v48, 0.0  ;;  %v152_v51 = vadd.f32 %v7633_v49, %v8373_v43 }
  0xe2   :  { %v143_v52 = vpop.f32.mrf.mxu0 }
  0xe3   :  { %222 = vst.msk [vmem:[#allocation3 + $0x1] sm:$0xff] %vm221_vm4, %v203_v50  ;;  %v206_v53 = vmax.f32 %v152_v51, 0.0  ;;  %v144_v54 = vadd.f32 %v8373_v43, %v143_v52 }
  0xe4   :  { %v7636_v55 = vpop.f32.mrf.mxu0 }
  0xe5   :  { %225 = vst.msk [vmem:[#allocation3 + $0x19] sm:$0xff] %vm221_vm4, %v206_v53  ;;  %v204_v56 = vmax.f32 %v144_v54, 0.0  ;;  %v165_v57 = vadd.f32 %v7636_v55, %v8373_v43 }
  0xe6   :  { %v156_v58 = vpop.f32.mrf.mxu0 }
  0xe7   :  { %223 = vst.msk [vmem:[#allocation3 + $0x9] sm:$0xff] %vm221_vm4, %v204_v56  ;;  %v209_v59 = vmax.f32 %v165_v57, 0.0  ;;  %v157_v60 = vadd.f32 %v8373_v43, %v156_v58 }
  0xe8   :  { %v7637_v61 = vpop.f32.mrf.mxu0 }
  0xe9   :  { %228 = vst.msk [vmem:[#allocation3 + $0x31] sm:$0xff] %vm221_vm4, %v209_v59  ;;  %v207_v62 = vmax.f32 %v157_v60, 0.0  ;;  %v168_v63 = vadd.f32 %v7637_v61, %v8373_v43 }
  0xea   :  { %v159_v1 = vpop.f32.mrf.mxu0 }
  0xeb   :  { %226 = vst.msk [vmem:[#allocation3 + $0x21] sm:$0xff] %vm221_vm4, %v207_v62  ;;  %v210_v2 = vmax.f32 %v168_v63, 0.0  ;;  %v160_v3 = vadd.f32 %v8373_v43, %v159_v1 }
  0xec   :  { %v7640_v4 = vpop.f32.mrf.mxu0  ;;  %v242_v7 = vld [vmem:[#allocation3 + $0x11] ss:$2 sm:$0xff]  ;;  %v254_v18 = vld [vmem:[#allocation3 + $0x12] ss:$2 sm:$0xff] }
  0xed   :  { %230 = vst.msk [vmem:[#allocation3 + $0x39] sm:$0x1f] %vm229_vm5, %v210_v2  ;;  %v208_v5 = vmax.f32 %v160_v3, 0.0  ;;  %v181_v6 = vadd.f32 %v7640_v4, %v8373_v43 }
  0xee   :  { %v172_v8 = vpop.f32.mrf.mxu0  ;;  %v232_v9 = vld [vmem:[#allocation3] ss:$2 sm:$0xff]  ;;  %v234_v10 = vld [vmem:[#allocation3 + $0x10] ss:$2 sm:$0xff]  ;;  %v240_v11 = vld [vmem:[#allocation3 + $0x1] ss:$2 sm:$0xff] }
  0xef   :  { %227 = vst.msk [vmem:[#allocation3 + $0x29] sm:$0xff] %vm221_vm4, %v208_v5  ;;  %v213_v12 = vmax.f32 %v181_v6, 0.0  ;;  %v173_v13 = vadd.f32 %v8373_v43, %v172_v8  ;;  %v247_v14 = vmax.f32 %v232_v9, %v240_v11  ;;  %v248_v15 = vmax.f32 %v234_v10, %v242_v7  ;;  %v252_v17 = vld [vmem:[#allocation3 + $0x2] ss:$2 sm:$0xff] }
  0xf0   :  { %v7641_v16 = vpop.f32.mrf.mxu0  ;;  %3384 = vst.msk [vmem:[#allocation3] sm:$0x3] %vm3383_vm7, %v8273_v30 }
  0xf1   :  { %268 = vst.msk [vmem:[#allocation3 + $0x51] sm:$0xff] %vm221_vm4, %v213_v12  ;;  %v211_v19 = vmax.f32 %v173_v13, 0.0  ;;  %v184_v20 = vadd.f32 %v7641_v16, %v8373_v43  ;;  %v8395_v21 = vmax.f32 %v247_v14, %v252_v17  ;;  %v8397_v22 = vmax.f32 %v248_v15, %v254_v18  ;;  %v7880_v12 = vld [vmem:[#allocation4 + $0x68] sm:$0xff]   ;;  %v7882_v14 = vld [vmem:[#allocation4 + $0x60] sm:$0xff]  }
  0xf2   :  { %v175_v23 = vpop.f32.mrf.mxu0  ;;  %v7881_v13 = vld [vmem:[#allocation4 + $0x28] sm:$0xff]   ;;  %7179 = vmatprep.subr.bf16.mxu1 %v7880_v12 }
  0xf3   :  { %266 = vst.msk [vmem:[#allocation3 + $0x41] sm:$0xff] %vm221_vm4, %v211_v19  ;;  %v214_v24 = vmax.f32 %v184_v20, 0.0  ;;  %v176_v25 = vadd.f32 %v8373_v43, %v175_v23  ;;  %v312_v26 = vrot.slane %v8395_v21, 6  ;;  %v313_v27 = vrot.slane %v8397_v22, 6  ;;  %7180 = vmatpush3.bf16.msra.mxu1 %v7881_v13  ;;  %v8170_v23 = vld [vmem:[#allocation4 + $0x6f8] sm:$0xff]  }
  0xf4   :  { %v7644_v28 = vpop.f32.mrf.mxu0  ;;  %v246_v1 = vld [vmem:[#allocation3 + $0x31] ss:$2 sm:$0x7f]  ;;  %v258_v11 = vld [vmem:[#allocation3 + $0x32] ss:$2 sm:$0x7f]  ;;  %7181 = vmatprep.subr.bf16.mxu1 %v7882_v14 }
  0xf5   :  { %269 = vst.msk [vmem:[#allocation3 + $0x59] sm:$0xff] %vm221_vm4, %v214_v24  ;;  %v212_v29 = vmax.f32 %v176_v25, 0.0  ;;  %v197_v31 = vadd.f32 %v7644_v28, %v8373_v43  ;;  %v314_v32 = vsel %vm99_vm0, %v312_v26, %v313_v27  ;;  %v324_v33 = vsel %vm99_vm0, 0.0, %v312_v26 }
  0xf6   :  { %v188_v34 = vpop.f32.mrf.mxu0  ;;  %v8409_v35 = vpack.c.bf16 %v324_v33, %v324_v33  ;;  %v8411_v36 = vpack.c.bf16 %v314_v32, %v314_v32  ;;  %v236_v37 = vld [vmem:[#allocation3 + $0x20] ss:$2 sm:$0xff]  ;;  %v244_v38 = vld [vmem:[#allocation3 + $0x21] ss:$2 sm:$0xff] }
  0xf7   :  { %267 = vst.msk [vmem:[#allocation3 + $0x49] sm:$0xff] %vm221_vm4, %v212_v29  ;;  %v217_v39 = vmax.f32 %v197_v31, 0.0  ;;  %v189_v40 = vadd.f32 %v8373_v43, %v188_v34  ;;  %v249_v41 = vmax.f32 %v236_v37, %v244_v38  ;;  %v256_v58 = vld [vmem:[#allocation3 + $0x22] ss:$2 sm:$0xff] }
  0xf8   :  { %v7645_v42 = vpop.f32.mrf.mxu0  ;;  %v356_v44 = vshrl.u32 %v8409_v35, 16  ;;  %v359_v45 = vshll.u32 %v8409_v35, 16  ;;  %v365_v46 = vshll.u32 %v8411_v36, 16  ;;  %v369_v47 = vshrl.u32 %v8411_v36, 16  ;;  %345 = vst.msk [vmem:[#allocation2] sm:$0xf] %vm344_vm6, %v8409_v35 }
  0xf9   :  { %346 = vst.msk [vmem:[#allocation2 + $0x14] sm:$0xf] %vm344_vm6, %v8411_v36  ;;  %v215_v49 = vmax.f32 %v189_v40, 0.0  ;;  %v200_v50 = vadd.f32 %v7645_v42, %v8373_v43  ;;  %v6616_v51 = vrot.slane %v8409_v35, 10  ;;  %v489_v52 = vrot.slane %v8411_v36, 6 }
  0xfa   :  { %272 = vst.msk [vmem:[#allocation3 + $0x71] sm:$0xff] %vm221_vm4, %v217_v39  ;;  %v191_v53 = vpop.f32.mrf.mxu0  ;;  %v443_v54 = vrot.slane %v356_v44, 5  ;;  %v444_v55 = vrot.slane %v359_v45, 6  ;;  %v447_v56 = vrot.slane %v369_v47, 5  ;;  %v448_v57 = vrot.slane %v365_v46, 6 }
  0xfb   :  { %270 = vst.msk [vmem:[#allocation3 + $0x61] sm:$0xff] %vm221_vm4, %v215_v49  ;;  %v218_v59 = vmax.f32 %v200_v50, 0.0  ;;  %v192_v60 = vadd.f32 %v8373_v43, %v191_v53  ;;  %v490_v61 = vsel %vm8421_vm14, %v6616_v51, %v489_v52  ;;  %v8437_v62 = vrot.slane %v489_v52, 4  ;;  %v238_v63 = vld [vmem:[#allocation3 + $0x30] ss:$2 sm:$0x7f] }
  0xfc   :  { %v445_v3 = vor.u32 %v444_v55, %v443_v54  ;;  %504 = vst.msk [vmem:[#allocation2 + $0x8] sm:$0xf] %vm344_vm6, %v490_v61  ;;  %v358_v4 = vrot.slane %v356_v44, 4  ;;  %v361_v5 = vrot.slane %v359_v45, 5  ;;  %v286_v6 = vld [vmem:[#allocation3 + $0x51] ss:$2 sm:$0xff]  ;;  %v8447_v9 = vmax.f32 %v249_v41, %v256_v58 }
  0xfd   :  { %v298_v43 = vld [vmem:[#allocation3 + $0x52] ss:$2 sm:$0xff]  ;;  %273 = vst.msk [vmem:[#allocation3 + $0x79] sm:$0x1f] %vm229_vm5, %v218_v59  ;;  %v216_v7 = vmax.f32 %v192_v60, 0.0  ;;  %v367_v8 = vrot.slane %v365_v46, 5  ;;  %v8449_v16 = vor.u32 %v448_v57, %v447_v56  ;;  %v250_v18 = vmax.f32 %v238_v63, %v246_v1  ;;  %vm8462_vm5 = vmor %vm100_vm1, %vm417_vm11 }
  0xfe   :  { %v371_v10 = vrot.slane %v369_v47, 4  ;;  %v446_v15 = vrot.slane %v445_v3, 4  ;;  %v362_v17 = vor.u32 %v361_v5, %v358_v4  ;;  %v276_v19 = vld [vmem:[#allocation3 + $0x40] ss:$2 sm:$0xff]  ;;  %v278_v20 = vld [vmem:[#allocation3 + $0x50] ss:$2 sm:$0xff] }
  0xff   :  { %271 = vst.msk [vmem:[#allocation3 + $0x69] sm:$0xff] %vm221_vm4, %v216_v7  ;;  %v315_v24 = vrot.slane %v8447_v9, 6  ;;  %v284_v25 = vld [vmem:[#allocation3 + $0x41] ss:$2 sm:$0xff]  ;;  %v292_v26 = vmax.f32 %v278_v20, %v286_v6  ;;  %v296_v28 = vld [vmem:[#allocation3 + $0x42] ss:$2 sm:$0xff]  ;;  %v262_v34 = vmax.f32 %v250_v18, %v258_v11 }
 0x100   :  { %v6615_v29 = vrot.slane %v8409_v35, 9  ;;  %v450_v32 = vsel %vm8441_vm2, %v446_v15, %v8449_v16  ;;  %v363_v33 = vrot.slane %v362_v17, 4  ;;  %v291_v37 = vmax.f32 %v276_v19, %v284_v25  ;;  %v7883_v63 = vld [vmem:[#allocation4 + $0x20] sm:$0xff]   ;;  %v7885_v11 = vld [vmem:[#allocation4 + $0x18] sm:$0xff]   ;;  %3390 = vst.msk [vmem:[#allocation3 + $0x21] sm:$0x3] %vm3383_vm7, %v8273_v30 }
 0x101   :  { %468 = vrot.lane.b32.xlu1 %v450_v32, %s8270_s18  ;;  %v316_v35 = vsel %vm99_vm0, %v313_v27, %v315_v24  ;;  %v372_v38 = vor.u32 %v371_v10, %v367_v8  ;;  %v8473_v39 = vmax.f32 %v292_v26, %v298_v43  ;;  %v421_v40 = vrot.slane %v8411_v36, 5  ;;  %7182 = vmatpush3.bf16.msra.mxu1 %v7883_v63  ;;  %v7884_v10 = vld [vmem:[#allocation4 + $0x58] sm:$0xff]  }
 0x102   :  { %v368_v41 = vsel %vm8454_vm3, %v363_v33, %v367_v8  ;;  %v8478_v42 = vpack.c.bf16 %v316_v35, %v316_v35  ;;  %v8481_v44 = vsel %vm263_vm13, %v262_v34, 0.0  ;;  %v8483_v45 = vmax.f32 %v291_v37, %v296_v28  ;;  %7183 = vmatprep.subr.bf16.mxu1 %v7884_v10  ;;  %3463 = vst.msk [vmem:[#allocation3 + $0x40] sm:$0x3] %vm3383_vm7, %v8273_v30 }
 0x103   :  { %399 = vrot.lane.b32.xlu0 %v368_v41, %s8270_s18  ;;  %v451_v27 = vrot.slane %v8449_v16, 4  ;;  %v317_v46 = vrot.slane %v8481_v44, 6  ;;  %v513_v47 = vrot.slane %v8473_v39, 6  ;;  %v422_v36 = vsel %vm8462_vm5, %v6615_v29, %v421_v40 }
 0x104   :  { %v375_v49 = vshll.u32 %v8478_v42, 16  ;;  %v492_v50 = vrot.slane %v8478_v42, 6  ;;  %347 = vst.msk [vmem:[#allocation2 + $0x28] sm:$0xf] %vm344_vm6, %v8478_v42  ;;  %v379_v51 = vshrl.u32 %v8478_v42, 16  ;;  %v512_v52 = vrot.slane %v8483_v45, 6 }
 0x105   :  { %436 = vst.msk [vmem:[#allocation2 + $0x4] sm:$0xf] %vm344_vm6, %v422_v36  ;;  %v373_v53 = vrot.slane %v372_v38, 4  ;;  %v318_v54 = vsel %vm99_vm0, %v315_v24, %v317_v46  ;;  %v326_v55 = vsel %vm325_vm15, %v317_v46, 0.0  ;;  %v8500_v56 = vrot.slane %v421_v40, 4  ;;  %7184 = vmatpush3.bf16.msra.mxu1 %v7885_v11  ;;  %v7886_v38 = vld [vmem:[#allocation4 + $0x50] sm:$0xff]  }
 0x106   :  { %v377_v57 = vrot.slane %v375_v49, 5  ;;  %v493_v58 = vsel %vm8421_vm14, %v8437_v62, %v492_v50  ;;  %v494_v59 = vrot.slane %v492_v50, 4  ;;  %v452_v60 = vrot.slane %v379_v51, 5  ;;  %v280_v61 = vld [vmem:[#allocation3 + $0x60] ss:$2 sm:$0xff]  ;;  %7185 = vmatprep.subr.bf16.mxu1 %v7886_v38 }
 0x107   :  { %505 = vst.msk [vmem:[#allocation2 + $0x1c] sm:$0xf] %vm344_vm6, %v493_v58  ;;  %v453_v1 = vrot.slane %v375_v49, 6  ;;  %v8506_v3 = vpack.c.bf16 %v318_v54, %v318_v54  ;;  %v381_v4 = vrot.slane %v379_v51, 4  ;;  %v8508_v5 = vpack.c.bf16 %v326_v55, %v326_v55  ;;  %v288_v6 = vld [vmem:[#allocation3 + $0x61] ss:$2 sm:$0xff] }
 0x108   :  { %v378_v43 = vsel %vm8454_vm3, %v373_v53, %v377_v57  ;;  %v514_v62 = vsel %vm99_vm0, %v512_v52, %v513_v47  ;;  %v524_v7 = vsel %vm99_vm0, 0.0, %v512_v52  ;;  %v293_v8 = vmax.f32 %v280_v61, %v288_v6  ;;  %v300_v20 = vld [vmem:[#allocation3 + $0x62] ss:$2 sm:$0xff]  ;;  %v8525_v24 = vld [vmem:[#allocation3 + $0x71] ss:$2 sm:$0x7f] }
 0x109   :  { %401 = vrot.lane.b32.xlu0 %v378_v43, %s8270_s18  ;;  %v454_v12 = vor.u32 %v453_v1, %v452_v60  ;;  %v382_v13 = vor.u32 %v381_v4, %v377_v57  ;;  %v385_v14 = vshll.u32 %v8506_v3, 16  ;;  %v495_v15 = vrot.slane %v8506_v3, 6  ;;  %348 = vst.msk [vmem:[#allocation2 + $0x3c] sm:$0xf] %vm344_vm6, %v8506_v3  ;;  %v7887_v43 = vld [vmem:[#allocation4 + $0x10] sm:$0xff]  }
 0x10a   :  { %v389_v16 = vshrl.u32 %v8506_v3, 16  ;;  %v395_v17 = vshll.u32 %v8508_v5, 16  ;;  %v498_v18 = vrot.slane %v8508_v5, 6  ;;  %v462_v19 = vshrl.u32 %v8508_v5, 16  ;;  %7186 = vmatpush3.bf16.msra.mxu1 %v7887_v43  ;;  %3468 = vst.msk [vmem:[#allocation3 + $0x61] sm:$0x3] %vm3383_vm7, %v8273_v30 }
 0x10b   :  { %v455_v25 = vsel %vm8441_vm2, %v451_v27, %v454_v12  ;;  %v383_v26 = vrot.slane %v382_v13, 4  ;;  %v387_v28 = vrot.slane %v385_v14, 5  ;;  %v496_v29 = vsel %vm8421_vm14, %v494_v59, %v495_v15  ;;  %v8531_v32 = vld [vmem:[#allocation3 + $0x70] ss:$2 sm:$0x7f] }
 0x10c   :  { %470 = vrot.lane.b32.xlu1 %v455_v25, %s8270_s18  ;;  %506 = vst.msk [vmem:[#allocation2 + $0x30] sm:$0xf] %vm344_vm6, %v496_v29  ;;  %v391_v33 = vrot.slane %v389_v16, 4  ;;  %v397_v34 = vrot.slane %v395_v17, 5  ;;  %v497_v37 = vrot.slane %v495_v15, 4  ;;  %v456_v35 = vrot.slane %v454_v12, 4 }
 0x10d   :  { %v388_v40 = vsel %vm8454_vm3, %v383_v26, %v387_v28  ;;  %v457_v41 = vrot.slane %v389_v16, 5  ;;  %v458_v27 = vrot.slane %v385_v14, 6  ;;  %v464_v46 = vrot.slane %v462_v19, 5  ;;  %v302_v11 = vld [vmem:[#allocation3 + $0x72] ss:$2 sm:$0x7f] }
 0x10e   :  { %403 = vrot.lane.b32.xlu0 %v388_v40, %s8270_s18  ;;  %v392_v36 = vor.u32 %v391_v33, %v387_v28  ;;  %v499_v49 = vsel %vm8421_vm14, %v497_v37, %v498_v18  ;;  %v7868_v50 = vld [vmem:[#allocation2 + $0x8] ss:$20 sps:$4 sm:$0xff]   ;;  %v465_v51 = vrot.slane %v395_v17, 6  ;;  %v8540_v52 = vpack.c.bf16 %v524_v7, %v524_v7 }
 0x10f   :  { %507 = vst.msk [vmem:[#allocation2 + $0x44] sm:$0xf] %vm344_vm6, %v499_v49  ;;  %v459_v53 = vor.u32 %v458_v27, %v457_v41  ;;  %v8543_v54 = vpack.c.bf16 %v514_v62, %v514_v62  ;;  %v8545_v55 = vmax.f32 %v293_v8, %v300_v20  ;;  %v294_v57 = vmax.f32 %v8531_v32, %v8525_v24 }
 0x110   :  { %v393_v58 = vrot.slane %v392_v36, 4  ;;  %7654 = vmatprep.mubr.msk.bf16.mxu0 %vm221_vm4, %v7868_v50  ;;  %v466_v59 = vor.u32 %v465_v51, %v464_v46  ;;  %v551_v60 = vshrl.u32 %v8540_v52, 16  ;;  %v554_v61 = vshll.u32 %v8540_v52, 16  ;;  %543 = vst.msk [vmem:[#allocation2 + $0x50] sm:$0xf] %vm344_vm6, %v8540_v52 }
 0x111   :  { %v460_v63 = vsel %vm8441_vm2, %v456_v35, %v459_v53  ;;  %v461_v1 = vrot.slane %v459_v53, 4  ;;  %v560_v4 = vshll.u32 %v8543_v54, 16  ;;  %v6623_v6 = vrot.slane %v8540_v52, 10  ;;  %544 = vst.msk [vmem:[#allocation2 + $0x64] sm:$0xf] %vm344_vm6, %v8543_v54 }
 0x112   :  { %v398_v62 = vsel %vm8454_vm3, %v393_v58, %v397_v34  ;;  %472 = vrot.lane.b32.xlu0 %v460_v63, %s8270_s18  ;;  %v553_v7 = vrot.slane %v551_v60, 4  ;;  %v556_v8 = vrot.slane %v554_v61, 5  ;;  %v674_v10 = vrot.slane %v8543_v54, 6 }
 0x113   :  { %405 = vrot.lane.b32.xlu1 %v398_v62, %s8270_s18  ;;  %v562_v12 = vrot.slane %v560_v4, 5  ;;  %v515_v13 = vrot.slane %v8545_v55, 6  ;;  %v564_v14 = vshrl.u32 %v8543_v54, 16  ;;  %v424_v15 = vrot.slane %v8478_v42, 5 }
 0x114   :  { %v467_v16 = vsel %vm8441_vm2, %v461_v1, %v466_v59  ;;  %v557_v17 = vor.u32 %v556_v8, %v553_v7  ;;  %v675_v18 = vsel %vm8421_vm14, %v6623_v6, %v674_v10  ;;  %v631_v19 = vrot.slane %v551_v60, 5 }
 0x115   :  { %689 = vst.msk [vmem:[#allocation2 + $0x58] sm:$0xf] %vm344_vm6, %v675_v18  ;;  %v516_v20 = vsel %vm99_vm0, %v513_v47, %v515_v13  ;;  %v566_v24 = vrot.slane %v564_v14, 4  ;;  %v632_v25 = vrot.slane %v554_v61, 6  ;;  %v635_v26 = vrot.slane %v564_v14, 5 }
 0x116   :  { %v7869_v28 = vld [vmem:[#allocation2 + $0x30] ss:$20 sps:$4 sm:$0xff]   ;;  %v558_v42 = vrot.slane %v557_v17, 4  ;;  %v8576_v29 = vpack.c.bf16 %v516_v20, %v516_v20  ;;  %v636_v32 = vrot.slane %v560_v4, 6  ;;  %v306_v33 = vmax.f32 %v294_v57, %v302_v11 }
 0x117   :  { %474 = vrot.lane.b32.xlu1 %v467_v16, %s8270_s18  ;;  %v676_v34 = vrot.slane %v674_v10, 4  ;;  %v567_v37 = vor.u32 %v566_v24, %v562_v12  ;;  %v633_v35 = vor.u32 %v632_v25, %v631_v19  ;;  %v425_v38 = vsel %vm8462_vm5, %v8500_v56, %v424_v15  ;;  %7655 = vmatmul.mubr.msk.bf16.vlgmr.msra.gmra.mxu0 %vm221_vm4, %v7869_v28 }
 0x118   :  { %v563_v47 = vsel %vm8454_vm3, %v558_v42, %v562_v12  ;;  %v570_v40 = vshll.u32 %v8576_v29, 16  ;;  %v677_v41 = vrot.slane %v8576_v29, 6  ;;  %545 = vst.msk [vmem:[#allocation2 + $0x78] sm:$0xf] %vm344_vm6, %v8576_v29  ;;  %v637_v27 = vor.u32 %v636_v32, %v635_v26  ;;  %437 = vst.msk [vmem:[#allocation2 + $0x18] sm:$0xf] %vm344_vm6, %v425_v38 }
 0x119   :  { %594 = vrot.lane.b32.xlu0 %v563_v47, %s8270_s18  ;;  %v634_v46 = vrot.slane %v633_v35, 4  ;;  %v574_v56 = vshrl.u32 %v8576_v29, 16  ;;  %v8593_v36 = vsel %vm263_vm13, %v306_v33, 0.0  ;;  %v426_v49 = vrot.slane %v424_v15, 4 }
 0x11a   :  { %v568_v50 = vrot.slane %v567_v37, 4  ;;  %v572_v51 = vrot.slane %v570_v40, 5  ;;  %v678_v53 = vsel %vm8421_vm14, %v676_v34, %v677_v41  ;;  %v679_v57 = vrot.slane %v677_v41, 4 }
 0x11b   :  { %690 = vst.msk [vmem:[#allocation2 + $0x6c] sm:$0xf] %vm344_vm6, %v678_v53  ;;  %v639_v58 = vrot.slane %v637_v27, 4  ;;  %v640_v59 = vrot.slane %v574_v56, 5  ;;  %v641_v60 = vrot.slane %v570_v40, 6  ;;  %v517_v61 = vrot.slane %v8593_v36, 6 }
 0x11c   :  { %v573_v63 = vsel %vm8454_vm3, %v568_v50, %v572_v51  ;;  %v638_v1 = vsel %vm8441_vm2, %v634_v46, %v637_v27  ;;  %v576_v4 = vrot.slane %v574_v56, 4  ;;  %v427_v6 = vrot.slane %v8506_v3, 5 }
 0x11d   :  { %596 = vrot.lane.b32.xlu1 %v573_v63, %s8270_s18  ;;  %656 = vrot.lane.b32.xlu0 %v638_v1, %s8270_s18  ;;  %v642_v43 = vor.u32 %v641_v60, %v640_v59  ;;  %v518_v62 = vsel %vm99_vm0, %v515_v13, %v517_v61  ;;  %v525_v7 = vsel %vm325_vm15, %v517_v61, 0.0  ;;  %v6622_v8 = vrot.slane %v8540_v52, 9 }
 0x11e   :  { %v7091_v10 = vpack.c.bf16 %v518_v62, %v518_v62  ;;  %v577_v11 = vor.u32 %v576_v4, %v572_v51  ;;  %v7092_v12 = vpack.c.bf16 %v525_v7, %v525_v7  ;;  %v428_v14 = vsel %vm8462_vm5, %v426_v49, %v427_v6 }
 0x11f   :  { %v643_v3 = vsel %vm8441_vm2, %v639_v58, %v642_v43  ;;  %438 = vst.msk [vmem:[#allocation2 + $0x2c] sm:$0xf] %vm344_vm6, %v428_v14  ;;  %v429_v15 = vrot.slane %v427_v6, 4  ;;  %v430_v16 = vrot.slane %v8508_v5, 5  ;;  %v612_v13 = vrot.slane %v8543_v54, 5 }
 0x120   :  { %v578_v17 = vrot.slane %v577_v11, 4  ;;  %v580_v18 = vshll.u32 %v7091_v10, 16  ;;  %v680_v19 = vrot.slane %v7091_v10, 6  ;;  %546 = vst.msk [vmem:[#allocation2 + $0x8c] sm:$0xf] %vm344_vm6, %v7091_v10  ;;  %v584_v52 = vshrl.u32 %v7091_v10, 16 }
 0x121   :  { %658 = vrot.lane.b32.xlu1 %v643_v3, %s8270_s18  ;;  %v590_v20 = vshll.u32 %v7092_v12, 16  ;;  %v650_v24 = vshrl.u32 %v7092_v12, 16  ;;  %v431_v25 = vsel %vm8462_vm5, %v429_v15, %v430_v16  ;;  %v613_v54 = vsel %vm8462_vm5, %v6622_v8, %v612_v13 }
 0x122   :  { %v582_v26 = vrot.slane %v580_v18, 5  ;;  %v681_v28 = vsel %vm8421_vm14, %v679_v57, %v680_v19  ;;  %v7870_v5 = vld [vmem:[#allocation2 + $0x58] ss:$20 sps:$4 sm:$0xff]   ;;  %v586_v42 = vrot.slane %v584_v52, 4  ;;  %439 = vst.msk [vmem:[#allocation2 + $0x40] sm:$0xf] %vm344_vm6, %v431_v25 }
 0x123   :  { %691 = vst.msk [vmem:[#allocation2 + $0x80] sm:$0xf] %vm344_vm6, %v681_v28  ;;  %v682_v32 = vrot.slane %v680_v19, 4  ;;  %v683_v33 = vrot.slane %v7092_v12, 6  ;;  %v645_v34 = vrot.slane %v584_v52, 5  ;;  %v646_v37 = vrot.slane %v580_v18, 6  ;;  %7658 = vmatprep.mubr.msk.bf16.mxu0 %vm221_vm4, %v7870_v5 }
 0x124   :  { %627 = vst.msk [vmem:[#allocation2 + $0x54] sm:$0xf] %vm344_vm6, %v613_v54  ;;  %v583_v35 = vsel %vm8454_vm3, %v578_v17, %v582_v26  ;;  %v587_v38 = vor.u32 %v586_v42, %v582_v26  ;;  %v592_v47 = vrot.slane %v590_v20, 5  ;;  %v644_v40 = vrot.slane %v642_v43, 4 }
 0x125   :  { %598 = vrot.lane.b32.xlu0 %v583_v35, %s8270_s18  ;;  %v684_v41 = vsel %vm8421_vm14, %v682_v32, %v683_v33  ;;  %v647_v27 = vor.u32 %v646_v37, %v645_v34  ;;  %v614_v46 = vrot.slane %v612_v13, 4  ;;  %v615_v56 = vrot.slane %v8576_v29, 5 }
 0x126   :  { %v588_v49 = vrot.slane %v587_v38, 4  ;;  %692 = vst.msk [vmem:[#allocation2 + $0x94] sm:$0xf] %vm344_vm6, %v684_v41  ;;  %v652_v50 = vrot.slane %v650_v24, 5  ;;  %v653_v51 = vrot.slane %v590_v20, 6  ;;  %v618_v53 = vrot.slane %v7091_v10, 5 }
 0x127   :  { %v616_v57 = vsel %vm8462_vm5, %v614_v46, %v615_v56  ;;  %v617_v58 = vrot.slane %v615_v56, 4  ;;  %v621_v59 = vrot.slane %v7092_v12, 5  ;;  %v648_v61 = vsel %vm8441_vm2, %v644_v40, %v647_v27  ;;  %v7888_v46 = vld [vmem:[#allocation4 + $0x148] sm:$0xff]   ;;  %v7889_v56 = vld [vmem:[#allocation4 + $0x140] sm:$0xff]  }
 0x128   :  { %v593_v60 = vsel %vm8454_vm3, %v588_v49, %v592_v47  ;;  %v649_v63 = vrot.slane %v647_v27, 4  ;;  %628 = vst.msk [vmem:[#allocation2 + $0x68] sm:$0xf] %vm344_vm6, %v616_v57  ;;  %v620_v29 = vrot.slane %v618_v53, 4  ;;  %v654_v4 = vor.u32 %v653_v51, %v652_v50  ;;  %7662 = vmatprep.subr.bf16.mxu0 %v7888_v46  ;;  %v7890_v49 = vld [vmem:[#allocation4 + $0x138] sm:$0xff]   ;;  %v7892_v50 = vld [vmem:[#allocation4 + $0x130] sm:$0xff]  }
 0x129   :  { %600 = vrot.lane.b32.xlu1 %v593_v60, %s8270_s18  ;;  %660 = vrot.lane.b32.xlu0 %v648_v61, %s8270_s18  ;;  %v619_v1 = vsel %vm8462_vm5, %v617_v58, %v618_v53  ;;  %vm411_vm1 = vcmask 1043968   ;;  %v7896_v51 = vld [vmem:[#allocation4 + $0x128] sm:$0xff]   ;;  %v7898_v57 = vld [vmem:[#allocation4 + $0x120] sm:$0xff]   ;;  %v7901_v60 = vld [vmem:[#allocation4 + $0xd8] sm:$0xff]   ;;  %vm6456_vm11 = vcmask 162816  }
 0x12a   :  { %629 = vst.msk [vmem:[#allocation2 + $0x7c] sm:$0xf] %vm344_vm6, %v619_v1  ;;  %v622_v6 = vsel %vm8462_vm5, %v620_v29, %v621_v59  ;;  %v655_v43 = vsel %vm8441_vm2, %v649_v63, %v654_v4  ;;  %7663 = vmatpush3.bf16.msra.mxu0 %v7888_v46  ;;  %v7897_v53 = vld [vmem:[#allocation4 + $0xe8] sm:$0xff]   ;;  %7219 = vmatprep.subr.bf16.mxu1 %v7896_v51  ;;  %v7899_v58 = vld [vmem:[#allocation4 + $0xe0] sm:$0xff]   ;;  %v7900_v59 = vld [vmem:[#allocation4 + $0x118] sm:$0xff]  }
 0x12b   :  { %630 = vst.msk [vmem:[#allocation2 + $0x90] sm:$0xf] %vm344_vm6, %v622_v6  ;;  %7664 = vmatprep.subr.bf16.mxu0 %v7889_v56  ;;  %v7902_v61 = vld [vmem:[#allocation4 + $0x110] sm:$0xff]   ;;  %v8673_v6 = vld [vmem:[%s9746_s2 + $0x1] ss:$0 sm:$0xff] }
 0x12c   :  { %v7903_v63 = vld [vmem:[#allocation4 + $0xd0] sm:$0xff]  }
 0x12d   :  { %v7871_v62 = vld [vmem:[#allocation2 + $0x80] ss:$20 sps:$4 sm:$0xff]   ;;  %662 = vrot.lane.b32.xlu1 %v655_v43, %s8270_s18 }
 0x12e   :  { %7659 = vmatmul.mubr.msk.bf16.gmra.mxu0 %vm221_vm4, %v7871_v62 }
 0x12f   :  { %7665 = vmatpush3.bf16.msra.mxu0 %v7889_v56 }
 0x130   :  { %7666 = vmatprep.subr.bf16.mxu0 %v7890_v49 }
 0x133   :  { %7667 = vmatpush3.bf16.msra.mxu0 %v7890_v49 }
 0x134   :  { %7668 = vmatprep.subr.bf16.mxu0 %v7892_v50 }
 0x137   :  { %7669 = vmatpush3.bf16.msra.mxu0 %v7892_v50 }
 0x173   :  { %v469_v7 = vpop.permute.xlu1 %468 }
 0x174   :  { %480 = vst.msk [vmem:[#allocation2 + $0x4] sm:$0xf] %vm411_vm1, %v469_v7 }
 0x175   :  { %v400_v8 = vpop.permute.xlu0 %399 }
 0x176   :  { %412 = vst.msk [vmem:[#allocation2] sm:$0xf] %vm411_vm1, %v400_v8 }
 0x17b   :  { %v402_v10 = vpop.permute.xlu0 %401 }
 0x17c   :  { %413 = vst.msk [vmem:[#allocation2 + $0x14] sm:$0xf] %vm411_vm1, %v402_v10 }
 0x17d   :  { %v693_v15 = vld [vmem:[#allocation2] sm:$0xff] }
 0x17e   :  { %v471_v11 = vpop.permute.xlu1 %470 }
 0x17f   :  { %481 = vst.msk [vmem:[#allocation2 + $0x18] sm:$0xf] %vm411_vm1, %v471_v11 }
 0x180   :  { %v404_v12 = vpop.permute.xlu0 %403 }
 0x181   :  { %414 = vst.msk [vmem:[#allocation2 + $0x28] sm:$0xf] %vm411_vm1, %v404_v12 }
 0x184   :  { %v473_v14 = vpop.permute.xlu0 %472 }
 0x185   :  { %v406_v3 = vpop.permute.xlu1 %405  ;;  %482 = vst.msk [vmem:[#allocation2 + $0x2c] sm:$0xf] %vm411_vm1, %v473_v14 }
 0x186   :  { %v695_v16 = vld [vmem:[#allocation2 + $0x14] sm:$0xff]  ;;  %415 = vst.msk [vmem:[#allocation2 + $0x3c] sm:$0xf] %vm411_vm1, %v406_v3 }
 0x187   :  { %v6626_v13 = vcombine.high %v693_v15, %v695_v16  ;;  %v6625_v17 = vcombine.low %v693_v15, %v695_v16 }
 0x189   :  { %v475_v18 = vpop.permute.xlu1 %474  ;;  %978 = vmatprep.mubr.bf16.mxu1 %v6626_v13 }
 0x18a   :  { %483 = vst.msk [vmem:[#allocation2 + $0x40] sm:$0xf] %vm411_vm1, %v475_v18  ;;  %979 = vmatmul.mubr.bf16.vlgmr.msra.gmra.mxu1 %v6625_v17 }
 0x18b   :  { %v595_v19 = vpop.permute.xlu0 %594  ;;  %7220 = vmatpush3.bf16.msra.mxu1 %v7897_v53 }
 0x18c   :  { %606 = vst.msk [vmem:[#allocation2 + $0x50] sm:$0xf] %vm411_vm1, %v595_v19  ;;  %v697_v24 = vld [vmem:[#allocation2 + $0x28] sm:$0xff]  ;;  %7221 = vmatprep.subr.bf16.mxu1 %v7898_v57 }
 0x18f   :  { %v597_v52 = vpop.permute.xlu1 %596  ;;  %v657_v20 = vpop.permute.xlu0 %656  ;;  %7222 = vmatpush3.bf16.msra.mxu1 %v7899_v58 }
 0x190   :  { %607 = vst.msk [vmem:[#allocation2 + $0x64] sm:$0xf] %vm411_vm1, %v597_v52  ;;  %668 = vst.msk [vmem:[#allocation2 + $0x54] sm:$0xf] %vm411_vm1, %v657_v20  ;;  %7223 = vmatprep.subr.bf16.mxu1 %v7900_v59 }
 0x191   :  { %v699_v25 = vld [vmem:[#allocation2 + $0x3c] sm:$0xff] }
 0x192   :  { %v6629_v26 = vcombine.high %v697_v24, %v699_v25  ;;  %v6628_v28 = vcombine.low %v697_v24, %v699_v25  ;;  %v7904_v24 = vld [vmem:[#allocation4 + $0x108] sm:$0xff]  }
 0x193   :  { %v659_v5 = vpop.permute.xlu1 %658  ;;  %7224 = vmatpush3.bf16.msra.mxu1 %v7901_v60  ;;  %v7905_v25 = vld [vmem:[#allocation4 + $0xc8] sm:$0xff]  }
 0x194   :  { %669 = vst.msk [vmem:[#allocation2 + $0x68] sm:$0xf] %vm411_vm1, %v659_v5  ;;  %986 = vmatprep.mubr.bf16.mxu1 %v6629_v26  ;;  %7225 = vmatprep.subr.bf16.mxu1 %v7902_v61 }
 0x195   :  { %987 = vmatmul.mubr.bf16.gmra.mxu1 %v6628_v28 }
 0x197   :  { %v599_v42 = vpop.permute.xlu0 %598  ;;  %v701_v54 = vld [vmem:[#allocation2 + $0x50] sm:$0xff]  ;;  %7226 = vmatpush3.bf16.msra.mxu1 %v7903_v63 }
 0x198   :  { %608 = vst.msk [vmem:[#allocation2 + $0x78] sm:$0xf] %vm411_vm1, %v599_v42  ;;  %7227 = vmatprep.subr.bf16.mxu1 %v7904_v24  ;;  %v7907_v24 = vld [vmem:[#allocation4 + $0xc0] sm:$0xff]  }
 0x19b   :  { %v703_v32 = vld [vmem:[#allocation2 + $0x64] sm:$0xff]  ;;  %v601_v33 = vpop.permute.xlu1 %600  ;;  %v661_v34 = vpop.permute.xlu0 %660  ;;  %7228 = vmatpush3.bf16.msra.mxu1 %v7905_v25 }
 0x19c   :  { %609 = vst.msk [vmem:[#allocation2 + $0x8c] sm:$0xf] %vm411_vm1, %v601_v33  ;;  %670 = vst.msk [vmem:[#allocation2 + $0x7c] sm:$0xf] %vm411_vm1, %v661_v34  ;;  %v6632_v37 = vcombine.high %v701_v54, %v703_v32  ;;  %v6631_v35 = vcombine.low %v701_v54, %v703_v32 }
 0x19e   :  { %994 = vmatprep.mubr.bf16.mxu1 %v6632_v37 }
 0x19f   :  { %v663_v38 = vpop.permute.xlu1 %662  ;;  %995 = vmatmul.mubr.bf16.gmra.mxu1 %v6631_v35 }
 0x1a0   :  { %671 = vst.msk [vmem:[#allocation2 + $0x90] sm:$0xf] %vm411_vm1, %v663_v38 }
 0x1a3   :  { %v705_v47 = vld [vmem:[#allocation2 + $0x78] sm:$0xff] }
 0x1a7   :  { %v707_v40 = vld [vmem:[#allocation2 + $0x8c] sm:$0xff] }
 0x1a8   :  { %v6635_v41 = vcombine.high %v705_v47, %v707_v40  ;;  %v6634_v27 = vcombine.low %v705_v47, %v707_v40 }
 0x1aa   :  { %1002 = vmatprep.mubr.bf16.mxu1 %v6635_v41 }
 0x1ab   :  { %1003 = vmatmul.mubr.bf16.gmra.mxu1 %v6634_v27 }
 0x1d7   :  { %v7656_v29 = vpop.f32.mrf.mxu0 }
 0x1d9   :  { %v1045_v4 = vpop.f32.mrf.mxu0 }
 0x1db   :  { %v7657_v10 = vpop.f32.mrf.mxu0 }
 0x1dd   :  { %v1048_v16 = vpop.f32.mrf.mxu0 }
 0x1ee   :  { %v8683_v41 = vpop.f32.mrf.mxu0 }
 0x24a   :  { %v7187_v1 = vpop.f32.mrf.mxu1 }
 0x24c   :  { %v7188_v43 = vpop.f32.mrf.mxu1 }
 0x24d   :  { %v7189_v62 = vadd.f32 %v7188_v43, %v7187_v1 }
 0x24e   :  { %v7190_v7 = vpop.f32.mrf.mxu1 }
 0x24f   :  { %v981_v8 = vadd.f32 %v7189_v62, %v8673_v6  ;;  %v1061_v62 = vpop.f32.mrf.mxu0 }
 0x250   :  { %v7191_v11 = vpop.f32.mrf.mxu1 }
 0x251   :  { %v1046_v12 = vadd.f32 %v1045_v4, %v981_v8  ;;  %v7192_v14 = vadd.f32 %v7191_v11, %v7190_v7 }
 0x253   :  { %v1076_v3 = vmax.f32 %v1046_v12, 0.0  ;;  %v984_v15 = vadd.f32 %v7192_v14, %v8673_v6 }
 0x255   :  { %v1088_v13 = vrot.slane %v1076_v3, 6  ;;  %v1049_v17 = vadd.f32 %v1048_v16, %v984_v15  ;;  %v7193_v18 = vpop.f32.mrf.mxu1 }
 0x257   :  { %v1100_v19 = vsel %vm99_vm0, 0.0, %v1088_v13  ;;  %v1077_v52 = vmax.f32 %v1049_v17, 0.0  ;;  %v7194_v20 = vpop.f32.mrf.mxu1 }
 0x258   :  { %v7093_v26 = vpack.c.bf16 %v1100_v19, %v1100_v19  ;;  %v7195_v28 = vadd.f32 %v7194_v20, %v7193_v18  ;;  %v7906_v20 = vld [vmem:[#allocation4 + $0x100] sm:$0xff]  }
 0x259   :  { %v1089_v5 = vrot.slane %v1077_v52, 6  ;;  %v7196_v42 = vpop.f32.mrf.mxu1  ;;  %7229 = vmatprep.subr.bf16.mxu1 %v7906_v20 }
 0x25a   :  { %1119 = vst.msk [vmem:[#allocation2] sm:$0xf] %vm344_vm6, %v7093_v26  ;;  %v989_v54 = vadd.f32 %v7195_v28, %v8673_v6  ;;  %v1127_v32 = vshrl.u32 %v7093_v26, 16  ;;  %v1130_v37 = vshll.u32 %v7093_v26, 16  ;;  %v6667_v27 = vrot.slane %v7093_v26, 10  ;;  %7230 = vmatpush3.bf16.msra.mxu1 %v7907_v24 }
 0x25b   :  { %v1090_v33 = vsel %vm99_vm0, %v1088_v13, %v1089_v5  ;;  %v7197_v34 = vpop.f32.mrf.mxu1  ;;  %v6666_v58 = vrot.slane %v7093_v26, 9 }
 0x25c   :  { %v8681_v35 = vpack.c.bf16 %v1090_v33, %v1090_v33  ;;  %v1054_v38 = vadd.f32 %v7656_v29, %v989_v54  ;;  %v7198_v47 = vadd.f32 %v7197_v34, %v7196_v42  ;;  %v1129_v40 = vrot.slane %v1127_v32, 4  ;;  %v8706_v42 = vpop.f32.mrf.mxu0 }
 0x25d   :  { %v1132_v46 = vrot.slane %v1130_v37, 5  ;;  %v1207_v56 = vrot.slane %v1127_v32, 5  ;;  %v1208_v49 = vrot.slane %v1130_v37, 6 }
 0x25e   :  { %v1250_v50 = vrot.slane %v8681_v35, 6  ;;  %1120 = vst.msk [vmem:[#allocation2 + $0x14] sm:$0xf] %vm344_vm6, %v8681_v35  ;;  %v1078_v51 = vmax.f32 %v1054_v38, 0.0  ;;  %v992_v53 = vadd.f32 %v7198_v47, %v8673_v6  ;;  %v1136_v57 = vshll.u32 %v8681_v35, 16 }
 0x25f   :  { %v7199_v59 = vpop.f32.mrf.mxu1  ;;  %v1133_v60 = vor.u32 %v1132_v46, %v1129_v40  ;;  %v1140_v61 = vshrl.u32 %v8681_v35, 16  ;;  %v1209_v63 = vor.u32 %v1208_v49, %v1207_v56  ;;  %v1188_v43 = vrot.slane %v8681_v35, 5 }
 0x260   :  { %v1251_v29 = vsel %vm8421_vm14, %v6667_v27, %v1250_v50  ;;  %v1091_v1 = vrot.slane %v1078_v51, 6  ;;  %v1057_v4 = vadd.f32 %v7657_v10, %v992_v53  ;;  %v1252_v7 = vrot.slane %v1250_v50, 4 }
 0x261   :  { %1265 = vst.msk [vmem:[#allocation2 + $0x8] sm:$0xf] %vm344_vm6, %v1251_v29  ;;  %v7200_v8 = vpop.f32.mrf.mxu1  ;;  %v1134_v11 = vrot.slane %v1133_v60, 4  ;;  %v1138_v12 = vrot.slane %v1136_v57, 5  ;;  %v1142_v14 = vrot.slane %v1140_v61, 4  ;;  %v1211_v13 = vrot.slane %v1140_v61, 5 }
 0x262   :  { %v1092_v3 = vsel %vm99_vm0, %v1089_v5, %v1091_v1  ;;  %v1079_v15 = vmax.f32 %v1057_v4, 0.0  ;;  %v7201_v16 = vadd.f32 %v7200_v8, %v7199_v59  ;;  %v1212_v52 = vrot.slane %v1136_v57, 6  ;;  %v7909_v8 = vld [vmem:[#allocation4 + $0xb8] sm:$0xff]  }
 0x263   :  { %v8696_v17 = vpack.c.bf16 %v1092_v3, %v1092_v3  ;;  %v7202_v18 = vpop.f32.mrf.mxu1  ;;  %v1139_v10 = vsel %vm8454_vm3, %v1134_v11, %v1138_v12  ;;  %v1143_v19 = vor.u32 %v1142_v14, %v1138_v12  ;;  %v1210_v28 = vrot.slane %v1209_v63, 4 }
 0x264   :  { %v1093_v25 = vrot.slane %v1079_v15, 6  ;;  %v997_v26 = vadd.f32 %v7201_v16, %v8673_v6  ;;  %1170 = vrot.lane.b32.xlu0 %v1139_v10, %s8270_s18  ;;  %v1189_v5 = vsel %vm8462_vm5, %v6666_v58, %v1188_v43  ;;  %v1213_v37 = vor.u32 %v1212_v52, %v1211_v13  ;;  %v1064_v58 = vpop.f32.mrf.mxu0 }
 0x265   :  { %v1253_v54 = vrot.slane %v8696_v17, 6  ;;  %1121 = vst.msk [vmem:[#allocation2 + $0x28] sm:$0xf] %vm344_vm6, %v8696_v17  ;;  %v7203_v32 = vpop.f32.mrf.mxu1  ;;  %v1144_v33 = vrot.slane %v1143_v19, 4  ;;  %v1146_v34 = vshll.u32 %v8696_v17, 16  ;;  %v1150_v63 = vshrl.u32 %v8696_v17, 16 }
 0x266   :  { %1203 = vst.msk [vmem:[#allocation2 + $0x4] sm:$0xf] %vm344_vm6, %v1189_v5  ;;  %v1094_v38 = vsel %vm99_vm0, %v1091_v1, %v1093_v25  ;;  %v1101_v47 = vsel %vm325_vm15, %v1093_v25, 0.0  ;;  %v1062_v40 = vadd.f32 %v1061_v62, %v997_v26  ;;  %v7204_v27 = vadd.f32 %v7203_v32, %v7202_v18 }
 0x267   :  { %v1254_v46 = vsel %vm8421_vm14, %v1252_v7, %v1253_v54  ;;  %v8717_v56 = vpack.c.bf16 %v1094_v38, %v1094_v38  ;;  %v8719_v49 = vpack.c.bf16 %v1101_v47, %v1101_v47  ;;  %v1148_v53 = vrot.slane %v1146_v34, 5  ;;  %v7908_v7 = vld [vmem:[#allocation4 + $0xf8] sm:$0xff]  }
 0x268   :  { %1266 = vst.msk [vmem:[#allocation2 + $0x1c] sm:$0xf] %vm344_vm6, %v1254_v46  ;;  %v1080_v50 = vmax.f32 %v1062_v40, 0.0  ;;  %v1000_v51 = vadd.f32 %v7204_v27, %v8673_v6  ;;  %v1214_v57 = vsel %vm8441_vm2, %v1210_v28, %v1213_v37  ;;  %v1255_v59 = vrot.slane %v1253_v54, 4  ;;  %7231 = vmatprep.subr.bf16.mxu1 %v7908_v7 }
 0x269   :  { %v1256_v60 = vrot.slane %v8717_v56, 6  ;;  %v1259_v61 = vrot.slane %v8719_v49, 6  ;;  %1122 = vst.msk [vmem:[#allocation2 + $0x3c] sm:$0xf] %vm344_vm6, %v8717_v56  ;;  %1232 = vrot.lane.b32.xlu0 %v1214_v57, %s8270_s18  ;;  %v1149_v4 = vsel %vm8454_vm3, %v1144_v33, %v1148_v53  ;;  %v1215_v62 = vrot.slane %v1213_v37, 4  ;;  %7232 = vmatpush3.bf16.msra.mxu1 %v7909_v8 }
 0x26a   :  { %v1273_v29 = vrot.slane %v1080_v50, 6  ;;  %v1065_v1 = vadd.f32 %v1064_v58, %v1000_v51  ;;  %1172 = vrot.lane.b32.xlu1 %v1149_v4, %s8270_s18  ;;  %v1216_v3 = vrot.slane %v1150_v63, 5  ;;  %v1217_v15 = vrot.slane %v1146_v34, 6 }
 0x26b   :  { %v1257_v11 = vsel %vm8421_vm14, %v1255_v59, %v1256_v60  ;;  %v1258_v12 = vrot.slane %v1256_v60, 4  ;;  %v7205_v14 = vpop.f32.mrf.mxu1  ;;  %v1152_v18 = vrot.slane %v1150_v63, 4  ;;  %v1156_v10 = vshll.u32 %v8717_v56, 16  ;;  %v7911_v63 = vld [vmem:[#allocation4 + $0xb0] sm:$0xff]  }
 0x26c   :  { %1267 = vst.msk [vmem:[#allocation2 + $0x30] sm:$0xf] %vm344_vm6, %v1257_v11  ;;  %v1285_v16 = vsel %vm99_vm0, 0.0, %v1273_v29  ;;  %v1081_v13 = vmax.f32 %v1065_v1, 0.0  ;;  %v1218_v24 = vor.u32 %v1217_v15, %v1216_v3  ;;  %v1160_v25 = vshrl.u32 %v8717_v56, 16 }
 0x26d   :  { %v1260_v19 = vsel %vm8421_vm14, %v1258_v12, %v1259_v61  ;;  %v8741_v52 = vpack.c.bf16 %v1285_v16, %v1285_v16  ;;  %v7206_v20 = vpop.f32.mrf.mxu1  ;;  %v1153_v5 = vor.u32 %v1152_v18, %v1148_v53  ;;  %v1158_v54 = vrot.slane %v1156_v10, 5  ;;  %v7910_v61 = vld [vmem:[#allocation4 + $0xf0] sm:$0xff]  }
 0x26e   :  { %1268 = vst.msk [vmem:[#allocation2 + $0x44] sm:$0xf] %vm344_vm6, %v1260_v19  ;;  %v1274_v26 = vrot.slane %v1081_v13, 6  ;;  %v7207_v28 = vadd.f32 %v7206_v20, %v7205_v14  ;;  %v1219_v34 = vsel %vm8441_vm2, %v1215_v62, %v1218_v24  ;;  %v8752_v38 = vrot.slane %v1188_v43, 4  ;;  %7233 = vmatprep.subr.bf16.mxu1 %v7910_v61 }
 0x26f   :  { %v6674_v32 = vrot.slane %v8741_v52, 10  ;;  %1304 = vst.msk [vmem:[#allocation2 + $0x50] sm:$0xf] %vm344_vm6, %v8741_v52  ;;  %v7208_v33 = vpop.f32.mrf.mxu1  ;;  %v7891_v37 = vld [vmem:[#allocation2 + $0x8] ss:$20 sps:$4 sm:$0xff]   ;;  %1234 = vrot.lane.b32.xlu1 %v1219_v34, %s8270_s18  ;;  %v1154_v27 = vrot.slane %v1153_v5, 4  ;;  %7234 = vmatpush3.bf16.msra.mxu1 %v7911_v63 }
 0x270   :  { %v1275_v47 = vsel %vm99_vm0, %v1273_v29, %v1274_v26  ;;  %v1005_v40 = vadd.f32 %v7207_v28, %v8673_v6  ;;  %v1162_v46 = vrot.slane %v1160_v25, 4  ;;  %7670 = vmatprep.mubr.msk.bf16.mxu0 %vm221_vm4, %v7891_v37  ;;  %v1166_v53 = vshll.u32 %v8719_v49, 16 }
 0x271   :  { %v8757_v50 = vpack.c.bf16 %v1275_v47, %v1275_v47  ;;  %v7209_v51 = vpop.f32.mrf.mxu1  ;;  %v1220_v57 = vrot.slane %v1218_v24, 4  ;;  %v1221_v58 = vrot.slane %v1160_v25, 5  ;;  %v1159_v59 = vsel %vm8454_vm3, %v1154_v27, %v1158_v54 }
 0x272   :  { %v1070_v35 = vadd.f32 %v8683_v41, %v1005_v40  ;;  %v7210_v43 = vadd.f32 %v7209_v51, %v7208_v33  ;;  %v1163_v60 = vor.u32 %v1162_v46, %v1158_v54  ;;  %1174 = vrot.lane.b32.xlu0 %v1159_v59, %s8270_s18  ;;  %v1168_v1 = vrot.slane %v1166_v53, 5 }
 0x273   :  { %v1435_v29 = vrot.slane %v8757_v50, 6  ;;  %1305 = vst.msk [vmem:[#allocation2 + $0x64] sm:$0xf] %vm344_vm6, %v8757_v50  ;;  %v1222_v4 = vrot.slane %v1156_v10, 6  ;;  %v1226_v62 = vshrl.u32 %v8719_v49, 16  ;;  %v1229_v11 = vrot.slane %v1166_v53, 6 }
 0x274   :  { %v1082_v7 = vmax.f32 %v1070_v35, 0.0  ;;  %v1008_v41 = vadd.f32 %v7210_v43, %v8673_v6  ;;  %v1164_v8 = vrot.slane %v1163_v60, 4  ;;  %v1312_v6 = vshrl.u32 %v8741_v52, 16 }
 0x275   :  { %v1436_v12 = vsel %vm8421_vm14, %v6674_v32, %v1435_v29  ;;  %v1437_v14 = vrot.slane %v1435_v29, 4  ;;  %v1223_v3 = vor.u32 %v1222_v4, %v1221_v58  ;;  %v1228_v15 = vrot.slane %v1226_v62, 5  ;;  %v7893_v16 = vld [vmem:[#allocation2 + $0x30] ss:$20 sps:$4 sm:$0xff]  }
 0x276   :  { %1450 = vst.msk [vmem:[#allocation2 + $0x58] sm:$0xf] %vm344_vm6, %v1436_v12  ;;  %v1276_v13 = vrot.slane %v1082_v7, 6  ;;  %v1073_v18 = vadd.f32 %v8706_v42, %v1008_v41  ;;  %v1169_v10 = vsel %vm8454_vm3, %v1164_v8, %v1168_v1  ;;  %7671 = vmatmul.mubr.msk.bf16.vlgmr.msra.gmra.mxu0 %vm221_vm4, %v7893_v16  ;;  %v1315_v25 = vshll.u32 %v8741_v52, 16 }
 0x277   :  { %1176 = vrot.lane.b32.xlu1 %v1169_v10, %s8270_s18  ;;  %v1224_v19 = vsel %vm8441_vm2, %v1220_v57, %v1223_v3  ;;  %v1225_v20 = vrot.slane %v1223_v3, 4  ;;  %v1230_v24 = vor.u32 %v1229_v11, %v1228_v15  ;;  %v1314_v42 = vrot.slane %v1312_v6, 4 }
 0x278   :  { %v1277_v28 = vsel %vm99_vm0, %v1274_v26, %v1276_v13  ;;  %v1083_v5 = vmax.f32 %v1073_v18, 0.0  ;;  %1236 = vrot.lane.b32.xlu0 %v1224_v19, %s8270_s18  ;;  %v1321_v54 = vshll.u32 %v8757_v50, 16  ;;  %v1317_v34 = vrot.slane %v1315_v25, 5 }
 0x279   :  { %v8785_v32 = vpack.c.bf16 %v1277_v28, %v1277_v28  ;;  %v1231_v33 = vsel %vm8441_vm2, %v1225_v20, %v1230_v24  ;;  %v1325_v37 = vshrl.u32 %v8757_v50, 16  ;;  %v1392_v27 = vrot.slane %v1312_v6, 5 }
 0x27a   :  { %v1278_v47 = vrot.slane %v1083_v5, 6  ;;  %v1323_v40 = vrot.slane %v1321_v54, 5  ;;  %v1393_v46 = vrot.slane %v1315_v25, 6  ;;  %v1318_v51 = vor.u32 %v1317_v34, %v1314_v42 }
 0x27b   :  { %v1438_v26 = vrot.slane %v8785_v32, 6  ;;  %1306 = vst.msk [vmem:[#allocation2 + $0x78] sm:$0xf] %vm344_vm6, %v8785_v32  ;;  %1238 = vrot.lane.b32.xlu1 %v1231_v33, %s8270_s18  ;;  %v1327_v53 = vrot.slane %v1325_v37, 4  ;;  %v1331_v57 = vshll.u32 %v8785_v32, 16  ;;  %v1197_v58 = vrot.slane %v8719_v49, 5 }
 0x27c   :  { %v1279_v35 = vsel %vm99_vm0, %v1276_v13, %v1278_v47  ;;  %v1286_v43 = vsel %vm325_vm15, %v1278_v47, 0.0  ;;  %v1394_v59 = vor.u32 %v1393_v46, %v1392_v27  ;;  %v1396_v29 = vrot.slane %v1325_v37, 5 }
 0x27d   :  { %v1439_v60 = vsel %vm8421_vm14, %v1437_v14, %v1438_v26  ;;  %v8800_v61 = vpack.c.bf16 %v1279_v35, %v1279_v35  ;;  %v8802_v63 = vpack.c.bf16 %v1286_v43, %v1286_v43  ;;  %v1440_v1 = vrot.slane %v1438_v26, 4 }
 0x27e   :  { %1451 = vst.msk [vmem:[#allocation2 + $0x6c] sm:$0xf] %vm344_vm6, %v1439_v60  ;;  %v1319_v4 = vrot.slane %v1318_v51, 4  ;;  %v1328_v62 = vor.u32 %v1327_v53, %v1323_v40  ;;  %v1333_v7 = vrot.slane %v1331_v57, 5  ;;  %v1395_v11 = vrot.slane %v1394_v59, 4 }
 0x27f   :  { %v1441_v41 = vrot.slane %v8800_v61, 6  ;;  %v1444_v8 = vrot.slane %v8802_v63, 6  ;;  %1307 = vst.msk [vmem:[#allocation2 + $0x8c] sm:$0xf] %vm344_vm6, %v8800_v61  ;;  %v1397_v12 = vrot.slane %v1321_v54, 6  ;;  %v1335_v15 = vshrl.u32 %v8785_v32, 16 }
 0x280   :  { %v1324_v14 = vsel %vm8454_vm3, %v1319_v4, %v1323_v40  ;;  %v1329_v3 = vrot.slane %v1328_v62, 4  ;;  %v1402_v16 = vrot.slane %v1331_v57, 6  ;;  %v1341_v6 = vshll.u32 %v8800_v61, 16 }
 0x281   :  { %v1442_v13 = vsel %vm8421_vm14, %v1440_v1, %v1441_v41  ;;  %v1443_v18 = vrot.slane %v1441_v41, 4  ;;  %1355 = vrot.lane.b32.xlu0 %v1324_v14, %s8270_s18  ;;  %v1398_v10 = vor.u32 %v1397_v12, %v1396_v29  ;;  %v1401_v20 = vrot.slane %v1335_v15, 5 }
 0x282   :  { %1452 = vst.msk [vmem:[#allocation2 + $0x80] sm:$0xf] %vm344_vm6, %v1442_v13  ;;  %v1334_v19 = vsel %vm8454_vm3, %v1329_v3, %v1333_v7  ;;  %v1337_v24 = vrot.slane %v1335_v15, 4  ;;  %v1345_v25 = vshrl.u32 %v8800_v61, 16  ;;  %v1343_v54 = vrot.slane %v1341_v6, 5 }
 0x283   :  { %v1445_v28 = vsel %vm8421_vm14, %v1443_v18, %v1444_v8  ;;  %1357 = vrot.lane.b32.xlu1 %v1334_v19, %s8270_s18  ;;  %v1399_v5 = vsel %vm8441_vm2, %v1395_v11, %v1398_v10  ;;  %v1400_v42 = vrot.slane %v1398_v10, 4  ;;  %v1403_v33 = vor.u32 %v1402_v16, %v1401_v20 }
 0x284   :  { %1453 = vst.msk [vmem:[#allocation2 + $0x94] sm:$0xf] %vm344_vm6, %v1445_v28  ;;  %v1338_v34 = vor.u32 %v1337_v24, %v1333_v7  ;;  %v1347_v37 = vrot.slane %v1345_v25, 4  ;;  %v1351_v47 = vshll.u32 %v8802_v63, 16  ;;  %v1406_v27 = vrot.slane %v1345_v25, 5 }
 0x285   :  { %1417 = vrot.lane.b32.xlu0 %v1399_v5, %s8270_s18  ;;  %v7894_v40 = vld [vmem:[#allocation2 + $0x58] ss:$20 sps:$4 sm:$0xff]   ;;  %v1407_v46 = vrot.slane %v1341_v6, 6  ;;  %v6673_v26 = vrot.slane %v8741_v52, 9  ;;  %v1404_v51 = vsel %vm8441_vm2, %v1400_v42, %v1403_v33  ;;  %v1411_v59 = vshrl.u32 %v8802_v63, 16 }
 0x286   :  { %v1339_v53 = vrot.slane %v1338_v34, 4  ;;  %v1348_v57 = vor.u32 %v1347_v37, %v1343_v54  ;;  %7674 = vmatprep.mubr.msk.bf16.mxu0 %vm221_vm4, %v7894_v40  ;;  %v1353_v35 = vrot.slane %v1351_v47, 5  ;;  %v1414_v60 = vrot.slane %v1351_v47, 6 }
 0x287   :  { %1419 = vrot.lane.b32.xlu1 %v1404_v51, %s8270_s18  ;;  %v1408_v43 = vor.u32 %v1407_v46, %v1406_v27  ;;  %v1191_v52 = vrot.slane %v8696_v17, 5  ;;  %v1194_v4 = vrot.slane %v8717_v56, 5  ;;  %v1405_v62 = vrot.slane %v1403_v33, 4 }
 0x288   :  { %v1344_v29 = vsel %vm8454_vm3, %v1339_v53, %v1343_v54  ;;  %v1349_v1 = vrot.slane %v1348_v57, 4  ;;  %v1413_v41 = vrot.slane %v1411_v59, 5  ;;  %v1373_v8 = vrot.slane %v8757_v50, 5 }
 0x289   :  { %1359 = vrot.lane.b32.xlu0 %v1344_v29, %s8270_s18  ;;  %v1410_v7 = vrot.slane %v1408_v43, 4  ;;  %v1192_v12 = vsel %vm8462_vm5, %v8752_v38, %v1191_v52  ;;  %v1193_v14 = vrot.slane %v1191_v52, 4  ;;  %v1196_v3 = vrot.slane %v1194_v4, 4 }
 0x28a   :  { %v1354_v11 = vsel %vm8454_vm3, %v1349_v1, %v1353_v35  ;;  %v1409_v17 = vsel %vm8441_vm2, %v1405_v62, %v1408_v43  ;;  %1204 = vst.msk [vmem:[#allocation2 + $0x18] sm:$0xf] %vm344_vm6, %v1192_v12  ;;  %v1374_v50 = vsel %vm8462_vm5, %v6673_v26, %v1373_v8  ;;  %v1375_v15 = vrot.slane %v1373_v8, 4  ;;  %v7919_v8 = vld [vmem:[#allocation4 + $0x1e0] sm:$0xff]   ;;  %v7922_v12 = vld [vmem:[#allocation4 + $0x1d0] sm:$0xff]  }
 0x28b   :  { %1361 = vrot.lane.b32.xlu1 %v1354_v11, %s8270_s18  ;;  %v7895_v56 = vld [vmem:[#allocation2 + $0x80] ss:$20 sps:$4 sm:$0xff]   ;;  %v1376_v16 = vrot.slane %v8785_v32, 5  ;;  %v1415_v13 = vor.u32 %v1414_v60, %v1413_v41  ;;  %v1195_v38 = vsel %vm8462_vm5, %v1193_v14, %v1194_v4  ;;  %v1198_v18 = vsel %vm8462_vm5, %v1196_v3, %v1197_v58  ;;  %1388 = vst.msk [vmem:[#allocation2 + $0x54] sm:$0xf] %vm344_vm6, %v1374_v50  ;;  %v7918_v41 = vld [vmem:[#allocation4 + $0x1e8] sm:$0xff]  }
 0x28c   :  { %v1379_v10 = vrot.slane %v8800_v61, 5  ;;  %7675 = vmatmul.mubr.msk.bf16.gmra.mxu0 %vm221_vm4, %v7895_v56  ;;  %1205 = vst.msk [vmem:[#allocation2 + $0x2c] sm:$0xf] %vm344_vm6, %v1195_v38  ;;  %1206 = vst.msk [vmem:[#allocation2 + $0x40] sm:$0xf] %vm344_vm6, %v1198_v18  ;;  %v1382_v49 = vrot.slane %v8802_v63, 5  ;;  %7678 = vmatprep.subr.bf16.mxu1 %v7918_v41 }
 0x28d   :  { %1421 = vrot.lane.b32.xlu0 %v1409_v17, %s8270_s18  ;;  %v1377_v32 = vsel %vm8462_vm5, %v1375_v15, %v1376_v16  ;;  %v1378_v6 = vrot.slane %v1376_v16, 4  ;;  %v1416_v58 = vsel %vm8441_vm2, %v1410_v7, %v1415_v13  ;;  %v7920_v11 = vld [vmem:[#allocation4 + $0x1d8] sm:$0xff]   ;;  %v7926_v14 = vld [vmem:[#allocation4 + $0x1c8] sm:$0xff]   ;;  %v7928_v17 = vld [vmem:[#allocation4 + $0x1c0] sm:$0xff]  }
 0x28e   :  { %1389 = vst.msk [vmem:[#allocation2 + $0x68] sm:$0xf] %vm344_vm6, %v1377_v32  ;;  %v1381_v61 = vrot.slane %v1379_v10, 4  ;;  %v7927_v3 = vld [vmem:[#allocation4 + $0x188] sm:$0xff]   ;;  %7267 = vmatprep.subr.bf16.mxu0 %v7926_v14  ;;  %v7929_v56 = vld [vmem:[#allocation4 + $0x180] sm:$0xff]   ;;  %v7930_v50 = vld [vmem:[#allocation4 + $0x1b8] sm:$0xff]  }
 0x28f   :  { %1423 = vrot.lane.b32.xlu1 %v1416_v58, %s8270_s18  ;;  %v1380_v19 = vsel %vm8462_vm5, %v1378_v6, %v1379_v10  ;;  %7268 = vmatpush3.bf16.msra.mxu0 %v7927_v3  ;;  %v7931_v15 = vld [vmem:[#allocation4 + $0x178] sm:$0xff]   ;;  %v7932_v16 = vld [vmem:[#allocation4 + $0x1b0] sm:$0xff]   ;;  %v8896_v10 = vld [vmem:[%s9746_s2 + $0x2] ss:$0 sm:$0xff] }
 0x290   :  { %1390 = vst.msk [vmem:[#allocation2 + $0x7c] sm:$0xf] %vm344_vm6, %v1380_v19  ;;  %v1383_v20 = vsel %vm8462_vm5, %v1381_v61, %v1382_v49  ;;  %7269 = vmatprep.subr.bf16.mxu0 %v7928_v17 }
 0x291   :  { %1391 = vst.msk [vmem:[#allocation2 + $0x90] sm:$0xf] %vm344_vm6, %v1383_v20 }
 0x293   :  { %7270 = vmatpush3.bf16.msra.mxu0 %v7929_v56 }
 0x294   :  { %7271 = vmatprep.subr.bf16.mxu0 %v7930_v50 }
 0x297   :  { %7272 = vmatpush3.bf16.msra.mxu0 %v7931_v15 }
 0x298   :  { %7273 = vmatprep.subr.bf16.mxu0 %v7932_v16 }
 0x2d6   :  { %v1171_v24 = vpop.permute.xlu0 %1170 }
 0x2d7   :  { %1182 = vst.msk [vmem:[#allocation2] sm:$0xf] %vm411_vm1, %v1171_v24 }
 0x2db   :  { %v1233_v63 = vpop.permute.xlu0 %1232 }
 0x2dc   :  { %1244 = vst.msk [vmem:[#allocation2 + $0x4] sm:$0xf] %vm411_vm1, %v1233_v63  ;;  %v1173_v25 = vpop.permute.xlu1 %1172 }
 0x2dd   :  { %1183 = vst.msk [vmem:[#allocation2 + $0x14] sm:$0xf] %vm411_vm1, %v1173_v25 }
 0x2e1   :  { %v1235_v28 = vpop.permute.xlu1 %1234 }
 0x2e2   :  { %1245 = vst.msk [vmem:[#allocation2 + $0x18] sm:$0xf] %vm411_vm1, %v1235_v28 }
 0x2e3   :  { %v1454_v54 = vld [vmem:[#allocation2] sm:$0xff] }
 0x2e4   :  { %v1175_v5 = vpop.permute.xlu0 %1174 }
 0x2e5   :  { %1184 = vst.msk [vmem:[#allocation2 + $0x28] sm:$0xf] %vm411_vm1, %v1175_v5 }
 0x2e9   :  { %v1177_v42 = vpop.permute.xlu1 %1176  ;;  %v1456_v33 = vld [vmem:[#allocation2 + $0x14] sm:$0xff] }
 0x2ea   :  { %1185 = vst.msk [vmem:[#allocation2 + $0x3c] sm:$0xf] %vm411_vm1, %v1177_v42  ;;  %v1237_v34 = vpop.permute.xlu0 %1236  ;;  %v6677_v37 = vcombine.high %v1454_v54, %v1456_v33  ;;  %v6676_v47 = vcombine.low %v1454_v54, %v1456_v33 }
 0x2eb   :  { %1246 = vst.msk [vmem:[#allocation2 + $0x2c] sm:$0xf] %vm411_vm1, %v1237_v34 }
 0x2ec   :  { %1739 = vmatprep.mubr.bf16.mxu1 %v6677_v37 }
 0x2ed   :  { %v1239_v40 = vpop.permute.xlu1 %1238  ;;  %1740 = vmatmul.mubr.bf16.vlgmr.msra.gmra.mxu1 %v6676_v47 }
 0x2ee   :  { %1247 = vst.msk [vmem:[#allocation2 + $0x40] sm:$0xf] %vm411_vm1, %v1239_v40  ;;  %7679 = vmatpush3.bf16.msra.mxu1 %v7918_v41 }
 0x2ef   :  { %7680 = vmatprep.subr.bf16.mxu1 %v7919_v8 }
 0x2f2   :  { %v1458_v46 = vld [vmem:[#allocation2 + $0x28] sm:$0xff]  ;;  %7681 = vmatpush3.bf16.msra.mxu1 %v7919_v8 }
 0x2f3   :  { %v1356_v27 = vpop.permute.xlu0 %1355  ;;  %7682 = vmatprep.subr.bf16.mxu1 %v7920_v11 }
 0x2f4   :  { %1367 = vst.msk [vmem:[#allocation2 + $0x50] sm:$0xf] %vm411_vm1, %v1356_v27 }
 0x2f5   :  { %v1460_v26 = vld [vmem:[#allocation2 + $0x3c] sm:$0xff]  ;;  %v1358_v51 = vpop.permute.xlu1 %1357 }
 0x2f6   :  { %1368 = vst.msk [vmem:[#allocation2 + $0x64] sm:$0xf] %vm411_vm1, %v1358_v51  ;;  %v6680_v53 = vcombine.high %v1458_v46, %v1460_v26  ;;  %v6679_v57 = vcombine.low %v1458_v46, %v1460_v26  ;;  %7683 = vmatpush3.bf16.msra.mxu1 %v7920_v11  ;;  %v7933_v46 = vld [vmem:[#allocation4 + $0x170] sm:$0xff]   ;;  %v7934_v26 = vld [vmem:[#allocation4 + $0x1a8] sm:$0xff]  }
 0x2f7   :  { %v1418_v35 = vpop.permute.xlu0 %1417  ;;  %7684 = vmatprep.subr.bf16.mxu1 %v7922_v12  ;;  %7274 = vmatpush3.bf16.msra.mxu0 %v7933_v46 }
 0x2f8   :  { %1429 = vst.msk [vmem:[#allocation2 + $0x54] sm:$0xf] %vm411_vm1, %v1418_v35  ;;  %1747 = vmatprep.mubr.bf16.mxu1 %v6680_v53  ;;  %7275 = vmatprep.subr.bf16.mxu0 %v7934_v26  ;;  %v7935_v26 = vld [vmem:[#allocation4 + $0x168] sm:$0xff]  }
 0x2f9   :  { %v1420_v43 = vpop.permute.xlu1 %1419  ;;  %1748 = vmatmul.mubr.bf16.gmra.mxu1 %v6679_v57 }
 0x2fa   :  { %1430 = vst.msk [vmem:[#allocation2 + $0x68] sm:$0xf] %vm411_vm1, %v1420_v43  ;;  %7685 = vmatpush3.bf16.msra.mxu1 %v7922_v12 }
 0x2fb   :  { %v1360_v59 = vpop.permute.xlu0 %1359  ;;  %7276 = vmatpush3.bf16.msra.mxu0 %v7935_v26 }
 0x2fc   :  { %1369 = vst.msk [vmem:[#allocation2 + $0x78] sm:$0xf] %vm411_vm1, %v1360_v59 }
 0x2fd   :  { %v1362_v60 = vpop.permute.xlu1 %1361  ;;  %v7914_v4 = vld [vmem:[#allocation2 + $0x50] ss:$20 sps:$4 sm:$0xff]  }
 0x2fe   :  { %1370 = vst.msk [vmem:[#allocation2 + $0x8c] sm:$0xf] %vm411_vm1, %v1362_v60 }
 0x2ff   :  { %v1422_v29 = vpop.permute.xlu0 %1421 }
 0x300   :  { %1431 = vst.msk [vmem:[#allocation2 + $0x7c] sm:$0xf] %vm411_vm1, %v1422_v29 }
 0x301   :  { %v1424_v1 = vpop.permute.xlu1 %1423  ;;  %v7912_v52 = vld [vmem:[#allocation2 + $0x54] ss:$20 sps:$4 sm:$0xff]  }
 0x302   :  { %1432 = vst.msk [vmem:[#allocation2 + $0x90] sm:$0xf] %vm411_vm1, %v1424_v1  ;;  %1755 = vmatprep.mubr.bf16.mxu1 %v7912_v52 }
 0x303   :  { %1756 = vmatmul.mubr.bf16.gmra.mxu1 %v7914_v4 }
 0x305   :  { %v7917_v7 = vld [vmem:[#allocation2 + $0x78] ss:$20 sps:$4 sm:$0xff]  }
 0x309   :  { %v7915_v62 = vld [vmem:[#allocation2 + $0x7c] ss:$20 sps:$4 sm:$0xff]  }
 0x30a   :  { %1763 = vmatprep.mubr.bf16.mxu1 %v7915_v62 }
 0x30b   :  { %1764 = vmatmul.mubr.bf16.gmra.mxu1 %v7917_v7 }
 0x336   :  { %v7672_v13 = vpop.f32.mrf.mxu0 }
 0x338   :  { %v1806_v18 = vpop.f32.mrf.mxu0 }
 0x33a   :  { %v7673_v61 = vpop.f32.mrf.mxu0 }
 0x33c   :  { %v1809_v28 = vpop.f32.mrf.mxu0 }
 0x34c   :  { %v8922_v62 = vpop.f32.mrf.mxu0 }
 0x3ad   :  { %v7235_v38 = vpop.f32.mrf.mxu1 }
 0x3af   :  { %v7236_v32 = vpop.f32.mrf.mxu1 }
 0x3b0   :  { %v7237_v6 = vadd.f32 %v7236_v32, %v7235_v38 }
 0x3b1   :  { %v7238_v49 = vpop.f32.mrf.mxu1 }
 0x3b2   :  { %v1742_v58 = vadd.f32 %v7237_v6, %v8896_v10  ;;  %v1822_v6 = vpop.f32.mrf.mxu0 }
 0x3b3   :  { %v7239_v19 = vpop.f32.mrf.mxu1 }
 0x3b4   :  { %v1807_v20 = vadd.f32 %v1806_v18, %v1742_v58  ;;  %v7240_v24 = vadd.f32 %v7239_v19, %v7238_v49 }
 0x3b6   :  { %v8900_v63 = vadd.f32 %v1807_v20, %v8395_v21  ;;  %v1745_v25 = vadd.f32 %v7240_v24, %v8896_v10 }
 0x3b8   :  { %v1845_v5 = vmax.f32 %v8900_v63, 0.0  ;;  %v1810_v42 = vadd.f32 %v1809_v28, %v1745_v25 }
 0x3b9   :  { %v7241_v54 = vpop.f32.mrf.mxu1 }
 0x3ba   :  { %v1857_v33 = vrot.slane %v1845_v5, 6  ;;  %v8907_v34 = vadd.f32 %v1810_v42, %v8397_v22 }
 0x3bb   :  { %v7242_v37 = vpop.f32.mrf.mxu1 }
 0x3bc   :  { %v7243_v47 = vadd.f32 %v7242_v37, %v7241_v54  ;;  %v1869_v40 = vsel %vm99_vm0, 0.0, %v1857_v33  ;;  %v1846_v21 = vmax.f32 %v8907_v34, 0.0 }
 0x3bd   :  { %v7244_v27 = vpop.f32.mrf.mxu1  ;;  %v7103_v51 = vpack.c.bf16 %v1869_v40, %v1869_v40 }
 0x3be   :  { %v1750_v53 = vadd.f32 %v7243_v47, %v8896_v10  ;;  %v1858_v57 = vrot.slane %v1846_v21, 6 }
 0x3bf   :  { %v7245_v35 = vpop.f32.mrf.mxu1  ;;  %1888 = vst.msk [vmem:[#allocation2] sm:$0xf] %vm344_vm6, %v7103_v51  ;;  %v1896_v60 = vshrl.u32 %v7103_v51, 16  ;;  %v1899_v29 = vshll.u32 %v7103_v51, 16  ;;  %v6718_v7 = vrot.slane %v7103_v51, 10  ;;  %v6717_v16 = vrot.slane %v7103_v51, 9 }
 0x3c0   :  { %v1815_v22 = vadd.f32 %v7672_v13, %v1750_v53  ;;  %v7246_v43 = vadd.f32 %v7245_v35, %v7244_v27  ;;  %v1859_v59 = vsel %vm99_vm0, %v1857_v33, %v1858_v57  ;;  %v7936_v51 = vld [vmem:[#allocation4 + $0x1a0] sm:$0xff]   ;;  %v8951_v53 = vpop.f32.mrf.mxu0 }
 0x3c1   :  { %v8916_v1 = vpack.c.bf16 %v1859_v59, %v1859_v59  ;;  %v1898_v41 = vrot.slane %v1896_v60, 4  ;;  %v1901_v8 = vrot.slane %v1899_v29, 5  ;;  %v1976_v11 = vrot.slane %v1896_v60, 5  ;;  %7277 = vmatprep.subr.bf16.mxu0 %v7936_v51 }
 0x3c2   :  { %v8919_v52 = vadd.f32 %v1815_v22, %v8447_v9  ;;  %v1753_v4 = vadd.f32 %v7246_v43, %v8896_v10  ;;  %v1977_v56 = vrot.slane %v1899_v29, 6 }
 0x3c3   :  { %v2019_v12 = vrot.slane %v8916_v1, 6  ;;  %1889 = vst.msk [vmem:[#allocation2 + $0x14] sm:$0xf] %vm344_vm6, %v8916_v1  ;;  %v7247_v17 = vpop.f32.mrf.mxu1  ;;  %v1902_v9 = vor.u32 %v1901_v8, %v1898_v41  ;;  %v1905_v50 = vshll.u32 %v8916_v1, 16  ;;  %v1909_v15 = vshrl.u32 %v8916_v1, 16 }
 0x3c4   :  { %v1847_v14 = vmax.f32 %v8919_v52, 0.0  ;;  %v1818_v3 = vadd.f32 %v7673_v61, %v1753_v4  ;;  %v1957_v13 = vrot.slane %v8916_v1, 5  ;;  %v1978_v28 = vor.u32 %v1977_v56, %v1976_v11 }
 0x3c5   :  { %v2020_v38 = vsel %vm8421_vm14, %v6718_v7, %v2019_v12  ;;  %v7248_v32 = vpop.f32.mrf.mxu1  ;;  %v1903_v61 = vrot.slane %v1902_v9, 4  ;;  %v1907_v19 = vrot.slane %v1905_v50, 5  ;;  %v1911_v25 = vrot.slane %v1909_v15, 4 }
 0x3c6   :  { %v1860_v18 = vrot.slane %v1847_v14, 6  ;;  %2034 = vst.msk [vmem:[#allocation2 + $0x8] sm:$0xf] %vm344_vm6, %v2020_v38  ;;  %v8937_v49 = vadd.f32 %v1818_v3, %v8481_v44  ;;  %v7249_v58 = vadd.f32 %v7248_v32, %v7247_v17  ;;  %v1980_v42 = vrot.slane %v1909_v15, 5  ;;  %v1825_v15 = vpop.f32.mrf.mxu0 }
 0x3c7   :  { %v7250_v24 = vpop.f32.mrf.mxu1  ;;  %v1908_v47 = vsel %vm8454_vm3, %v1903_v61, %v1907_v19  ;;  %v1912_v40 = vor.u32 %v1911_v25, %v1907_v19  ;;  %v1981_v27 = vrot.slane %v1905_v50, 6  ;;  %v1958_v46 = vsel %vm8462_vm5, %v6717_v16, %v1957_v13 }
 0x3c8   :  { %v1861_v20 = vsel %vm99_vm0, %v1858_v57, %v1860_v18  ;;  %v1848_v33 = vmax.f32 %v8937_v49, 0.0  ;;  %v1758_v37 = vadd.f32 %v7249_v58, %v8896_v10  ;;  %1939 = vrot.lane.b32.xlu0 %v1908_v47, %s8270_s18  ;;  %v2021_v57 = vrot.slane %v2019_v12, 4  ;;  %1972 = vst.msk [vmem:[#allocation2 + $0x4] sm:$0xf] %vm344_vm6, %v1958_v46 }
 0x3c9   :  { %v8940_v54 = vpack.c.bf16 %v1861_v20, %v1861_v20  ;;  %v7251_v44 = vpop.f32.mrf.mxu1  ;;  %v1979_v4 = vrot.slane %v1978_v28, 4  ;;  %v8960_v7 = vor.u32 %v1981_v27, %v1980_v42  ;;  %v1913_v12 = vrot.slane %v1912_v40, 4 }
 0x3ca   :  { %v1862_v22 = vrot.slane %v1848_v33, 6  ;;  %v1823_v43 = vadd.f32 %v1822_v6, %v1758_v37  ;;  %v7252_v59 = vadd.f32 %v7251_v44, %v7250_v24 }
 0x3cb   :  { %v2022_v35 = vrot.slane %v8940_v54, 6  ;;  %1890 = vst.msk [vmem:[#allocation2 + $0x28] sm:$0xf] %vm344_vm6, %v8940_v54  ;;  %v7253_v60 = vpop.f32.mrf.mxu1  ;;  %v1915_v29 = vshll.u32 %v8940_v54, 16  ;;  %v1919_v51 = vshrl.u32 %v8940_v54, 16 }
 0x3cc   :  { %v1863_v11 = vsel %vm99_vm0, %v1860_v18, %v1862_v22  ;;  %v1870_v3 = vsel %vm325_vm15, %v1862_v22, 0.0  ;;  %v8970_v56 = vadd.f32 %v1823_v43, %v8483_v45  ;;  %v1761_v9 = vadd.f32 %v7252_v59, %v8896_v10 }
 0x3cd   :  { %v2023_v41 = vsel %vm8421_vm14, %v2021_v57, %v2022_v35  ;;  %v2024_v8 = vrot.slane %v2022_v35, 4  ;;  %v8967_v17 = vpack.c.bf16 %v1863_v11, %v1863_v11  ;;  %v7254_v50 = vpop.f32.mrf.mxu1  ;;  %v8973_v16 = vpack.c.bf16 %v1870_v3, %v1870_v3 }
 0x3ce   :  { %2035 = vst.msk [vmem:[#allocation2 + $0x1c] sm:$0xf] %vm344_vm6, %v2023_v41  ;;  %v7255_v38 = vadd.f32 %v7254_v50, %v7253_v60  ;;  %v1917_v32 = vrot.slane %v1915_v29, 5  ;;  %v1983_v18 = vsel %vm8441_vm2, %v1979_v4, %v8960_v7  ;;  %v1849_v45 = vmax.f32 %v8970_v56, 0.0  ;;  %v7937_v60 = vld [vmem:[#allocation4 + $0x160] sm:$0xff]  }
 0x3cf   :  { %v1963_v6 = vrot.slane %v8967_v17, 5  ;;  %v2025_v58 = vrot.slane %v8967_v17, 6  ;;  %1891 = vst.msk [vmem:[#allocation2 + $0x3c] sm:$0xf] %vm344_vm6, %v8967_v17  ;;  %v1826_v61 = vadd.f32 %v1825_v15, %v1761_v9  ;;  %v7256_v19 = vpop.f32.mrf.mxu1  ;;  %2001 = vrot.lane.b32.xlu0 %v1983_v18, %s8270_s18  ;;  %v1966_v20 = vrot.slane %v8973_v16, 5  ;;  %7278 = vmatpush3.bf16.msra.mxu0 %v7937_v60 }
 0x3d0   :  { %v2028_v24 = vrot.slane %v8973_v16, 6  ;;  %v1766_v25 = vadd.f32 %v7255_v38, %v8896_v10  ;;  %v1918_v28 = vsel %vm8454_vm3, %v1913_v12, %v1917_v32  ;;  %v2042_v44 = vrot.slane %v1849_v45, 6  ;;  %v7938_v12 = vld [vmem:[#allocation4 + $0x198] sm:$0xff]  }
 0x3d1   :  { %v1965_v42 = vrot.slane %v1963_v6, 4  ;;  %v2026_v37 = vsel %vm8421_vm14, %v2024_v8, %v2025_v58  ;;  %v2027_v47 = vrot.slane %v2025_v58, 4  ;;  %1941 = vrot.lane.b32.xlu1 %v1918_v28, %s8270_s18  ;;  %v7257_v40 = vpop.f32.mrf.mxu1  ;;  %v8998_v27 = vadd.f32 %v1826_v61, %v8473_v39  ;;  %7279 = vmatprep.subr.bf16.mxu0 %v7938_v12 }
 0x3d2   :  { %2036 = vst.msk [vmem:[#allocation2 + $0x30] sm:$0xf] %vm344_vm6, %v2026_v37  ;;  %v1831_v46 = vadd.f32 %v8922_v62, %v1766_v25  ;;  %v7258_v26 = vadd.f32 %v7257_v40, %v7256_v19  ;;  %v9004_v57 = vrot.slane %v1957_v13, 4  ;;  %v2054_v43 = vsel %vm99_vm0, 0.0, %v2042_v44 }
 0x3d3   :  { %v1967_v35 = vsel %vm8462_vm5, %v1965_v42, %v1966_v20  ;;  %v2029_v22 = vsel %vm8421_vm14, %v2027_v47, %v2028_v24  ;;  %v9013_v39 = vpack.c.bf16 %v2054_v43, %v2054_v43  ;;  %v1850_v62 = vmax.f32 %v8998_v27, 0.0  ;;  %v7940_v43 = vld [vmem:[#allocation4 + $0x190] sm:$0xff]  }
 0x3d4   :  { %2037 = vst.msk [vmem:[#allocation2 + $0x44] sm:$0xf] %vm344_vm6, %v2029_v22  ;;  %1975 = vst.msk [vmem:[#allocation2 + $0x40] sm:$0xf] %vm344_vm6, %v1967_v35  ;;  %v9017_v1 = vadd.f32 %v1831_v46, %v8545_v55  ;;  %v1769_v13 = vadd.f32 %v7258_v26, %v8896_v10  ;;  %v1985_v4 = vrot.slane %v1919_v51, 5  ;;  %v1986_v41 = vrot.slane %v1915_v29, 6 }
 0x3d5   :  { %v7921_v59 = vld [vmem:[#allocation2 + $0x8] ss:$20 sps:$4 sm:$0xff]   ;;  %v1921_v8 = vrot.slane %v1919_v51, 4  ;;  %v1925_v11 = vshll.u32 %v8967_v17, 16  ;;  %v1960_v3 = vrot.slane %v8940_v54, 5  ;;  %v2043_v9 = vrot.slane %v1850_v62, 6 }
 0x3d6   :  { %2073 = vst.msk [vmem:[#allocation2 + $0x50] sm:$0xf] %vm344_vm6, %v9013_v39  ;;  %v1851_v55 = vmax.f32 %v9017_v1, 0.0  ;;  %v1984_v10 = vrot.slane %v8960_v7, 4  ;;  %7686 = vmatprep.mubr.msk.bf16.mxu1 %vm221_vm4, %v7921_v59  ;;  %v1834_v29 = vadd.f32 %v8951_v53, %v1769_v13  ;;  %v1987_v50 = vor.u32 %v1986_v41, %v1985_v4  ;;  %v7939_v22 = vld [vmem:[#allocation4 + $0x158] sm:$0xff]  }
 0x3d7   :  { %v1922_v15 = vor.u32 %v1921_v8, %v1917_v32  ;;  %v1927_v38 = vrot.slane %v1925_v11, 5  ;;  %v2044_v18 = vsel %vm99_vm0, %v2042_v44, %v2043_v9  ;;  %v1929_v61 = vshrl.u32 %v8967_v17, 16  ;;  %7280 = vmatpush3.bf16.msra.mxu0 %v7939_v22 }
 0x3d8   :  { %v2045_v58 = vrot.slane %v1851_v55, 6  ;;  %v1935_v19 = vshll.u32 %v8973_v16, 16  ;;  %v9035_v20 = vpack.c.bf16 %v2044_v18, %v2044_v18  ;;  %v9038_v7 = vadd.f32 %v1834_v29, %v8593_v36  ;;  %7281 = vmatprep.subr.bf16.mxu0 %v7940_v43 }
 0x3d9   :  { %v1988_v53 = vsel %vm8441_vm2, %v1984_v10, %v1987_v50  ;;  %v1923_v32 = vrot.slane %v1922_v15, 4  ;;  %v9044_v24 = vrot.slane %v1960_v3, 4  ;;  %v6724_v25 = vrot.slane %v9013_v39, 9 }
 0x3da   :  { %v2046_v28 = vsel %vm99_vm0, %v2043_v9, %v2045_v58  ;;  %2003 = vrot.lane.b32.xlu1 %v1988_v53, %s8270_s18  ;;  %v1931_v42 = vrot.slane %v1929_v61, 4  ;;  %v6725_v37 = vrot.slane %v9013_v39, 10  ;;  %v2204_v36 = vrot.slane %v9035_v20, 6  ;;  %2074 = vst.msk [vmem:[#allocation2 + $0x64] sm:$0xf] %vm344_vm6, %v9035_v20 }
 0x3db   :  { %v9053_v47 = vpack.c.bf16 %v2046_v28, %v2046_v28  ;;  %v1852_v44 = vmax.f32 %v9038_v7, 0.0  ;;  %v1928_v40 = vsel %vm8454_vm3, %v1923_v32, %v1927_v38  ;;  %v1990_v26 = vrot.slane %v1929_v61, 5  ;;  %v7923_v35 = vld [vmem:[#allocation2 + $0x30] ss:$20 sps:$4 sm:$0xff]  }
 0x3dc   :  { %v1932_v46 = vor.u32 %v1931_v42, %v1927_v38  ;;  %v1991_v51 = vrot.slane %v1925_v11, 6  ;;  %v2205_v13 = vsel %vm8421_vm14, %v6725_v37, %v2204_v36  ;;  %v2206_v59 = vrot.slane %v2204_v36, 4  ;;  %1943 = vrot.lane.b32.xlu0 %v1928_v40, %s8270_s18  ;;  %7687 = vmatmul.mubr.msk.bf16.vlgmr.msra.gmra.mxu1 %vm221_vm4, %v7923_v35  ;;  %v7941_v28 = vld [vmem:[#allocation4 + $0x150] sm:$0xff]  }
 0x3dd   :  { %2075 = vst.msk [vmem:[#allocation2 + $0x78] sm:$0xf] %vm344_vm6, %v9053_v47  ;;  %v1937_v60 = vrot.slane %v1935_v19, 5  ;;  %v1989_v4 = vrot.slane %v1987_v50, 4  ;;  %2219 = vst.msk [vmem:[#allocation2 + $0x58] sm:$0xf] %vm344_vm6, %v2205_v13  ;;  %7282 = vmatpush3.bf16.msra.mxu0 %v7941_v28 }
 0x3de   :  { %v2207_v41 = vrot.slane %v9053_v47, 6  ;;  %v2047_v8 = vrot.slane %v1852_v44, 6  ;;  %v1933_v11 = vrot.slane %v1932_v46, 4  ;;  %v1992_v12 = vor.u32 %v1991_v51, %v1990_v26 }
 0x3df   :  { %v2142_v9 = vrot.slane %v9035_v20, 5  ;;  %v1995_v10 = vshrl.u32 %v8973_v16, 16  ;;  %v1998_v29 = vrot.slane %v1935_v19, 6  ;;  %v2081_v15 = vshrl.u32 %v9013_v39, 16 }
 0x3e0   :  { %v2208_v50 = vsel %vm8421_vm14, %v2206_v59, %v2207_v41  ;;  %v2209_v38 = vrot.slane %v2207_v41, 4  ;;  %v2048_v18 = vsel %vm99_vm0, %v2045_v58, %v2047_v8  ;;  %v2055_v61 = vsel %vm325_vm15, %v2047_v8, 0.0 }
 0x3e1   :  { %2220 = vst.msk [vmem:[#allocation2 + $0x6c] sm:$0xf] %vm344_vm6, %v2208_v50  ;;  %v9076_v53 = vpack.c.bf16 %v2048_v18, %v2048_v18  ;;  %v9078_v32 = vpack.c.bf16 %v2055_v61, %v2055_v61  ;;  %v1938_v16 = vsel %vm8454_vm3, %v1933_v11, %v1937_v60  ;;  %v1993_v19 = vsel %vm8441_vm2, %v1989_v4, %v1992_v12 }
 0x3e2   :  { %1945 = vrot.lane.b32.xlu1 %v1938_v16, %s8270_s18  ;;  %2005 = vrot.lane.b32.xlu0 %v1993_v19, %s8270_s18  ;;  %v1994_v58 = vrot.slane %v1992_v12, 4  ;;  %v1997_v42 = vrot.slane %v1995_v10, 5  ;;  %v2083_v37 = vrot.slane %v2081_v15, 4  ;;  %v2084_v36 = vshll.u32 %v9013_v39, 16 }
 0x3e3   :  { %v2148_v40 = vrot.slane %v9076_v53, 5  ;;  %v2151_v46 = vrot.slane %v9078_v32, 5  ;;  %v2210_v26 = vrot.slane %v9076_v53, 6  ;;  %v2213_v51 = vrot.slane %v9078_v32, 6  ;;  %2076 = vst.msk [vmem:[#allocation2 + $0x8c] sm:$0xf] %vm344_vm6, %v9076_v53 }
 0x3e4   :  { %v1999_v35 = vor.u32 %v1998_v29, %v1997_v42  ;;  %v2086_v22 = vrot.slane %v2084_v36, 5  ;;  %v2090_v43 = vshll.u32 %v9035_v20, 16  ;;  %v2094_v13 = vshrl.u32 %v9035_v20, 16 }
 0x3e5   :  { %v2150_v59 = vrot.slane %v2148_v40, 4  ;;  %v2211_v60 = vsel %vm8421_vm14, %v2209_v38, %v2210_v26  ;;  %v2212_v4 = vrot.slane %v2210_v26, 4  ;;  %v2100_v41 = vshll.u32 %v9053_v47, 16 }
 0x3e6   :  { %2221 = vst.msk [vmem:[#allocation2 + $0x80] sm:$0xf] %vm344_vm6, %v2211_v60  ;;  %v2000_v8 = vsel %vm8441_vm2, %v1994_v58, %v1999_v35  ;;  %v2087_v11 = vor.u32 %v2086_v22, %v2083_v37  ;;  %v2092_v12 = vrot.slane %v2090_v43, 5  ;;  %v2096_v10 = vrot.slane %v2094_v13, 4 }
 0x3e7   :  { %v2152_v29 = vsel %vm8462_vm5, %v2150_v59, %v2151_v46  ;;  %v2214_v50 = vsel %vm8421_vm14, %v2212_v4, %v2213_v51  ;;  %2007 = vrot.lane.b32.xlu1 %v2000_v8, %s8270_s18  ;;  %v2102_v38 = vrot.slane %v2100_v41, 5  ;;  %v2161_v18 = vrot.slane %v2081_v15, 5 }
 0x3e8   :  { %2222 = vst.msk [vmem:[#allocation2 + $0x94] sm:$0xf] %vm344_vm6, %v2214_v50  ;;  %2160 = vst.msk [vmem:[#allocation2 + $0x90] sm:$0xf] %vm344_vm6, %v2152_v29  ;;  %v2088_v61 = vrot.slane %v2087_v11, 4  ;;  %v2097_v16 = vor.u32 %v2096_v10, %v2092_v12  ;;  %v2162_v19 = vrot.slane %v2084_v36, 6  ;;  %v2143_v54 = vsel %vm8462_vm5, %v6724_v25, %v2142_v9 }
 0x3e9   :  { %v2165_v28 = vrot.slane %v2094_v13, 5  ;;  %v2166_v58 = vrot.slane %v2090_v43, 6  ;;  %v2104_v42 = vshrl.u32 %v9053_v47, 16  ;;  %v2171_v37 = vrot.slane %v2100_v41, 6  ;;  %v7924_v26 = vld [vmem:[#allocation2 + $0x58] ss:$20 sps:$4 sm:$0xff]  }
 0x3ea   :  { %v2110_v46 = vshll.u32 %v9076_v53, 16  ;;  %v2093_v51 = vsel %vm8454_vm3, %v2088_v61, %v2092_v12  ;;  %v2098_v35 = vrot.slane %v2097_v16, 4  ;;  %v2163_v15 = vor.u32 %v2162_v19, %v2161_v18  ;;  %7690 = vmatprep.mubr.msk.bf16.mxu1 %vm221_vm4, %v7924_v26  ;;  %2157 = vst.msk [vmem:[#allocation2 + $0x54] sm:$0xf] %vm344_vm6, %v2143_v54  ;;  %v7952_v54 = vld [vmem:[#allocation4 + $0x270] sm:$0xff]  }
 0x3eb   :  { %v2114_v22 = vshrl.u32 %v9076_v53, 16  ;;  %2124 = vrot.lane.b32.xlu0 %v2093_v51, %s8270_s18  ;;  %v2167_v59 = vor.u32 %v2166_v58, %v2165_v28  ;;  %v2170_v60 = vrot.slane %v2104_v42, 5  ;;  %v2106_v36 = vrot.slane %v2104_v42, 4 }
 0x3ec   :  { %v2112_v13 = vrot.slane %v2110_v46, 5  ;;  %v2103_v43 = vsel %vm8454_vm3, %v2098_v35, %v2102_v38  ;;  %v2164_v4 = vrot.slane %v2163_v15, 4  ;;  %v2120_v8 = vshll.u32 %v9078_v32, 16 }
 0x3ed   :  { %v2116_v41 = vrot.slane %v2114_v22, 4  ;;  %v2145_v11 = vrot.slane %v9053_v47, 5  ;;  %2126 = vrot.lane.b32.xlu1 %v2103_v43, %s8270_s18  ;;  %v2172_v12 = vor.u32 %v2171_v37, %v2170_v60  ;;  %v2107_v10 = vor.u32 %v2106_v36, %v2102_v38 }
 0x3ee   :  { %v2175_v29 = vrot.slane %v2114_v22, 5  ;;  %v2168_v50 = vsel %vm8441_vm2, %v2164_v4, %v2167_v59  ;;  %v2169_v18 = vrot.slane %v2167_v59, 4  ;;  %v2176_v16 = vrot.slane %v2110_v46, 6 }
 0x3ef   :  { %v2117_v61 = vor.u32 %v2116_v41, %v2112_v13  ;;  %v2144_v19 = vrot.slane %v2142_v9, 4  ;;  %2186 = vrot.lane.b32.xlu0 %v2168_v50, %s8270_s18  ;;  %v2108_v28 = vrot.slane %v2107_v10, 4  ;;  %v2122_v58 = vrot.slane %v2120_v8, 5  ;;  %v7925_v26 = vld [vmem:[#allocation2 + $0x80] ss:$20 sps:$4 sm:$0xff]  }
 0x3f0   :  { %v2180_v47 = vshrl.u32 %v9078_v32, 16  ;;  %v2173_v42 = vsel %vm8441_vm2, %v2169_v18, %v2172_v12  ;;  %v2177_v37 = vor.u32 %v2176_v16, %v2175_v29  ;;  %v1961_v46 = vsel %vm8462_vm5, %v9004_v57, %v1960_v3  ;;  %7691 = vmatmul.mubr.msk.bf16.gmra.mxu1 %vm221_vm4, %v7925_v26 }
 0x3f1   :  { %v2118_v38 = vrot.slane %v2117_v61, 4  ;;  %v2147_v51 = vrot.slane %v2145_v11, 4  ;;  %2188 = vrot.lane.b32.xlu1 %v2173_v42, %s8270_s18  ;;  %v2113_v35 = vsel %vm8454_vm3, %v2108_v28, %v2112_v13  ;;  %1973 = vst.msk [vmem:[#allocation2 + $0x18] sm:$0xf] %vm344_vm6, %v1961_v46  ;;  %v1964_v32 = vsel %vm8462_vm5, %v9044_v24, %v1963_v6 }
 0x3f2   :  { %v2182_v3 = vrot.slane %v2180_v47, 5  ;;  %v2183_v15 = vrot.slane %v2120_v8, 6  ;;  %1974 = vst.msk [vmem:[#allocation2 + $0x2c] sm:$0xf] %vm344_vm6, %v1964_v32  ;;  %v2146_v17 = vsel %vm8462_vm5, %v2144_v19, %v2145_v11  ;;  %v2174_v39 = vrot.slane %v2172_v12, 4  ;;  %v7950_v32 = vld [vmem:[#allocation4 + $0x278] sm:$0xff]  }
 0x3f3   :  { %v2123_v57 = vsel %vm8454_vm3, %v2118_v38, %v2122_v58  ;;  %2128 = vrot.lane.b32.xlu0 %v2113_v35, %s8270_s18  ;;  %2158 = vst.msk [vmem:[#allocation2 + $0x68] sm:$0xf] %vm344_vm6, %v2146_v17  ;;  %v2149_v6 = vsel %vm8462_vm5, %v2147_v51, %v2148_v40  ;;  %v2179_v20 = vrot.slane %v2177_v37, 4  ;;  %v7948_v51 = vld [vmem:[#allocation4 + $0x288] sm:$0xff]   ;;  %v7949_v35 = vld [vmem:[#allocation4 + $0x280] sm:$0xff]  }
 0x3f4   :  { %2159 = vst.msk [vmem:[#allocation2 + $0x7c] sm:$0xf] %vm344_vm6, %v2149_v6  ;;  %v2178_v24 = vsel %vm8441_vm2, %v2174_v39, %v2177_v37  ;;  %v2184_v25 = vor.u32 %v2183_v15, %v2182_v3  ;;  %7694 = vmatprep.subr.bf16.mxu1 %v7948_v51  ;;  %v7957_v3 = vld [vmem:[#allocation4 + $0x228] sm:$0xff]   ;;  %v7958_v15 = vld [vmem:[#allocation4 + $0x260] sm:$0xff]   ;;  %v7960_v6 = vld [vmem:[#allocation4 + $0x258] sm:$0xff]  }
 0x3f5   :  { %2130 = vrot.lane.b32.xlu1 %v2123_v57, %s8270_s18  ;;  %7695 = vmatpush3.bf16.msra.mxu1 %v7948_v51  ;;  %v7956_v57 = vld [vmem:[#allocation4 + $0x268] sm:$0xff]   ;;  %v7959_v17 = vld [vmem:[#allocation4 + $0x220] sm:$0xff]   ;;  %v7961_v39 = vld [vmem:[#allocation4 + $0x218] sm:$0xff]  }
 0x3f6   :  { %v2185_v9 = vsel %vm8441_vm2, %v2179_v20, %v2184_v25  ;;  %7696 = vmatprep.subr.bf16.mxu1 %v7949_v35  ;;  %7315 = vmatprep.subr.bf16.mxu0 %v7956_v57  ;;  %v7962_v20 = vld [vmem:[#allocation4 + $0x250] sm:$0xff]  }
 0x3f7   :  { %2190 = vrot.lane.b32.xlu0 %v2178_v24, %s8270_s18  ;;  %v7963_v24 = vld [vmem:[#allocation4 + $0x210] sm:$0xff]  }
 0x3f9   :  { %2192 = vrot.lane.b32.xlu1 %v2185_v9, %s8270_s18  ;;  %7697 = vmatpush3.bf16.msra.mxu1 %v7949_v35 }
 0x3fa   :  { %7698 = vmatprep.subr.bf16.mxu1 %v7950_v32 }
 0x3fd   :  { %7699 = vmatpush3.bf16.msra.mxu1 %v7950_v32 }
 0x3fe   :  { %7700 = vmatprep.subr.bf16.mxu1 %v7952_v54 }
 0x401   :  { %7701 = vmatpush3.bf16.msra.mxu1 %v7952_v54 }
 0x43a   :  { %v1940_v53 = vpop.permute.xlu0 %1939 }
 0x43b   :  { %1951 = vst.msk [vmem:[#allocation2] sm:$0xf] %vm411_vm1, %v1940_v53 }
 0x441   :  { %v2002_v40 = vpop.permute.xlu0 %2001 }
 0x442   :  { %2013 = vst.msk [vmem:[#allocation2 + $0x4] sm:$0xf] %vm411_vm1, %v2002_v40  ;;  %v9190_v40 = vld [vmem:[%s9746_s2 + $0x3] ss:$0 sm:$0xff] }
 0x443   :  { %v1942_v22 = vpop.permute.xlu1 %1941 }
 0x444   :  { %1952 = vst.msk [vmem:[#allocation2 + $0x14] sm:$0xf] %vm411_vm1, %v1942_v22 }
 0x449   :  { %v2223_v36 = vld [vmem:[#allocation2] sm:$0xff] }
 0x44c   :  { %v2004_v59 = vpop.permute.xlu1 %2003 }
 0x44d   :  { %2014 = vst.msk [vmem:[#allocation2 + $0x18] sm:$0xf] %vm411_vm1, %v2004_v59 }
 0x44e   :  { %v1944_v60 = vpop.permute.xlu0 %1943 }
 0x44f   :  { %1953 = vst.msk [vmem:[#allocation2 + $0x28] sm:$0xf] %vm411_vm1, %v1944_v60 }
 0x454   :  { %v2225_v13 = vld [vmem:[#allocation2 + $0x14] sm:$0xff]  ;;  %v1946_v43 = vpop.permute.xlu1 %1945  ;;  %v2006_v4 = vpop.permute.xlu0 %2005 }
 0x455   :  { %1954 = vst.msk [vmem:[#allocation2 + $0x3c] sm:$0xf] %vm411_vm1, %v1946_v43  ;;  %2015 = vst.msk [vmem:[#allocation2 + $0x2c] sm:$0xf] %vm411_vm1, %v2006_v4  ;;  %v6728_v41 = vcombine.high %v2223_v36, %v2225_v13  ;;  %v6727_v8 = vcombine.low %v2223_v36, %v2225_v13 }
 0x457   :  { %2508 = vmatprep.mubr.bf16.mxu0 %v6728_v41 }
 0x458   :  { %2509 = vmatmul.mubr.bf16.vlgmr.msra.gmra.mxu0 %v6727_v8 }
 0x459   :  { %v2008_v11 = vpop.permute.xlu1 %2007  ;;  %7316 = vmatpush3.bf16.msra.mxu0 %v7957_v3 }
 0x45a   :  { %2016 = vst.msk [vmem:[#allocation2 + $0x40] sm:$0xf] %vm411_vm1, %v2008_v11  ;;  %7317 = vmatprep.subr.bf16.mxu0 %v7958_v15 }
 0x45c   :  { %v2227_v29 = vld [vmem:[#allocation2 + $0x28] sm:$0xff] }
 0x45d   :  { %v2125_v12 = vpop.permute.xlu0 %2124  ;;  %7318 = vmatpush3.bf16.msra.mxu0 %v7959_v17 }
 0x45e   :  { %2136 = vst.msk [vmem:[#allocation2 + $0x50] sm:$0xf] %vm411_vm1, %v2125_v12  ;;  %7319 = vmatprep.subr.bf16.mxu0 %v7960_v6 }
 0x45f   :  { %v2127_v10 = vpop.permute.xlu1 %2126 }
 0x460   :  { %2137 = vst.msk [vmem:[#allocation2 + $0x64] sm:$0xf] %vm411_vm1, %v2127_v10 }
 0x461   :  { %v2229_v50 = vld [vmem:[#allocation2 + $0x3c] sm:$0xff]  ;;  %v2187_v18 = vpop.permute.xlu0 %2186  ;;  %7320 = vmatpush3.bf16.msra.mxu0 %v7961_v39 }
 0x462   :  { %2198 = vst.msk [vmem:[#allocation2 + $0x54] sm:$0xf] %vm411_vm1, %v2187_v18  ;;  %v6731_v61 = vcombine.high %v2227_v29, %v2229_v50  ;;  %v6730_v16 = vcombine.low %v2227_v29, %v2229_v50  ;;  %7321 = vmatprep.subr.bf16.mxu0 %v7962_v20 }
 0x463   :  { %v2189_v19 = vpop.permute.xlu1 %2188 }
 0x464   :  { %2199 = vst.msk [vmem:[#allocation2 + $0x68] sm:$0xf] %vm411_vm1, %v2189_v19  ;;  %2516 = vmatprep.mubr.bf16.mxu0 %v6731_v61  ;;  %v7965_v19 = vld [vmem:[#allocation4 + $0x208] sm:$0xff]  }
 0x465   :  { %v2129_v28 = vpop.permute.xlu0 %2128  ;;  %2517 = vmatmul.mubr.bf16.gmra.mxu0 %v6730_v16  ;;  %v7964_v16 = vld [vmem:[#allocation4 + $0x248] sm:$0xff]  }
 0x466   :  { %2138 = vst.msk [vmem:[#allocation2 + $0x78] sm:$0xf] %vm411_vm1, %v2129_v28  ;;  %7322 = vmatpush3.bf16.msra.mxu0 %v7963_v24 }
 0x467   :  { %v2131_v58 = vpop.permute.xlu1 %2130  ;;  %v7944_v37 = vld [vmem:[#allocation2 + $0x50] ss:$20 sps:$4 sm:$0xff]   ;;  %7323 = vmatprep.subr.bf16.mxu0 %v7964_v16 }
 0x468   :  { %2139 = vst.msk [vmem:[#allocation2 + $0x8c] sm:$0xf] %vm411_vm1, %v2131_v58  ;;  %v7966_v16 = vld [vmem:[#allocation4 + $0x240] sm:$0xff]  }
 0x469   :  { %v2191_v47 = vpop.permute.xlu0 %2190 }
 0x46a   :  { %2200 = vst.msk [vmem:[#allocation2 + $0x7c] sm:$0xf] %vm411_vm1, %v2191_v47  ;;  %7324 = vmatpush3.bf16.msra.mxu0 %v7965_v19  ;;  %v7967_v19 = vld [vmem:[#allocation4 + $0x200] sm:$0xff]  }
 0x46b   :  { %v2193_v42 = vpop.permute.xlu1 %2192  ;;  %v7942_v38 = vld [vmem:[#allocation2 + $0x54] ss:$20 sps:$4 sm:$0xff]   ;;  %7325 = vmatprep.subr.bf16.mxu0 %v7966_v16 }
 0x46c   :  { %2201 = vst.msk [vmem:[#allocation2 + $0x90] sm:$0xf] %vm411_vm1, %v2193_v42  ;;  %2524 = vmatprep.mubr.bf16.mxu0 %v7942_v38 }
 0x46d   :  { %2525 = vmatmul.mubr.bf16.gmra.mxu0 %v7944_v37 }
 0x46e   :  { %7326 = vmatpush3.bf16.msra.mxu0 %v7967_v19 }
 0x46f   :  { %v7947_v46 = vld [vmem:[#allocation2 + $0x78] ss:$20 sps:$4 sm:$0xff]  }
 0x473   :  { %v7945_v26 = vld [vmem:[#allocation2 + $0x7c] ss:$20 sps:$4 sm:$0xff]  }
 0x474   :  { %2532 = vmatprep.mubr.bf16.mxu0 %v7945_v26 }
 0x475   :  { %2533 = vmatmul.mubr.bf16.gmra.mxu0 %v7947_v46 }
 0x49c   :  { %v7688_v25 = vpop.f32.mrf.mxu1 }
 0x49e   :  { %v2575_v53 = vpop.f32.mrf.mxu1 }
 0x4a0   :  { %v7689_v13 = vpop.f32.mrf.mxu1 }
 0x4a2   :  { %v2578_v12 = vpop.f32.mrf.mxu1 }
 0x4b0   :  { %v9198_v39 = vpop.f32.mrf.mxu1 }
 0x518   :  { %v7283_v9 = vpop.f32.mrf.mxu0 }
 0x51a   :  { %v7284_v22 = vpop.f32.mrf.mxu0 }
 0x51b   :  { %v7285_v59 = vadd.f32 %v7284_v22, %v7283_v9 }
 0x51c   :  { %v7286_v60 = vpop.f32.mrf.mxu0 }
 0x51d   :  { %v2511_v36 = vadd.f32 %v7285_v59, %v9190_v40 }
 0x51e   :  { %v7287_v43 = vpop.f32.mrf.mxu0 }
 0x51f   :  { %v2576_v4 = vadd.f32 %v2575_v53, %v2511_v36  ;;  %v7288_v41 = vadd.f32 %v7287_v43, %v7286_v60 }
 0x521   :  { %v2606_v8 = vmax.f32 %v2576_v4, 0.0  ;;  %v2514_v11 = vadd.f32 %v7288_v41, %v9190_v40 }
 0x523   :  { %v2618_v10 = vrot.slane %v2606_v8, 6  ;;  %v2579_v29 = vadd.f32 %v2578_v12, %v2514_v11 }
 0x525   :  { %v2630_v50 = vsel %vm99_vm0, 0.0, %v2618_v10  ;;  %v2607_v18 = vmax.f32 %v2579_v29, 0.0  ;;  %v7289_v61 = vpop.f32.mrf.mxu0 }
 0x526   :  { %v7113_v28 = vpack.c.bf16 %v2630_v50, %v2630_v50 }
 0x527   :  { %v2619_v58 = vrot.slane %v2607_v18, 6  ;;  %v7290_v47 = vpop.f32.mrf.mxu0 }
 0x528   :  { %2649 = vst.msk [vmem:[#allocation2] sm:$0xf] %vm344_vm6, %v7113_v28  ;;  %v7291_v42 = vadd.f32 %v7290_v47, %v7289_v61  ;;  %v2657_v38 = vshrl.u32 %v7113_v28, 16  ;;  %v2660_v46 = vshll.u32 %v7113_v28, 16  ;;  %v6768_v57 = vrot.slane %v7113_v28, 9 }
 0x529   :  { %v2620_v37 = vsel %vm99_vm0, %v2618_v10, %v2619_v58  ;;  %v7292_v26 = vpop.f32.mrf.mxu0  ;;  %v6769_v3 = vrot.slane %v7113_v28, 10  ;;  %v2591_v10 = vpop.f32.mrf.mxu1 }
 0x52a   :  { %v7114_v51 = vpack.c.bf16 %v2620_v37, %v2620_v37  ;;  %v2519_v35 = vadd.f32 %v7291_v42, %v9190_v40  ;;  %v2659_v32 = vrot.slane %v2657_v38, 4  ;;  %v2737_v54 = vrot.slane %v2657_v38, 5 }
 0x52b   :  { %v7293_v15 = vpop.f32.mrf.mxu0  ;;  %v2662_v17 = vrot.slane %v2660_v46, 5  ;;  %v2738_v6 = vrot.slane %v2660_v46, 6 }
 0x52c   :  { %v2718_v20 = vrot.slane %v7114_v51, 5  ;;  %v2780_v24 = vrot.slane %v7114_v51, 6  ;;  %2650 = vst.msk [vmem:[#allocation2 + $0x14] sm:$0xf] %vm344_vm6, %v7114_v51  ;;  %v2584_v9 = vadd.f32 %v7688_v25, %v2519_v35  ;;  %v7294_v53 = vadd.f32 %v7293_v15, %v7292_v26 }
 0x52d   :  { %v2663_v22 = vor.u32 %v2662_v17, %v2659_v32  ;;  %v2666_v59 = vshll.u32 %v7114_v51, 16  ;;  %v2670_v60 = vshrl.u32 %v7114_v51, 16  ;;  %v7295_v4 = vpop.f32.mrf.mxu0  ;;  %v2739_v41 = vor.u32 %v2738_v6, %v2737_v54 }
 0x52e   :  { %v2719_v36 = vsel %vm8462_vm5, %v6768_v57, %v2718_v20  ;;  %v2781_v43 = vsel %vm8421_vm14, %v6769_v3, %v2780_v24  ;;  %v2608_v8 = vmax.f32 %v2584_v9, 0.0  ;;  %v2522_v11 = vadd.f32 %v7294_v53, %v9190_v40 }
 0x52f   :  { %2795 = vst.msk [vmem:[#allocation2 + $0x8] sm:$0xf] %vm344_vm6, %v2781_v43  ;;  %2733 = vst.msk [vmem:[#allocation2 + $0x4] sm:$0xf] %vm344_vm6, %v2719_v36  ;;  %v2664_v25 = vrot.slane %v2663_v22, 4  ;;  %v2668_v12 = vrot.slane %v2666_v59, 5  ;;  %v7296_v29 = vpop.f32.mrf.mxu0 }
 0x530   :  { %v2672_v50 = vrot.slane %v2670_v60, 4  ;;  %v2741_v18 = vrot.slane %v2670_v60, 5  ;;  %v2742_v61 = vrot.slane %v2666_v59, 6  ;;  %v2621_v28 = vrot.slane %v2608_v8, 6 }
 0x531   :  { %v2587_v47 = vadd.f32 %v7689_v13, %v2522_v11  ;;  %v7297_v42 = vadd.f32 %v7296_v29, %v7295_v4  ;;  %v2669_v38 = vsel %vm8454_vm3, %v2664_v25, %v2668_v12  ;;  %v7298_v37 = vpop.f32.mrf.mxu0  ;;  %v2740_v46 = vrot.slane %v2739_v41, 4  ;;  %v9215_v13 = vpop.f32.mrf.mxu1 }
 0x532   :  { %2700 = vrot.lane.b32.xlu0 %v2669_v38, %s8270_s18  ;;  %v2673_v26 = vor.u32 %v2672_v50, %v2668_v12  ;;  %v9211_v51 = vor.u32 %v2742_v61, %v2741_v18  ;;  %v2720_v35 = vrot.slane %v2718_v20, 4  ;;  %v2622_v32 = vsel %vm99_vm0, %v2619_v58, %v2621_v28 }
 0x533   :  { %v2609_v54 = vmax.f32 %v2587_v47, 0.0  ;;  %v2527_v57 = vadd.f32 %v7297_v42, %v9190_v40  ;;  %v2782_v3 = vrot.slane %v2780_v24, 4  ;;  %v9217_v15 = vpack.c.bf16 %v2622_v32, %v2622_v32  ;;  %v7299_v17 = vpop.f32.mrf.mxu0  ;;  %v2594_v25 = vpop.f32.mrf.mxu1 }
 0x534   :  { %v2674_v6 = vrot.slane %v2673_v26, 4  ;;  %v2744_v9 = vsel %vm8441_vm2, %v2740_v46, %v9211_v51  ;;  %v7300_v20 = vadd.f32 %v7299_v17, %v7298_v37  ;;  %v2745_v58 = vrot.slane %v9211_v51, 4  ;;  %v7968_v46 = vld [vmem:[#allocation4 + $0x238] sm:$0xff]  }
 0x535   :  { %v2623_v53 = vrot.slane %v2609_v54, 6  ;;  %v2592_v22 = vadd.f32 %v2591_v10, %v2527_v57  ;;  %v2721_v59 = vrot.slane %v9217_v15, 5  ;;  %v2783_v60 = vrot.slane %v9217_v15, 6  ;;  %2651 = vst.msk [vmem:[#allocation2 + $0x28] sm:$0xf] %vm344_vm6, %v9217_v15  ;;  %v7301_v24 = vpop.f32.mrf.mxu0  ;;  %7327 = vmatprep.subr.bf16.mxu0 %v7968_v46 }
 0x536   :  { %v2676_v36 = vshll.u32 %v9217_v15, 16  ;;  %2762 = vrot.lane.b32.xlu0 %v2744_v9, %s8270_s18  ;;  %v2680_v43 = vshrl.u32 %v9217_v15, 16  ;;  %v2530_v11 = vadd.f32 %v7300_v20, %v9190_v40 }
 0x537   :  { %v2624_v4 = vsel %vm99_vm0, %v2621_v28, %v2623_v53  ;;  %v2631_v41 = vsel %vm325_vm15, %v2623_v53, 0.0  ;;  %v2610_v8 = vmax.f32 %v2592_v22, 0.0  ;;  %v2722_v12 = vsel %vm8462_vm5, %v2720_v35, %v2721_v59  ;;  %v7302_v18 = vpop.f32.mrf.mxu0  ;;  %v7969_v35 = vld [vmem:[#allocation4 + $0x1f8] sm:$0xff]  }
 0x538   :  { %v2723_v10 = vrot.slane %v2721_v59, 4  ;;  %v2784_v29 = vsel %vm8421_vm14, %v2782_v3, %v2783_v60  ;;  %v2785_v50 = vrot.slane %v2783_v60, 4  ;;  %2734 = vst.msk [vmem:[#allocation2 + $0x18] sm:$0xf] %vm344_vm6, %v2722_v12  ;;  %v9239_v61 = vpack.c.bf16 %v2624_v4, %v2624_v4  ;;  %7328 = vmatpush3.bf16.msra.mxu0 %v7969_v35 }
 0x539   :  { %2796 = vst.msk [vmem:[#allocation2 + $0x1c] sm:$0xf] %vm344_vm6, %v2784_v29  ;;  %v9241_v16 = vpack.c.bf16 %v2631_v41, %v2631_v41  ;;  %v2803_v19 = vrot.slane %v2610_v8, 6  ;;  %v2595_v28 = vadd.f32 %v2594_v25, %v2530_v11  ;;  %v7303_v47 = vadd.f32 %v7302_v18, %v7301_v24  ;;  %v7304_v38 = vpop.f32.mrf.mxu0  ;;  %v7971_v29 = vld [vmem:[#allocation4 + $0x1f0] sm:$0xff]  }
 0x53a   :  { %v2678_v42 = vrot.slane %v2676_v36, 5  ;;  %v2746_v37 = vrot.slane %v2680_v43, 5  ;;  %v2747_v26 = vrot.slane %v2676_v36, 6  ;;  %v2724_v32 = vrot.slane %v9239_v61, 5  ;;  %2652 = vst.msk [vmem:[#allocation2 + $0x3c] sm:$0xf] %vm344_vm6, %v9239_v61 }
 0x53b   :  { %v2727_v54 = vrot.slane %v9241_v16, 5  ;;  %v2786_v57 = vrot.slane %v9239_v61, 6  ;;  %v2789_v3 = vrot.slane %v9241_v16, 6  ;;  %v2815_v15 = vsel %vm99_vm0, 0.0, %v2803_v19  ;;  %v7305_v22 = vpop.f32.mrf.mxu0 }
 0x53c   :  { %v2611_v17 = vmax.f32 %v2595_v28, 0.0  ;;  %v2535_v9 = vadd.f32 %v7303_v47, %v9190_v40  ;;  %v2679_v53 = vsel %vm8454_vm3, %v2674_v6, %v2678_v42  ;;  %v2725_v20 = vsel %vm8462_vm5, %v2723_v10, %v2724_v32  ;;  %v7970_v10 = vld [vmem:[#allocation4 + $0x230] sm:$0xff]  }
 0x53d   :  { %v2726_v59 = vrot.slane %v2724_v32, 4  ;;  %v2787_v60 = vsel %vm8421_vm14, %v2785_v50, %v2786_v57  ;;  %v2788_v24 = vrot.slane %v2786_v57, 4  ;;  %2702 = vrot.lane.b32.xlu1 %v2679_v53, %s8270_s18  ;;  %2735 = vst.msk [vmem:[#allocation2 + $0x2c] sm:$0xf] %vm344_vm6, %v2725_v20  ;;  %v9260_v36 = vpack.c.bf16 %v2815_v15, %v2815_v15  ;;  %7329 = vmatprep.subr.bf16.mxu0 %v7970_v10 }
 0x53e   :  { %2797 = vst.msk [vmem:[#allocation2 + $0x30] sm:$0xf] %vm344_vm6, %v2787_v60  ;;  %v2804_v6 = vrot.slane %v2611_v17, 6  ;;  %v2600_v4 = vadd.f32 %v9198_v39, %v2535_v9  ;;  %v7306_v41 = vadd.f32 %v7305_v22, %v7304_v38  ;;  %v9267_v25 = vor.u32 %v2747_v26, %v2746_v37  ;;  %7330 = vmatpush3.bf16.msra.mxu0 %v7971_v29 }
 0x53f   :  { %v2728_v8 = vsel %vm8462_vm5, %v2726_v59, %v2727_v54  ;;  %v2790_v11 = vsel %vm8421_vm14, %v2788_v24, %v2789_v3  ;;  %v2682_v12 = vrot.slane %v2680_v43, 4  ;;  %v6775_v50 = vrot.slane %v9260_v36, 9  ;;  %2834 = vst.msk [vmem:[#allocation2 + $0x50] sm:$0xf] %vm344_vm6, %v9260_v36 }
 0x540   :  { %2798 = vst.msk [vmem:[#allocation2 + $0x44] sm:$0xf] %vm344_vm6, %v2790_v11  ;;  %2736 = vst.msk [vmem:[#allocation2 + $0x40] sm:$0xf] %vm344_vm6, %v2728_v8  ;;  %v6776_v39 = vrot.slane %v9260_v36, 10  ;;  %v2805_v18 = vsel %vm99_vm0, %v2803_v19, %v2804_v6  ;;  %v2612_v28 = vmax.f32 %v2600_v4, 0.0  ;;  %v2538_v43 = vadd.f32 %v7306_v41, %v9190_v40 }
 0x541   :  { %v9276_v47 = vpack.c.bf16 %v2805_v18, %v2805_v18  ;;  %v2749_v38 = vsel %vm8441_vm2, %v2745_v58, %v9267_v25  ;;  %v2683_v37 = vor.u32 %v2682_v12, %v2678_v42  ;;  %v7951_v26 = vld [vmem:[#allocation2 + $0x8] ss:$20 sps:$4 sm:$0xff]   ;;  %v2686_v35 = vshll.u32 %v9239_v61, 16 }
 0x542   :  { %v2806_v46 = vrot.slane %v2612_v28, 6  ;;  %2764 = vrot.lane.b32.xlu1 %v2749_v38, %s8270_s18  ;;  %v2690_v19 = vshrl.u32 %v9239_v61, 16  ;;  %v2696_v32 = vshll.u32 %v9241_v16, 16  ;;  %v2603_v58 = vadd.f32 %v9215_v13, %v2538_v43  ;;  %7702 = vmatprep.mubr.msk.bf16.mxu1 %vm221_vm4, %v7951_v26 }
 0x543   :  { %v2903_v40 = vrot.slane %v9276_v47, 5  ;;  %v2965_v51 = vrot.slane %v9276_v47, 6  ;;  %2835 = vst.msk [vmem:[#allocation2 + $0x64] sm:$0xf] %vm344_vm6, %v9276_v47  ;;  %v2684_v42 = vrot.slane %v2683_v37, 4  ;;  %v2688_v57 = vrot.slane %v2686_v35, 5 }
 0x544   :  { %v2807_v54 = vsel %vm99_vm0, %v2804_v6, %v2806_v46  ;;  %v2692_v3 = vrot.slane %v2690_v19, 4  ;;  %v2698_v61 = vrot.slane %v2696_v32, 5  ;;  %v2613_v22 = vmax.f32 %v2603_v58, 0.0 }
 0x545   :  { %v2904_v15 = vsel %vm8462_vm5, %v6775_v50, %v2903_v40  ;;  %v2905_v17 = vrot.slane %v2903_v40, 4  ;;  %v2966_v9 = vsel %vm8421_vm14, %v6776_v39, %v2965_v51  ;;  %v2967_v53 = vrot.slane %v2965_v51, 4 }
 0x546   :  { %2980 = vst.msk [vmem:[#allocation2 + $0x58] sm:$0xf] %vm344_vm6, %v2966_v9  ;;  %2918 = vst.msk [vmem:[#allocation2 + $0x54] sm:$0xf] %vm344_vm6, %v2904_v15  ;;  %v9301_v13 = vpack.c.bf16 %v2807_v54, %v2807_v54  ;;  %v2689_v20 = vsel %vm8454_vm3, %v2684_v42, %v2688_v57  ;;  %v2693_v59 = vor.u32 %v2692_v3, %v2688_v57  ;;  %v2750_v60 = vrot.slane %v9267_v25, 4 }
 0x547   :  { %2704 = vrot.lane.b32.xlu0 %v2689_v20, %s8270_s18  ;;  %v2751_v24 = vrot.slane %v2690_v19, 5  ;;  %v2752_v6 = vrot.slane %v2686_v35, 6  ;;  %v2756_v4 = vshrl.u32 %v9241_v16, 16  ;;  %v2808_v11 = vrot.slane %v2613_v22, 6  ;;  %v7953_v10 = vld [vmem:[#allocation2 + $0x30] ss:$20 sps:$4 sm:$0xff]  }
 0x548   :  { %v2906_v41 = vrot.slane %v9301_v13, 5  ;;  %v2968_v8 = vrot.slane %v9301_v13, 6  ;;  %2836 = vst.msk [vmem:[#allocation2 + $0x78] sm:$0xf] %vm344_vm6, %v9301_v13  ;;  %v2694_v12 = vrot.slane %v2693_v59, 4  ;;  %v2759_v39 = vrot.slane %v2696_v32, 6  ;;  %7703 = vmatmul.mubr.msk.bf16.vlgmr.msra.gmra.mxu1 %vm221_vm4, %v7953_v10 }
 0x549   :  { %v2753_v29 = vor.u32 %v2752_v6, %v2751_v24  ;;  %v2758_v50 = vrot.slane %v2756_v4, 5  ;;  %v2842_v18 = vshrl.u32 %v9260_v36, 16  ;;  %v2809_v38 = vsel %vm99_vm0, %v2806_v46, %v2808_v11 }
 0x54a   :  { %v2907_v25 = vsel %vm8462_vm5, %v2905_v17, %v2906_v41  ;;  %v2908_v28 = vrot.slane %v2906_v41, 4  ;;  %v2969_v16 = vsel %vm8421_vm14, %v2967_v53, %v2968_v8  ;;  %v2970_v43 = vrot.slane %v2968_v8, 4 }
 0x54b   :  { %2981 = vst.msk [vmem:[#allocation2 + $0x6c] sm:$0xf] %vm344_vm6, %v2969_v16  ;;  %2919 = vst.msk [vmem:[#allocation2 + $0x68] sm:$0xf] %vm344_vm6, %v2907_v25  ;;  %v2816_v37 = vsel %vm325_vm15, %v2808_v11, 0.0  ;;  %v2699_v26 = vsel %vm8454_vm3, %v2694_v12, %v2698_v61  ;;  %v2754_v35 = vsel %vm8441_vm2, %v2750_v60, %v2753_v29  ;;  %v7121_v19 = vpack.c.bf16 %v2809_v38, %v2809_v38 }
 0x54c   :  { %v9326_v32 = vpack.c.bf16 %v2816_v37, %v2816_v37  ;;  %2706 = vrot.lane.b32.xlu1 %v2699_v26, %s8270_s18  ;;  %2766 = vrot.lane.b32.xlu0 %v2754_v35, %s8270_s18  ;;  %v2755_v40 = vrot.slane %v2753_v29, 4  ;;  %v2760_v51 = vor.u32 %v2759_v39, %v2758_v50  ;;  %v2844_v58 = vrot.slane %v2842_v18, 4 }
 0x54d   :  { %v2845_v46 = vshll.u32 %v9260_v36, 16  ;;  %v2851_v42 = vshll.u32 %v9276_v47, 16  ;;  %v2855_v54 = vshrl.u32 %v9276_v47, 16  ;;  %v2909_v57 = vrot.slane %v7121_v19, 5  ;;  %2837 = vst.msk [vmem:[#allocation2 + $0x8c] sm:$0xf] %vm344_vm6, %v7121_v19 }
 0x54e   :  { %v2912_v3 = vrot.slane %v9326_v32, 5  ;;  %v2971_v61 = vrot.slane %v7121_v19, 6  ;;  %v2974_v15 = vrot.slane %v9326_v32, 6  ;;  %v2761_v17 = vsel %vm8441_vm2, %v2755_v40, %v2760_v51 }
 0x54f   :  { %v2847_v9 = vrot.slane %v2845_v46, 5  ;;  %v2853_v53 = vrot.slane %v2851_v42, 5  ;;  %v2857_v22 = vrot.slane %v2855_v54, 4  ;;  %v2910_v36 = vsel %vm8462_vm5, %v2908_v28, %v2909_v57 }
 0x550   :  { %v2911_v20 = vrot.slane %v2909_v57, 4  ;;  %v2972_v47 = vsel %vm8421_vm14, %v2970_v43, %v2971_v61  ;;  %v2973_v59 = vrot.slane %v2971_v61, 4  ;;  %2768 = vrot.lane.b32.xlu1 %v2761_v17, %s8270_s18  ;;  %2920 = vst.msk [vmem:[#allocation2 + $0x7c] sm:$0xf] %vm344_vm6, %v2910_v36  ;;  %v2861_v6 = vshll.u32 %v9301_v13, 16 }
 0x551   :  { %2982 = vst.msk [vmem:[#allocation2 + $0x80] sm:$0xf] %vm344_vm6, %v2972_v47  ;;  %v2848_v60 = vor.u32 %v2847_v9, %v2844_v58  ;;  %v2858_v24 = vor.u32 %v2857_v22, %v2853_v53  ;;  %v2922_v4 = vrot.slane %v2842_v18, 5  ;;  %v2923_v11 = vrot.slane %v2845_v46, 6 }
 0x552   :  { %v2913_v41 = vsel %vm8462_vm5, %v2911_v20, %v2912_v3  ;;  %v2975_v8 = vsel %vm8421_vm14, %v2973_v59, %v2974_v15  ;;  %v2926_v12 = vrot.slane %v2855_v54, 5  ;;  %v7954_v10 = vld [vmem:[#allocation2 + $0x58] ss:$20 sps:$4 sm:$0xff]   ;;  %v2863_v39 = vrot.slane %v2861_v6, 5 }
 0x553   :  { %2983 = vst.msk [vmem:[#allocation2 + $0x94] sm:$0xf] %vm344_vm6, %v2975_v8  ;;  %2921 = vst.msk [vmem:[#allocation2 + $0x90] sm:$0xf] %vm344_vm6, %v2913_v41  ;;  %v2849_v29 = vrot.slane %v2848_v60, 4  ;;  %v2859_v50 = vrot.slane %v2858_v24, 4  ;;  %v2924_v28 = vor.u32 %v2923_v11, %v2922_v4  ;;  %7706 = vmatprep.mubr.msk.bf16.mxu1 %vm221_vm4, %v7954_v10 }
 0x554   :  { %v2927_v25 = vrot.slane %v2851_v42, 6  ;;  %v2865_v18 = vshrl.u32 %v9301_v13, 16  ;;  %v2932_v16 = vrot.slane %v2861_v6, 6  ;;  %v2871_v43 = vshll.u32 %v7121_v19, 16 }
 0x555   :  { %v2854_v38 = vsel %vm8454_vm3, %v2849_v29, %v2853_v53  ;;  %v2864_v37 = vsel %vm8454_vm3, %v2859_v50, %v2863_v39  ;;  %v2875_v35 = vshrl.u32 %v7121_v19, 16  ;;  %v2925_v13 = vrot.slane %v2924_v28, 4 }
 0x556   :  { %v2928_v26 = vor.u32 %v2927_v25, %v2926_v12  ;;  %2885 = vrot.lane.b32.xlu0 %v2854_v38, %s8270_s18  ;;  %2887 = vrot.lane.b32.xlu1 %v2864_v37, %s8270_s18  ;;  %v2931_v40 = vrot.slane %v2865_v18, 5  ;;  %v2867_v51 = vrot.slane %v2865_v18, 4  ;;  %v2873_v58 = vrot.slane %v2871_v43, 5 }
 0x557   :  { %v2877_v46 = vrot.slane %v2875_v35, 4  ;;  %v2881_v42 = vshll.u32 %v9326_v32, 16  ;;  %v2936_v54 = vrot.slane %v2875_v35, 5  ;;  %v2937_v15 = vrot.slane %v2871_v43, 6 }
 0x558   :  { %v2930_v57 = vrot.slane %v2928_v26, 4  ;;  %v2933_v3 = vor.u32 %v2932_v16, %v2931_v40  ;;  %v2868_v61 = vor.u32 %v2867_v51, %v2863_v39  ;;  %v2929_v17 = vsel %vm8441_vm2, %v2925_v13, %v2928_v26 }
 0x559   :  { %v2878_v19 = vor.u32 %v2877_v46, %v2873_v58  ;;  %v2941_v9 = vshrl.u32 %v9326_v32, 16  ;;  %v2938_v36 = vor.u32 %v2937_v15, %v2936_v54  ;;  %v2883_v59 = vrot.slane %v2881_v42, 5 }
 0x55a   :  { %2947 = vrot.lane.b32.xlu0 %v2929_v17, %s8270_s18  ;;  %v2934_v53 = vsel %vm8441_vm2, %v2930_v57, %v2933_v3  ;;  %v2869_v22 = vrot.slane %v2868_v61, 4  ;;  %v7955_v20 = vld [vmem:[#allocation2 + $0x80] ss:$20 sps:$4 sm:$0xff]   ;;  %v2944_v6 = vrot.slane %v2881_v42, 6  ;;  %v2935_v41 = vrot.slane %v2933_v3, 4  ;;  %v7985_v17 = vld [vmem:[#allocation4 + $0x328] sm:$0xff]  }
 0x55b   :  { %2949 = vrot.lane.b32.xlu1 %v2934_v53, %s8270_s18  ;;  %v2879_v47 = vrot.slane %v2878_v19, 4  ;;  %v2943_v24 = vrot.slane %v2941_v9, 5  ;;  %7707 = vmatmul.mubr.msk.bf16.gmra.mxu1 %vm221_vm4, %v7955_v20  ;;  %v2940_v4 = vrot.slane %v2938_v36, 4  ;;  %v7986_v19 = vld [vmem:[#allocation4 + $0x320] sm:$0xff]   ;;  %v7987_v9 = vld [vmem:[#allocation4 + $0x318] sm:$0xff]   ;;  %v7988_v53 = vld [vmem:[#allocation4 + $0x310] sm:$0xff]  }
 0x55c   :  { %v2874_v60 = vsel %vm8454_vm3, %v2869_v22, %v2873_v58  ;;  %v2939_v11 = vsel %vm8441_vm2, %v2935_v41, %v2938_v36  ;;  %7710 = vmatprep.subr.bf16.mxu0 %v7985_v17  ;;  %v7990_v22 = vld [vmem:[#allocation4 + $0x308] sm:$0xff]   ;;  %v7992_v20 = vld [vmem:[#allocation4 + $0x300] sm:$0xff]  }
 0x55d   :  { %v2884_v32 = vsel %vm8454_vm3, %v2879_v47, %v2883_v59  ;;  %v2945_v8 = vor.u32 %v2944_v6, %v2943_v24  ;;  %v7991_v36 = vld [vmem:[#allocation4 + $0x2c8] sm:$0xff]   ;;  %7363 = vmatprep.subr.bf16.mxu1 %v7990_v22  ;;  %v7993_v47 = vld [vmem:[#allocation4 + $0x2c0] sm:$0xff]   ;;  %v7994_v59 = vld [vmem:[#allocation4 + $0x2f8] sm:$0xff]  }
 0x55e   :  { %2889 = vrot.lane.b32.xlu0 %v2874_v60, %s8270_s18  ;;  %7364 = vmatpush3.bf16.msra.mxu1 %v7991_v36 }
 0x55f   :  { %2891 = vrot.lane.b32.xlu1 %v2884_v32, %s8270_s18  ;;  %v2946_v12 = vsel %vm8441_vm2, %v2940_v4, %v2945_v8  ;;  %7365 = vmatprep.subr.bf16.mxu1 %v7992_v20  ;;  %v9404_v32 = vld [vmem:[%s9746_s2 + $0x4] ss:$0 sm:$0xff] }
 0x562   :  { %2951 = vrot.lane.b32.xlu0 %v2939_v11, %s8270_s18  ;;  %7366 = vmatpush3.bf16.msra.mxu1 %v7993_v47 }
 0x563   :  { %2953 = vrot.lane.b32.xlu1 %v2946_v12, %s8270_s18  ;;  %7367 = vmatprep.subr.bf16.mxu1 %v7994_v59 }
 0x5a4   :  { %v2701_v10 = vpop.permute.xlu0 %2700 }
 0x5a5   :  { %2712 = vst.msk [vmem:[#allocation2] sm:$0xf] %vm411_vm1, %v2701_v10 }
 0x5a8   :  { %v2763_v29 = vpop.permute.xlu0 %2762 }
 0x5a9   :  { %2774 = vst.msk [vmem:[#allocation2 + $0x4] sm:$0xf] %vm411_vm1, %v2763_v29 }
 0x5af   :  { %v2703_v50 = vpop.permute.xlu1 %2702 }
 0x5b0   :  { %2713 = vst.msk [vmem:[#allocation2 + $0x14] sm:$0xf] %vm411_vm1, %v2703_v50 }
 0x5b4   :  { %v2765_v39 = vpop.permute.xlu1 %2764 }
 0x5b5   :  { %2775 = vst.msk [vmem:[#allocation2 + $0x18] sm:$0xf] %vm411_vm1, %v2765_v39 }
 0x5b7   :  { %v7974_v18 = vld [vmem:[#allocation2] ss:$20 sps:$4 sm:$0xff]  }
 0x5b9   :  { %v2705_v25 = vpop.permute.xlu0 %2704 }
 0x5ba   :  { %2714 = vst.msk [vmem:[#allocation2 + $0x28] sm:$0xf] %vm411_vm1, %v2705_v25 }
 0x5bc   :  { %v7972_v28 = vld [vmem:[#allocation2 + $0x4] ss:$20 sps:$4 sm:$0xff]  }
 0x5bd   :  { %3269 = vmatprep.mubr.bf16.mxu0 %v7972_v28 }
 0x5be   :  { %v2707_v16 = vpop.permute.xlu1 %2706  ;;  %v2767_v43 = vpop.permute.xlu0 %2766  ;;  %3270 = vmatmul.mubr.bf16.vlgmr.msra.gmra.mxu0 %v7974_v18 }
 0x5bf   :  { %2715 = vst.msk [vmem:[#allocation2 + $0x3c] sm:$0xf] %vm411_vm1, %v2707_v16  ;;  %2776 = vst.msk [vmem:[#allocation2 + $0x2c] sm:$0xf] %vm411_vm1, %v2767_v43  ;;  %7711 = vmatpush3.bf16.msra.mxu0 %v7985_v17 }
 0x5c0   :  { %7712 = vmatprep.subr.bf16.mxu0 %v7986_v19 }
 0x5c2   :  { %v2769_v38 = vpop.permute.xlu1 %2768 }
 0x5c3   :  { %2777 = vst.msk [vmem:[#allocation2 + $0x40] sm:$0xf] %vm411_vm1, %v2769_v38  ;;  %7713 = vmatpush3.bf16.msra.mxu0 %v7986_v19 }
 0x5c4   :  { %7714 = vmatprep.subr.bf16.mxu0 %v7987_v9 }
 0x5c6   :  { %v7977_v40 = vld [vmem:[#allocation2 + $0x28] ss:$20 sps:$4 sm:$0xff]  }
 0x5c7   :  { %7715 = vmatpush3.bf16.msra.mxu0 %v7987_v9 }
 0x5c8   :  { %v2886_v37 = vpop.permute.xlu0 %2885  ;;  %v2888_v26 = vpop.permute.xlu1 %2887  ;;  %7716 = vmatprep.subr.bf16.mxu0 %v7988_v53 }
 0x5c9   :  { %2897 = vst.msk [vmem:[#allocation2 + $0x50] sm:$0xf] %vm411_vm1, %v2886_v37  ;;  %2898 = vst.msk [vmem:[#allocation2 + $0x64] sm:$0xf] %vm411_vm1, %v2888_v26  ;;  %v7995_v37 = vld [vmem:[#allocation4 + $0x2b8] sm:$0xff]   ;;  %v7996_v26 = vld [vmem:[#allocation4 + $0x2f0] sm:$0xff]  }
 0x5ca   :  { %v7975_v35 = vld [vmem:[#allocation2 + $0x2c] ss:$20 sps:$4 sm:$0xff]   ;;  %7368 = vmatpush3.bf16.msra.mxu1 %v7995_v37 }
 0x5cb   :  { %3277 = vmatprep.mubr.bf16.mxu0 %v7975_v35  ;;  %7717 = vmatpush3.bf16.msra.mxu0 %v7988_v53 }
 0x5cc   :  { %v2948_v51 = vpop.permute.xlu0 %2947  ;;  %3278 = vmatmul.mubr.bf16.gmra.mxu0 %v7977_v40  ;;  %7369 = vmatprep.subr.bf16.mxu1 %v7996_v26 }
 0x5cd   :  { %2959 = vst.msk [vmem:[#allocation2 + $0x54] sm:$0xf] %vm411_vm1, %v2948_v51  ;;  %v2950_v58 = vpop.permute.xlu1 %2949  ;;  %v7997_v51 = vld [vmem:[#allocation4 + $0x2b0] sm:$0xff]  }
 0x5ce   :  { %2960 = vst.msk [vmem:[#allocation2 + $0x68] sm:$0xf] %vm411_vm1, %v2950_v58  ;;  %v7998_v58 = vld [vmem:[#allocation4 + $0x2e8] sm:$0xff]   ;;  %7370 = vmatpush3.bf16.msra.mxu1 %v7997_v51 }
 0x5cf   :  { %7371 = vmatprep.subr.bf16.mxu1 %v7998_v58 }
 0x5d0   :  { %v2890_v13 = vpop.permute.xlu0 %2889  ;;  %v7980_v3 = vld [vmem:[#allocation2 + $0x50] ss:$20 sps:$4 sm:$0xff]  }
 0x5d1   :  { %2899 = vst.msk [vmem:[#allocation2 + $0x78] sm:$0xf] %vm411_vm1, %v2890_v13  ;;  %v2892_v46 = vpop.permute.xlu1 %2891 }
 0x5d2   :  { %2900 = vst.msk [vmem:[#allocation2 + $0x8c] sm:$0xf] %vm411_vm1, %v2892_v46 }
 0x5d4   :  { %v2952_v42 = vpop.permute.xlu0 %2951 }
 0x5d5   :  { %2961 = vst.msk [vmem:[#allocation2 + $0x7c] sm:$0xf] %vm411_vm1, %v2952_v42  ;;  %v2954_v54 = vpop.permute.xlu1 %2953  ;;  %v7978_v57 = vld [vmem:[#allocation2 + $0x54] ss:$20 sps:$4 sm:$0xff]  }
 0x5d6   :  { %2962 = vst.msk [vmem:[#allocation2 + $0x90] sm:$0xf] %vm411_vm1, %v2954_v54  ;;  %3285 = vmatprep.mubr.bf16.mxu0 %v7978_v57 }
 0x5d7   :  { %3286 = vmatmul.mubr.bf16.gmra.mxu0 %v7980_v3 }
 0x5d9   :  { %v7983_v15 = vld [vmem:[#allocation2 + $0x78] ss:$20 sps:$4 sm:$0xff]  }
 0x5dd   :  { %v7981_v61 = vld [vmem:[#allocation2 + $0x7c] ss:$20 sps:$4 sm:$0xff]  }
 0x5de   :  { %3293 = vmatprep.mubr.bf16.mxu0 %v7981_v61 }
 0x5df   :  { %3294 = vmatmul.mubr.bf16.gmra.mxu0 %v7983_v15 }
 0x608   :  { %v7704_v60 = vpop.f32.mrf.mxu1 }
 0x60a   :  { %v3336_v6 = vpop.f32.mrf.mxu1 }
 0x60c   :  { %v7705_v12 = vpop.f32.mrf.mxu1 }
 0x60e   :  { %v3339_v28 = vpop.f32.mrf.mxu1 }
 0x67e   :  { %v7331_v24 = vpop.f32.mrf.mxu0 }
 0x680   :  { %v7332_v4 = vpop.f32.mrf.mxu0 }
 0x681   :  { %v7333_v41 = vadd.f32 %v7332_v4, %v7331_v24  ;;  %v8000_v24 = vld [vmem:[#allocation4 + $0x2e0] sm:$0xff]  }
 0x682   :  { %v7334_v8 = vpop.f32.mrf.mxu0 }
 0x683   :  { %v3272_v11 = vadd.f32 %v7333_v41, %v9404_v32 }
 0x684   :  { %v7335_v10 = vpop.f32.mrf.mxu0 }
 0x685   :  { %v3337_v29 = vadd.f32 %v3336_v6, %v3272_v11  ;;  %v7336_v50 = vadd.f32 %v7335_v10, %v7334_v8  ;;  %v8001_v10 = vld [vmem:[#allocation4 + $0x2a0] sm:$0xff]  }
 0x687   :  { %v3367_v39 = vadd.f32 %v3337_v29, %v1845_v5  ;;  %v3275_v25 = vadd.f32 %v7336_v50, %v9404_v32  ;;  %v8002_v29 = vld [vmem:[#allocation4 + $0x2d8] sm:$0xff]  }
 0x689   :  { %v3375_v18 = vmax.f32 %v3367_v39, 0.0  ;;  %v3340_v16 = vadd.f32 %v3339_v28, %v3275_v25 }
 0x68b   :  { %3385 = vst.msk [vmem:[#allocation3 + $0x2] sm:$0xff] %vm221_vm4, %v3375_v18  ;;  %v3368_v43 = vadd.f32 %v3340_v16, %v1846_v21  ;;  %v9415_v21 = vpop.f32.mrf.mxu1  ;;  %v8003_v18 = vld [vmem:[#allocation4 + $0x298] sm:$0xff]  }
 0x68c   :  { %v7337_v38 = vpop.f32.mrf.mxu0 }
 0x68d   :  { %v3376_v35 = vmax.f32 %v3368_v43, 0.0  ;;  %v3352_v47 = vpop.f32.mrf.mxu1 }
 0x68e   :  { %v7338_v40 = vpop.f32.mrf.mxu0 }
 0x68f   :  { %3386 = vst.msk [vmem:[#allocation3 + $0xa] sm:$0xff] %vm221_vm4, %v3376_v35  ;;  %v7339_v63 = vadd.f32 %v7338_v40, %v7337_v38  ;;  %v7709_v11 = vpop.f32.mrf.mxu1 }
 0x690   :  { %v7340_v5 = vpop.f32.mrf.mxu0 }
 0x691   :  { %v3280_v13 = vadd.f32 %v7339_v63, %v9404_v32  ;;  %v3355_v16 = vpop.f32.mrf.mxu1 }
 0x692   :  { %v7341_v46 = vpop.f32.mrf.mxu0 }
 0x693   :  { %v3345_v42 = vadd.f32 %v7704_v60, %v3280_v13  ;;  %v7342_v34 = vadd.f32 %v7341_v46, %v7340_v5  ;;  %v7999_v60 = vld [vmem:[#allocation4 + $0x2a8] sm:$0xff]  }
 0x694   :  { %7372 = vmatpush3.bf16.msra.mxu1 %v7999_v60  ;;  %v8009_v60 = vld [vmem:[#allocation4 + $0x488] sm:$0xff]  }
 0x695   :  { %v3369_v54 = vadd.f32 %v3345_v42, %v1847_v14  ;;  %v3283_v57 = vadd.f32 %v7342_v34, %v9404_v32  ;;  %7373 = vmatprep.subr.bf16.mxu1 %v8000_v24  ;;  %v8004_v34 = vld [vmem:[#allocation4 + $0x2d0] sm:$0xff]  }
 0x696   :  { %v3403_v3 = vld [vmem:[#allocation3 + $0x1] ss:$2 sm:$0xff]  ;;  %v3391_v61 = vld [vmem:[#allocation3] ss:$2 sm:$0xff] }
 0x697   :  { %v3377_v15 = vmax.f32 %v3369_v54, 0.0  ;;  %v3348_v17 = vadd.f32 %v7705_v12, %v3283_v57  ;;  %v7343_v19 = vpop.f32.mrf.mxu0  ;;  %v7125_v9 = vpack.c.bf16 %v3403_v3, %v3403_v3  ;;  %v3419_v53 = vld [vmem:[#allocation3 + $0x2] ss:$2 sm:$0xff]  ;;  %v3432_v22 = vld [vmem:[#allocation3 + $0x3] ss:$2 sm:$0xff]  ;;  %v7123_v36 = vpack.c.bf16 %v3391_v61, %v3391_v61 }
 0x698   :  { %v7127_v20 = vpack.c.bf16 %v3419_v53, %v3419_v53  ;;  %v7129_v41 = vpack.c.bf16 %v3432_v22, %v3432_v22  ;;  %7374 = vmatpush3.bf16.msra.mxu1 %v8001_v10 }
 0x699   :  { %3387 = vst.msk [vmem:[#allocation3 + $0x12] sm:$0xff] %vm221_vm4, %v3377_v15  ;;  %v3370_v59 = vadd.f32 %v3348_v17, %v1848_v33  ;;  %v7344_v52 = vpop.f32.mrf.mxu0  ;;  %3411 = vrot.lane.b32.xlu0 %v7125_v9, %s8270_s18  ;;  %7375 = vmatprep.subr.bf16.mxu1 %v8002_v29  ;;  %v8005_v17 = vld [vmem:[#allocation4 + $0x290] sm:$0xff]  }
 0x69a   :  { %v7345_v14 = vadd.f32 %v7344_v52, %v7343_v19  ;;  %3401 = vst.msk [vmem:[#allocation2] sm:$0xf] %vm344_vm6, %v7123_v36  ;;  %3429 = vst.msk [vmem:[#allocation2 + $0x4] sm:$0xf] %vm344_vm6, %v7127_v20 }
 0x69b   :  { %v3378_v6 = vmax.f32 %v3370_v59, 0.0  ;;  %v7346_v4 = vpop.f32.mrf.mxu0 }
 0x69c   :  { %v3288_v8 = vadd.f32 %v7345_v14, %v9404_v32  ;;  %7376 = vmatpush3.bf16.msra.mxu1 %v8003_v18 }
 0x69d   :  { %v7347_v49 = vpop.f32.mrf.mxu0  ;;  %3441 = vrot.lane.b32.xlu0 %v7129_v41, %s8270_s18  ;;  %3389 = vst.msk [vmem:[#allocation3 + $0x1a] sm:$0x7f] %vm3388_vm8, %v3378_v6  ;;  %7377 = vmatprep.subr.bf16.mxu1 %v8004_v34  ;;  %v8021_v34 = vld [vmem:[#allocation4 + $0x3e8] sm:$0xff]  }
 0x69e   :  { %v3353_v33 = vadd.f32 %v3352_v47, %v3288_v8  ;;  %v7348_v12 = vadd.f32 %v7347_v49, %v7346_v4 }
 0x69f   :  { %v7349_v50 = vpop.f32.mrf.mxu0 }
 0x6a0   :  { %v3371_v39 = vadd.f32 %v3353_v33, %v1849_v45  ;;  %v3291_v25 = vadd.f32 %v7348_v12, %v9404_v32  ;;  %v3450_v28 = vld [vmem:[#allocation3 + $0x4] ss:$2 sm:$0xff]  ;;  %7378 = vmatpush3.bf16.msra.mxu1 %v8005_v17  ;;  %v8027_v17 = vld [vmem:[#allocation4 + $0x358] sm:$0xff]  }
 0x6a1   :  { %v7350_v43 = vpop.f32.mrf.mxu0  ;;  %v7131_v38 = vpack.c.bf16 %v3450_v28, %v3450_v28  ;;  %7722 = vmatprep.subr.bf16.mxu1 %v8009_v60 }
 0x6a2   :  { %v3379_v37 = vmax.f32 %v3371_v39, 0.0  ;;  %v3356_v26 = vadd.f32 %v3355_v16, %v3291_v25  ;;  %v7351_v35 = vadd.f32 %v7350_v43, %v7349_v50 }
 0x6a3   :  { %v7352_v40 = vpop.f32.mrf.mxu0  ;;  %3461 = vst.msk [vmem:[#allocation2 + $0x8] sm:$0xf] %vm344_vm6, %v7131_v38 }
 0x6a4   :  { %3464 = vst.msk [vmem:[#allocation3 + $0x42] sm:$0xff] %vm221_vm4, %v3379_v37  ;;  %v3372_v56 = vadd.f32 %v3356_v26, %v1850_v62  ;;  %v3296_v45 = vadd.f32 %v7351_v35, %v9404_v32  ;;  %v3404_v63 = vld [vmem:[#allocation3 + $0x11] ss:$2 sm:$0xff]  ;;  %v3452_v5 = vld [vmem:[#allocation3 + $0x14] ss:$2 sm:$0xff] }
 0x6a5   :  { %v7353_v51 = vpop.f32.mrf.mxu0  ;;  %v7126_v58 = vpack.c.bf16 %v3404_v63, %v3404_v63  ;;  %v7132_v13 = vpack.c.bf16 %v3452_v5, %v3452_v5  ;;  %v3392_v46 = vld [vmem:[#allocation3 + $0x10] ss:$2 sm:$0xff]  ;;  %v3434_v61 = vld [vmem:[#allocation3 + $0x13] ss:$2 sm:$0xff] }
 0x6a6   :  { %v3420_v42 = vld [vmem:[#allocation3 + $0x12] ss:$2 sm:$0xff]  ;;  %v3380_v54 = vmax.f32 %v3372_v56, 0.0  ;;  %v3361_v57 = vadd.f32 %v9415_v21, %v3296_v45  ;;  %v7354_v3 = vadd.f32 %v7353_v51, %v7352_v40  ;;  %v7124_v15 = vpack.c.bf16 %v3392_v46, %v3392_v46  ;;  %v8019_v46 = vld [vmem:[#allocation4 + $0x368] sm:$0xff]  }
 0x6a7   :  { %3413 = vrot.lane.b32.xlu1 %v7126_v58, %s8270_s18  ;;  %3462 = vst.msk [vmem:[#allocation2 + $0x1c] sm:$0xf] %vm344_vm6, %v7132_v13  ;;  %v7128_v27 = vpack.c.bf16 %v3420_v42, %v3420_v42  ;;  %v7130_v21 = vpack.c.bf16 %v3434_v61, %v3434_v61  ;;  %v8010_v37 = vld [vmem:[#allocation4 + $0x480] sm:$0xff]   ;;  %v8014_v35 = vld [vmem:[#allocation4 + $0x478] sm:$0xff]   ;;  %v8016_v56 = vld [vmem:[#allocation4 + $0x470] sm:$0xff]  }
 0x6a8   :  { %3465 = vst.msk [vmem:[#allocation3 + $0x4a] sm:$0xff] %vm221_vm4, %v3380_v54  ;;  %v3373_v62 = vadd.f32 %v3361_v57, %v1851_v55  ;;  %v3299_v19 = vadd.f32 %v7354_v3, %v9404_v32  ;;  %v8018_v13 = vld [vmem:[#allocation4 + $0x3a8] sm:$0xff]   ;;  %v8022_v54 = vld [vmem:[#allocation4 + $0x3a0] sm:$0xff]  }
 0x6a9   :  { %3402 = vst.msk [vmem:[#allocation2 + $0x14] sm:$0xf] %vm344_vm6, %v7124_v15  ;;  %3430 = vst.msk [vmem:[#allocation2 + $0x18] sm:$0xf] %vm344_vm6, %v7128_v27  ;;  %v8020_v42 = vld [vmem:[#allocation4 + $0x428] sm:$0xff]   ;;  %7403 = vmatprep.subr.bf16.mxu0 %v8018_v13  ;;  %v8023_v57 = vld [vmem:[#allocation4 + $0x360] sm:$0xff]  }
 0x6aa   :  { %v3381_v9 = vmax.f32 %v3373_v62, 0.0  ;;  %v3364_v53 = vadd.f32 %v7709_v11, %v3299_v19  ;;  %v8024_v3 = vld [vmem:[#allocation4 + $0x420] sm:$0xff]   ;;  %v8026_v15 = vld [vmem:[#allocation4 + $0x398] sm:$0xff]   ;;  %v8030_v19 = vld [vmem:[#allocation4 + $0x390] sm:$0xff]  }
 0x6ab   :  { %3443 = vrot.lane.b32.xlu1 %v7130_v21, %s8270_s18  ;;  %v8025_v61 = vld [vmem:[#allocation4 + $0x3e0] sm:$0xff]   ;;  %v8028_v27 = vld [vmem:[#allocation4 + $0x418] sm:$0xff]   ;;  %v8031_v21 = vld [vmem:[#allocation4 + $0x350] sm:$0xff]  }
 0x6ac   :  { %3466 = vst.msk [vmem:[#allocation3 + $0x52] sm:$0xff] %vm221_vm4, %v3381_v9  ;;  %v3374_v22 = vadd.f32 %v3364_v53, %v1852_v44  ;;  %v8029_v62 = vld [vmem:[#allocation4 + $0x3d8] sm:$0xff]   ;;  %v8032_v9 = vld [vmem:[#allocation4 + $0x410] sm:$0xff]  }
 0x6ad   :  { %v8033_v53 = vld [vmem:[#allocation4 + $0x3d0] sm:$0xff]  }
 0x6ae   :  { %v3382_v36 = vmax.f32 %v3374_v22, 0.0  ;;  %v7984_v1 = vld [vmem:[#allocation2 + $0x8] ss:$20 sps:$4 sm:$0xff]  }
 0x6af   :  { %v3481_v55 = vld [vmem:[#allocation3 + $0x41] ss:$2 sm:$0xff]  ;;  %v3469_v20 = vld [vmem:[#allocation3 + $0x40] ss:$2 sm:$0xff]  ;;  %7718 = vmatprep.mubr.msk.bf16.mxu0 %vm221_vm4, %v7984_v1 }
 0x6b0   :  { %3467 = vst.msk [vmem:[#allocation3 + $0x5a] sm:$0x7f] %vm3388_vm8, %v3382_v36  ;;  %v7135_v32 = vpack.c.bf16 %v3481_v55, %v3481_v55  ;;  %v7133_v47 = vpack.c.bf16 %v3469_v20, %v3469_v20  ;;  %v3498_v59 = vld [vmem:[#allocation3 + $0x42] ss:$2 sm:$0xff]  ;;  %v3512_v52 = vld [vmem:[#allocation3 + $0x43] ss:$2 sm:$0xff] }
 0x6b1   :  { %v7137_v14 = vpack.c.bf16 %v3498_v59, %v3498_v59  ;;  %v7139_v44 = vpack.c.bf16 %v3512_v52, %v3512_v52  ;;  %v8034_v22 = vld [vmem:[#allocation4 + $0x388] sm:$0xff]   ;;  %v8038_v20 = vld [vmem:[#allocation4 + $0x380] sm:$0xff]   ;;  %v8042_v52 = vld [vmem:[#allocation4 + $0x378] sm:$0xff]  }
 0x6b2   :  { %3489 = vrot.lane.b32.xlu0 %v7135_v32, %s8270_s18  ;;  %3479 = vst.msk [vmem:[#allocation2 + $0x28] sm:$0xf] %vm344_vm6, %v7133_v47  ;;  %v8035_v36 = vld [vmem:[#allocation4 + $0x348] sm:$0xff]   ;;  %v8039_v32 = vld [vmem:[#allocation4 + $0x340] sm:$0xff]  }
 0x6b3   :  { %v3530_v7 = vld [vmem:[#allocation3 + $0x44] ss:$2 sm:$0xff]  ;;  %3509 = vst.msk [vmem:[#allocation2 + $0x2c] sm:$0xf] %vm344_vm6, %v7137_v14  ;;  %v8043_v14 = vld [vmem:[#allocation4 + $0x338] sm:$0xff]  }
 0x6b4   :  { %v7141_v24 = vpack.c.bf16 %v3530_v7, %v3530_v7  ;;  %v8036_v1 = vld [vmem:[#allocation4 + $0x408] sm:$0xff]   ;;  %v8040_v47 = vld [vmem:[#allocation4 + $0x400] sm:$0xff]   ;;  %v8045_v7 = vld [vmem:[#allocation4 + $0x3b8] sm:$0xff]  }
 0x6b5   :  { %v8037_v55 = vld [vmem:[#allocation4 + $0x3c8] sm:$0xff]   ;;  %v8041_v59 = vld [vmem:[#allocation4 + $0x3c0] sm:$0xff]  }
 0x6b6   :  { %3521 = vrot.lane.b32.xlu0 %v7139_v44, %s8270_s18  ;;  %3541 = vst.msk [vmem:[#allocation2 + $0x30] sm:$0xf] %vm344_vm6, %v7141_v24  ;;  %v8046_v44 = vld [vmem:[#allocation4 + $0x370] sm:$0xff]  }
 0x6b7   :  { %v3482_v6 = vld [vmem:[#allocation3 + $0x51] ss:$2 sm:$0xff]  ;;  %v3532_v4 = vld [vmem:[#allocation3 + $0x54] ss:$2 sm:$0xff] }
 0x6b8   :  { %v7136_v41 = vpack.c.bf16 %v3482_v6, %v3482_v6  ;;  %v7142_v8 = vpack.c.bf16 %v3532_v4, %v3532_v4  ;;  %v3470_v11 = vld [vmem:[#allocation3 + $0x50] ss:$2 sm:$0xff]  ;;  %v3514_v33 = vld [vmem:[#allocation3 + $0x53] ss:$2 sm:$0xff] }
 0x6b9   :  { %v3500_v49 = vld [vmem:[#allocation3 + $0x52] ss:$2 sm:$0xff]  ;;  %v7134_v12 = vpack.c.bf16 %v3470_v11, %v3470_v11  ;;  %v7140_v29 = vpack.c.bf16 %v3514_v33, %v3514_v33  ;;  %v9481_v33 = vld [vmem:[%s9746_s2 + $0x5] ss:$0 sm:$0xff] }
 0x6ba   :  { %v7138_v10 = vpack.c.bf16 %v3500_v49, %v3500_v49  ;;  %3491 = vrot.lane.b32.xlu1 %v7136_v41, %s8270_s18  ;;  %3542 = vst.msk [vmem:[#allocation2 + $0x44] sm:$0xf] %vm344_vm6, %v7142_v8  ;;  %v8047_v24 = vld [vmem:[#allocation4 + $0x330] sm:$0xff]   ;;  %v9473_v41 = vld [vmem:[#allocation4 + $0x468] sm:$0xff]  }
 0x6bb   :  { %3480 = vst.msk [vmem:[#allocation2 + $0x3c] sm:$0xf] %vm344_vm6, %v7134_v12  ;;  %v8048_v6 = vld [vmem:[#allocation4 + $0x3f0] sm:$0xff]  }
 0x6bc   :  { %3510 = vst.msk [vmem:[#allocation2 + $0x40] sm:$0xf] %vm344_vm6, %v7138_v10  ;;  %v8049_v4 = vld [vmem:[#allocation4 + $0x3b0] sm:$0xff]   ;;  %vm6332_vm6 = vcmask 818176  }
 0x6be   :  { %3523 = vrot.lane.b32.xlu1 %v7140_v29, %s8270_s18 }
 0x6c1   :  { %v7989_v50 = vld [vmem:[#allocation2 + $0x30] ss:$20 sps:$4 sm:$0xff]  }
 0x6c2   :  { %7719 = vmatmul.mubr.msk.bf16.vlgmr.msra.gmra.mxu0 %vm221_vm4, %v7989_v50 }
 0x6c3   :  { %7404 = vmatpush3.bf16.msra.mxu0 %v8019_v46 }
 0x6c4   :  { %7405 = vmatprep.subr.bf16.mxu0 %v8022_v54 }
 0x6c7   :  { %7406 = vmatpush3.bf16.msra.mxu0 %v8023_v57 }
 0x6c8   :  { %7407 = vmatprep.subr.bf16.mxu0 %v8026_v15 }
 0x6cb   :  { %7408 = vmatpush3.bf16.msra.mxu0 %v8027_v17 }
 0x6cc   :  { %7409 = vmatprep.subr.bf16.mxu0 %v8030_v19 }
 0x6cf   :  { %7410 = vmatpush3.bf16.msra.mxu0 %v8031_v21 }
 0x6d0   :  { %7411 = vmatprep.subr.bf16.mxu0 %v8034_v22 }
 0x6d3   :  { %7412 = vmatpush3.bf16.msra.mxu0 %v8035_v36 }
 0x6d4   :  { %7413 = vmatprep.subr.bf16.mxu0 %v8038_v20 }
 0x6d7   :  { %7414 = vmatpush3.bf16.msra.mxu0 %v8039_v32 }
 0x6d8   :  { %7415 = vmatprep.subr.bf16.mxu0 %v8042_v52 }
 0x6db   :  { %7416 = vmatpush3.bf16.msra.mxu0 %v8043_v14 }
 0x6dc   :  { %7417 = vmatprep.subr.bf16.mxu0 %v8046_v44 }
 0x6df   :  { %7418 = vmatpush3.bf16.msra.mxu0 %v8047_v24 }
 0x6e0   :  { %7734 = vmatprep.subr.bf16.mxu0 %v9473_v41 }
 0x70b   :  { %v3412_v39 = vpop.permute.xlu0 %3411 }
 0x70c   :  { %3417 = vst.msk [vmem:[#allocation2] sm:$0xf] %vm411_vm1, %v3412_v39 }
 0x70f   :  { %v3442_v25 = vpop.permute.xlu0 %3441 }
 0x710   :  { %3447 = vst.msk [vmem:[#allocation2 + $0x4] sm:$0xf] %vm411_vm1, %v3442_v25 }
 0x719   :  { %v3414_v28 = vpop.permute.xlu1 %3413 }
 0x71a   :  { %3418 = vst.msk [vmem:[#allocation2 + $0x14] sm:$0xf] %vm411_vm1, %v3414_v28 }
 0x71d   :  { %v3444_v18 = vpop.permute.xlu1 %3443 }
 0x71e   :  { %3448 = vst.msk [vmem:[#allocation2 + $0x18] sm:$0xf] %vm411_vm1, %v3444_v18 }
 0x721   :  { %v8008_v38 = vld [vmem:[#allocation2] ss:$20 sps:$4 sm:$0xff]  }
 0x724   :  { %v3490_v16 = vpop.permute.xlu0 %3489 }
 0x725   :  { %3495 = vst.msk [vmem:[#allocation2 + $0x28] sm:$0xf] %vm411_vm1, %v3490_v16  ;;  %v8006_v43 = vld [vmem:[#allocation2 + $0x4] ss:$20 sps:$4 sm:$0xff]  }
 0x726   :  { %3784 = vmatprep.mubr.bf16.mxu1 %v8006_v43  ;;  %v8015_v51 = vld [vmem:[#allocation2 + $0x4] ss:$20 sps:$4 sm:$0xff]  }
 0x727   :  { %3785 = vmatmul.mubr.bf16.vlgmr.msra.gmra.mxu1 %v8008_v38 }
 0x728   :  { %v3522_v26 = vpop.permute.xlu0 %3521  ;;  %7723 = vmatpush3.bf16.msra.mxu1 %v8009_v60  ;;  %v8044_v60 = vld [vmem:[#allocation4 + $0x3f8] sm:$0xff]  }
 0x729   :  { %3527 = vst.msk [vmem:[#allocation2 + $0x2c] sm:$0xf] %vm411_vm1, %v3522_v26  ;;  %7724 = vmatprep.subr.bf16.mxu1 %v8010_v37 }
 0x72c   :  { %v3492_v40 = vpop.permute.xlu1 %3491  ;;  %7725 = vmatpush3.bf16.msra.mxu1 %v8010_v37 }
 0x72d   :  { %3496 = vst.msk [vmem:[#allocation2 + $0x3c] sm:$0xf] %vm411_vm1, %v3492_v40  ;;  %7726 = vmatprep.subr.bf16.mxu1 %v8014_v35 }
 0x730   :  { %v3524_v45 = vpop.permute.xlu1 %3523  ;;  %7727 = vmatpush3.bf16.msra.mxu1 %v8014_v35 }
 0x731   :  { %3528 = vst.msk [vmem:[#allocation2 + $0x40] sm:$0xf] %vm411_vm1, %v3524_v45  ;;  %7728 = vmatprep.subr.bf16.mxu1 %v8016_v56 }
 0x734   :  { %7729 = vmatpush3.bf16.msra.mxu1 %v8016_v56  ;;  %v8013_v5 = vld [vmem:[#allocation2 + $0x28] ss:$20 sps:$4 sm:$0xff]  }
 0x735   :  { %7431 = vmatprep.subr.bf16.mxu1 %v8020_v42 }
 0x738   :  { %v8011_v63 = vld [vmem:[#allocation2 + $0x2c] ss:$20 sps:$4 sm:$0xff]  }
 0x739   :  { %3792 = vmatprep.mubr.bf16.mxu1 %v8011_v63  ;;  %v8017_v58 = vld [vmem:[#allocation2 + $0x2c] ss:$20 sps:$4 sm:$0xff]  }
 0x73a   :  { %3793 = vmatmul.mubr.bf16.gmra.mxu1 %v8013_v5 }
 0x73b   :  { %7730 = vmatprep.mubr.msk.bf16.mxu1 %vm221_vm4, %v8015_v51 }
 0x742   :  { %7731 = vmatmul.mubr.msk.bf16.vlgmr.msra.gmra.mxu1 %vm221_vm4, %v8017_v58  ;;  %vm8274_vm4 = vmmov 0  }
 0x743   :  { %7432 = vmatpush3.bf16.msra.mxu1 %v8021_v34 }
 0x744   :  { %7433 = vmatprep.subr.bf16.mxu1 %v8024_v3 }
 0x747   :  { %7434 = vmatpush3.bf16.msra.mxu1 %v8025_v61 }
 0x748   :  { %7435 = vmatprep.subr.bf16.mxu1 %v8028_v27 }
 0x74b   :  { %7436 = vmatpush3.bf16.msra.mxu1 %v8029_v62 }
 0x74c   :  { %7437 = vmatprep.subr.bf16.mxu1 %v8032_v9 }
 0x74f   :  { %7438 = vmatpush3.bf16.msra.mxu1 %v8033_v53 }
 0x750   :  { %7439 = vmatprep.subr.bf16.mxu1 %v8036_v1 }
 0x753   :  { %7440 = vmatpush3.bf16.msra.mxu1 %v8037_v55 }
 0x754   :  { %7441 = vmatprep.subr.bf16.mxu1 %v8040_v47 }
 0x757   :  { %7442 = vmatpush3.bf16.msra.mxu1 %v8041_v59 }
 0x758   :  { %7443 = vmatprep.subr.bf16.mxu1 %v8044_v60 }
 0x75b   :  { %7444 = vmatpush3.bf16.msra.mxu1 %v8045_v7 }
 0x75c   :  { %7445 = vmatprep.subr.bf16.mxu1 %v8048_v6 }
 0x75f   :  { %7446 = vmatpush3.bf16.msra.mxu1 %v8049_v4 }
 0x782   :  { %v9476_v8 = vpop.f32.mrf.mxu0 }
 0x784   :  { %v3835_v49 = vpop.f32.mrf.mxu0 }
 0x786   :  { %v9484_v39 = vpop.f32.mrf.mxu0 }
 0x788   :  { %v3838_v38 = vpop.f32.mrf.mxu0 }
 0x7e7   :  { %v7379_v11 = vpop.f32.mrf.mxu1 }
 0x7e9   :  { %v7380_v12 = vpop.f32.mrf.mxu1 }
 0x7ea   :  { %v7381_v10 = vadd.f32 %v7380_v12, %v7379_v11 }
 0x7eb   :  { %v7382_v29 = vpop.f32.mrf.mxu1 }
 0x7ec   :  { %v3787_v50 = vadd.f32 %v7381_v10, %v9481_v33 }
 0x7ed   :  { %v7383_v25 = vpop.f32.mrf.mxu1 }
 0x7ee   :  { %v3836_v28 = vadd.f32 %v3835_v49, %v3787_v50  ;;  %v7384_v18 = vadd.f32 %v7383_v25, %v7382_v29 }
 0x7f0   :  { %v3850_v16 = vmax.f32 %v3836_v28, 0.0  ;;  %v3790_v43 = vadd.f32 %v7384_v18, %v9481_v33 }
 0x7f2   :  { %v3962_v37 = vrot.slane %v3850_v16, 6  ;;  %v3839_v26 = vadd.f32 %v3838_v38, %v3790_v43 }
 0x7f4   :  { %v3968_v35 = vsel %vm99_vm0, 0.0, %v3962_v37  ;;  %v3851_v40 = vmax.f32 %v3839_v26, 0.0 }
 0x7f5   :  { %v7143_v56 = vpack.c.bf16 %v3968_v35, %v3968_v35 }
 0x7f6   :  { %v3963_v45 = vrot.slane %v3851_v40, 6 }
 0x7f7   :  { %3979 = vst [vmem:[#allocation2] sm:$0xf] %v7143_v56  ;;  %v3985_v63 = vshrl.u32 %v7143_v56, 16  ;;  %v3988_v5 = vshll.u32 %v7143_v56, 16  ;;  %v6875_v15 = vrot.slane %v7143_v56, 9  ;;  %v6876_v27 = vrot.slane %v7143_v56, 10 }
 0x7f8   :  { %v3964_v51 = vsel %vm99_vm0, %v3962_v37, %v3963_v45  ;;  %v3969_v58 = vsel %vm99_vm0, %v3963_v45, 0.0 }
 0x7f9   :  { %v3987_v13 = vrot.slane %v3985_v63, 4  ;;  %v3990_v46 = vrot.slane %v3988_v5, 5  ;;  %v4023_v42 = vrot.slane %v3985_v63, 5  ;;  %v4024_v34 = vrot.slane %v3988_v5, 6 }
 0x7fa   :  { %v7144_v54 = vpack.c.bf16 %v3964_v51, %v3964_v51  ;;  %v7145_v57 = vpack.c.bf16 %v3969_v58, %v3969_v58  ;;  %v7385_v3 = vpop.f32.mrf.mxu1 }
 0x7fb   :  { %v3991_v61 = vor.u32 %v3990_v46, %v3987_v13  ;;  %v4025_v17 = vor.u32 %v4024_v34, %v4023_v42  ;;  %v8057_v34 = vld [vmem:[#allocation4 + $0x460] sm:$0xff]  }
 0x7fc   :  { %3980 = vst [vmem:[#allocation2 + $0x14] sm:$0xf] %v7144_v54  ;;  %v3994_v62 = vshll.u32 %v7144_v54, 16  ;;  %v3998_v19 = vshrl.u32 %v7144_v54, 16  ;;  %v4004_v21 = vshll.u32 %v7145_v57, 16  ;;  %v4014_v9 = vrot.slane %v7144_v54, 5  ;;  %v7386_v53 = vpop.f32.mrf.mxu1 }
 0x7fd   :  { %v3992_v22 = vrot.slane %v3991_v61, 4  ;;  %v4026_v36 = vrot.slane %v4025_v17, 4  ;;  %v4017_v1 = vrot.slane %v7145_v57, 5  ;;  %v4032_v55 = vshrl.u32 %v7145_v57, 16 }
 0x7fe   :  { %v3996_v20 = vrot.slane %v3994_v62, 5  ;;  %v4000_v32 = vrot.slane %v3998_v19, 4  ;;  %v4006_v47 = vrot.slane %v4004_v21, 5  ;;  %v4015_v59 = vsel %vm8462_vm5, %v6875_v15, %v4014_v9  ;;  %v7388_v52 = vpop.f32.mrf.mxu1 }
 0x7ff   :  { %v4016_v14 = vrot.slane %v4014_v9, 4  ;;  %4021 = vst [vmem:[#allocation2 + $0x8] sm:$0xf] %v4015_v59  ;;  %v4027_v60 = vrot.slane %v3998_v19, 5  ;;  %v4028_v7 = vrot.slane %v3994_v62, 6  ;;  %v4034_v44 = vrot.slane %v4032_v55, 5 }
 0x800   :  { %v3997_v24 = vsel %vm8454_vm3, %v3992_v22, %v3996_v20  ;;  %v4001_v6 = vor.u32 %v4000_v32, %v3996_v20  ;;  %v4035_v4 = vrot.slane %v4004_v21, 6  ;;  %v4044_v11 = vrot.slane %v7144_v54, 6  ;;  %v7389_v49 = vpop.f32.mrf.mxu1  ;;  %v8058_v32 = vld [vmem:[#allocation4 + $0x458] sm:$0xff]  }
 0x801   :  { %v4018_v12 = vsel %vm8462_vm5, %v4016_v14, %v4017_v1  ;;  %v4029_v10 = vor.u32 %v4028_v7, %v4027_v60  ;;  %v4047_v29 = vrot.slane %v7145_v57, 6  ;;  %4010 = vst [vmem:[#allocation2 + $0x4] sm:$0xf] %v3997_v24  ;;  %v7387_v50 = vadd.f32 %v7386_v53, %v7385_v3 }
 0x802   :  { %v4002_v25 = vrot.slane %v4001_v6, 4  ;;  %4022 = vst [vmem:[#allocation2 + $0x1c] sm:$0xf] %v4018_v12  ;;  %v4036_v28 = vor.u32 %v4035_v4, %v4034_v44  ;;  %v4045_v18 = vsel %vm8421_vm14, %v6876_v27, %v4044_v11  ;;  %v4046_v16 = vrot.slane %v4044_v11, 4 }
 0x803   :  { %v4030_v43 = vsel %vm8441_vm2, %v4026_v36, %v4029_v10  ;;  %v4031_v38 = vrot.slane %v4029_v10, 4  ;;  %4051 = vst [vmem:[#allocation2 + $0x10] sm:$0xf] %v4045_v18  ;;  %v3795_v37 = vadd.f32 %v7387_v50, %v9481_v33  ;;  %v7390_v26 = vadd.f32 %v7389_v49, %v7388_v52  ;;  %v8055_v3 = vld [vmem:[#allocation2] ss:$20 sps:$4 sm:$0xff]  }
 0x804   :  { %v4007_v35 = vsel %vm8454_vm3, %v4002_v25, %v4006_v47  ;;  %4040 = vst [vmem:[#allocation2 + $0xc] sm:$0xf] %v4030_v43  ;;  %v4048_v40 = vsel %vm8421_vm14, %v4046_v16, %v4047_v29  ;;  %v8059_v10 = vld [vmem:[#allocation4 + $0x450] sm:$0xff]  }
 0x805   :  { %4011 = vst [vmem:[#allocation2 + $0x18] sm:$0xf] %v4007_v35  ;;  %v4037_v56 = vsel %vm8441_vm2, %v4031_v38, %v4036_v28  ;;  %4052 = vst [vmem:[#allocation2 + $0x24] sm:$0xf] %v4048_v40  ;;  %v3844_v45 = vadd.f32 %v9476_v8, %v3795_v37  ;;  %v3798_v63 = vadd.f32 %v7390_v26, %v9481_v33 }
 0x806   :  { %4041 = vst [vmem:[#allocation2 + $0x20] sm:$0xf] %v4037_v56 }
 0x807   :  { %v3852_v5 = vmax.f32 %v3844_v45, 0.0  ;;  %v3847_v51 = vadd.f32 %v9484_v39, %v3798_v63 }
 0x809   :  { %v4055_v58 = vrot.slane %v3852_v5, 6  ;;  %v3853_v13 = vmax.f32 %v3847_v51, 0.0  ;;  %v8056_v17 = vld [vmem:[#allocation2 + $0x8] ss:$20 sps:$4 sm:$0xff]  }
 0x80a   :  { %v8060_v5 = vld [vmem:[#allocation4 + $0x448] sm:$0xff]  }
 0x80b   :  { %v4061_v46 = vsel %vm99_vm0, 0.0, %v4055_v58  ;;  %v4056_v42 = vrot.slane %v3853_v13, 6  ;;  %v8067_v13 = vld [vmem:[#allocation4 + $0x440] sm:$0xff]  }
 0x80c   :  { %v7146_v54 = vpack.c.bf16 %v4061_v46, %v4061_v46  ;;  %v8050_v57 = vld [vmem:[#allocation2 + $0x4] ss:$20 sps:$4 sm:$0xff]  }
 0x80d   :  { %v4057_v61 = vsel %vm99_vm0, %v4055_v58, %v4056_v42  ;;  %v4062_v15 = vsel %vm99_vm0, %v4056_v42, 0.0  ;;  %v8052_v8 = vld [vmem:[#allocation2 + $0xc] ss:$20 sps:$4 sm:$0xff]   ;;  %4567 = vmatprep.mubr.bf16.mxu0 %v8050_v57  ;;  %v8069_v42 = vld [vmem:[#allocation4 + $0x438] sm:$0xff]  }
 0x80e   :  { %4072 = vst [vmem:[#allocation2 + $0x28] sm:$0xf] %v7146_v54  ;;  %v4078_v33 = vshrl.u32 %v7146_v54, 16  ;;  %v4081_v27 = vshll.u32 %v7146_v54, 16  ;;  %v6880_v39 = vrot.slane %v7146_v54, 9  ;;  %v7147_v62 = vpack.c.bf16 %v4057_v61, %v4057_v61  ;;  %4616 = vmatprep.mubr.bf16.mxu1 %v8052_v8  ;;  %4568 = vmatmul.mubr.bf16.vlgmr.msra.gmra.mxu0 %v8055_v3  ;;  %v8070_v61 = vld [vmem:[#allocation4 + $0x430] sm:$0xff]  }
 0x80f   :  { %v7148_v19 = vpack.c.bf16 %v4062_v15, %v4062_v15  ;;  %4617 = vmatmul.mubr.bf16.vlgmr.msra.gmra.mxu1 %v8056_v17  ;;  %7735 = vmatpush3.bf16.msra.mxu0 %v9473_v41  ;;  %v6881_v29 = vrot.slane %v7146_v54, 10  ;;  %v8068_v54 = vld [vmem:[#allocation2 + $0x10] ss:$20 sps:$4 sm:$0xff]   ;;  %v8072_v8 = vld [vmem:[#allocation4 + $0x508] sm:$0xff]  }
 0x810   :  { %v4080_v21 = vrot.slane %v4078_v33, 4  ;;  %v4083_v9 = vrot.slane %v4081_v27, 5  ;;  %v4116_v53 = vrot.slane %v4078_v33, 5  ;;  %v4117_v22 = vrot.slane %v4081_v27, 6  ;;  %4073 = vst [vmem:[#allocation2 + $0x3c] sm:$0xf] %v7147_v62  ;;  %7736 = vmatprep.subr.bf16.mxu0 %v8057_v34  ;;  %7469 = vmatprep.subr.bf16.mxu1 %v8072_v8 }
 0x811   :  { %v4087_v36 = vshll.u32 %v7147_v62, 16  ;;  %v4091_v1 = vshrl.u32 %v7147_v62, 16  ;;  %v4097_v55 = vshll.u32 %v7148_v19, 16  ;;  %v4107_v20 = vrot.slane %v7147_v62, 5  ;;  %v8073_v17 = vld [vmem:[#allocation4 + $0x4c8] sm:$0xff]  }
 0x812   :  { %v4084_v47 = vor.u32 %v4083_v9, %v4080_v21  ;;  %v4125_v59 = vshrl.u32 %v7148_v19, 16  ;;  %v4118_v52 = vor.u32 %v4117_v22, %v4116_v53  ;;  %v4110_v6 = vrot.slane %v7148_v19, 5  ;;  %v8074_v33 = vld [vmem:[#allocation4 + $0x588] sm:$0xff]   ;;  %7470 = vmatpush3.bf16.msra.mxu1 %v8073_v17  ;;  %v8079_v21 = vld [vmem:[#allocation4 + $0x540] sm:$0xff]   ;;  %v8080_v9 = vld [vmem:[#allocation4 + $0x4f8] sm:$0xff]  }
 0x813   :  { %v4089_v14 = vrot.slane %v4087_v36, 5  ;;  %v4093_v60 = vrot.slane %v4091_v1, 4  ;;  %v4108_v7 = vsel %vm8462_vm5, %v6880_v39, %v4107_v20  ;;  %v4109_v24 = vrot.slane %v4107_v20, 4  ;;  %7737 = vmatpush3.bf16.msra.mxu0 %v8057_v34  ;;  %v8075_v27 = vld [vmem:[#allocation4 + $0x548] sm:$0xff]   ;;  %v8076_v39 = vld [vmem:[#allocation4 + $0x500] sm:$0xff]   ;;  %v8081_v53 = vld [vmem:[#allocation4 + $0x4b8] sm:$0xff]  }
 0x814   :  { %v4085_v44 = vrot.slane %v4084_v47, 4  ;;  %4114 = vst [vmem:[#allocation2 + $0x30] sm:$0xf] %v4108_v7  ;;  %v4120_v41 = vrot.slane %v4091_v1, 5  ;;  %v4121_v11 = vrot.slane %v4087_v36, 6  ;;  %v4127_v49 = vrot.slane %v4125_v59, 5  ;;  %7738 = vmatprep.subr.bf16.mxu0 %v8058_v32  ;;  %7471 = vmatprep.subr.bf16.mxu1 %v8076_v39 }
 0x815   :  { %v4094_v4 = vor.u32 %v4093_v60, %v4089_v14  ;;  %v4128_v12 = vrot.slane %v4097_v55, 6  ;;  %v4111_v25 = vsel %vm8462_vm5, %v4109_v24, %v4110_v6  ;;  %v4137_v28 = vrot.slane %v7147_v62, 6  ;;  %v8077_v62 = vld [vmem:[#allocation4 + $0x4c0] sm:$0xff]   ;;  %v8082_v22 = vld [vmem:[#allocation4 + $0x578] sm:$0xff]   ;;  %v8084_v1 = vld [vmem:[#allocation4 + $0x4f0] sm:$0xff]  }
 0x816   :  { %v4090_v50 = vsel %vm8454_vm3, %v4085_v44, %v4089_v14  ;;  %v4119_v18 = vrot.slane %v4118_v52, 4  ;;  %v4099_v43 = vrot.slane %v4097_v55, 5  ;;  %4115 = vst [vmem:[#allocation2 + $0x44] sm:$0xf] %v4111_v25  ;;  %v4122_v38 = vor.u32 %v4121_v11, %v4120_v41  ;;  %7472 = vmatpush3.bf16.msra.mxu1 %v8077_v62  ;;  %v8083_v36 = vld [vmem:[#allocation4 + $0x538] sm:$0xff]   ;;  %v8085_v55 = vld [vmem:[#allocation4 + $0x4b0] sm:$0xff]   ;;  %v7732_v25 = vpop.f32.mrf.mxu1 }
 0x817   :  { %v4095_v16 = vrot.slane %v4094_v4, 4  ;;  %4103 = vst [vmem:[#allocation2 + $0x2c] sm:$0xf] %v4090_v50  ;;  %v4138_v37 = vsel %vm8421_vm14, %v6881_v29, %v4137_v28  ;;  %v4139_v26 = vrot.slane %v4137_v28, 4  ;;  %v4140_v35 = vrot.slane %v7148_v19, 6  ;;  %7739 = vmatpush3.bf16.msra.mxu0 %v8058_v32  ;;  %v8078_v19 = vld [vmem:[#allocation4 + $0x580] sm:$0xff]   ;;  %7473 = vmatprep.subr.bf16.mxu1 %v8080_v9 }
 0x818   :  { %v4123_v56 = vsel %vm8441_vm2, %v4119_v18, %v4122_v38  ;;  %v4124_v45 = vrot.slane %v4122_v38, 4  ;;  %v4129_v63 = vor.u32 %v4128_v12, %v4127_v49  ;;  %4144 = vst [vmem:[#allocation2 + $0x38] sm:$0xf] %v4138_v37  ;;  %7740 = vmatprep.subr.bf16.mxu0 %v8059_v10  ;;  %v8065_v34 = vld [vmem:[#allocation2 + $0x28] ss:$20 sps:$4 sm:$0xff]   ;;  %v8086_v20 = vld [vmem:[#allocation4 + $0x570] sm:$0xff]   ;;  %v3945_v28 = vpop.f32.mrf.mxu1 }
 0x819   :  { %v4100_v40 = vsel %vm8454_vm3, %v4095_v16, %v4099_v43  ;;  %4133 = vst [vmem:[#allocation2 + $0x34] sm:$0xf] %v4123_v56  ;;  %v4141_v51 = vsel %vm8421_vm14, %v4139_v26, %v4140_v35  ;;  %v8087_v32 = vld [vmem:[#allocation4 + $0x530] sm:$0xff]   ;;  %v8088_v47 = vld [vmem:[#allocation4 + $0x4e8] sm:$0xff]   ;;  %v8092_v60 = vld [vmem:[#allocation4 + $0x4e0] sm:$0xff]  }
 0x81a   :  { %4104 = vst [vmem:[#allocation2 + $0x40] sm:$0xf] %v4100_v40  ;;  %v4130_v58 = vsel %vm8441_vm2, %v4124_v45, %v4129_v63  ;;  %4145 = vst [vmem:[#allocation2 + $0x4c] sm:$0xf] %v4141_v51  ;;  %7474 = vmatpush3.bf16.msra.mxu1 %v8081_v53  ;;  %v8089_v59 = vld [vmem:[#allocation4 + $0x4a8] sm:$0xff]   ;;  %v8093_v7 = vld [vmem:[#allocation4 + $0x4a0] sm:$0xff]   ;;  %v7733_v18 = vpop.f32.mrf.mxu1 }
 0x81b   :  { %4134 = vst [vmem:[#allocation2 + $0x48] sm:$0xf] %v4130_v58  ;;  %7741 = vmatpush3.bf16.msra.mxu0 %v8059_v10  ;;  %7475 = vmatprep.subr.bf16.mxu1 %v8084_v1  ;;  %v8090_v52 = vld [vmem:[#allocation4 + $0x568] sm:$0xff]   ;;  %v8094_v44 = vld [vmem:[#allocation4 + $0x560] sm:$0xff]   ;;  %v8096_v6 = vld [vmem:[#allocation4 + $0x4d8] sm:$0xff]  }
 0x81c   :  { %7742 = vmatprep.subr.bf16.mxu0 %v8060_v5  ;;  %v8091_v14 = vld [vmem:[#allocation4 + $0x528] sm:$0xff]   ;;  %v8095_v24 = vld [vmem:[#allocation4 + $0x520] sm:$0xff]   ;;  %v8098_v41 = vld [vmem:[#allocation4 + $0x558] sm:$0xff]   ;;  %v3948_v16 = vpop.f32.mrf.mxu1 }
 0x81d   :  { %v8066_v3 = vld [vmem:[#allocation2 + $0x30] ss:$20 sps:$4 sm:$0xff]   ;;  %v8097_v4 = vld [vmem:[#allocation4 + $0x498] sm:$0xff]   ;;  %v9530_v50 = vld [vmem:[#allocation4 + $0x5c8] sm:$0xff]  }
 0x81e   :  { %7476 = vmatpush3.bf16.msra.mxu1 %v8085_v55  ;;  %v8099_v11 = vld [vmem:[#allocation4 + $0x518] sm:$0xff]   ;;  %v8100_v49 = vld [vmem:[#allocation4 + $0x4d0] sm:$0xff]  }
 0x81f   :  { %7743 = vmatpush3.bf16.msra.mxu0 %v8060_v5  ;;  %7477 = vmatprep.subr.bf16.mxu1 %v8088_v47  ;;  %v8102_v12 = vld [vmem:[#allocation4 + $0x550] sm:$0xff]  }
 0x820   :  { %7744 = vmatprep.subr.bf16.mxu0 %v8067_v13  ;;  %v8101_v10 = vld [vmem:[#allocation4 + $0x490] sm:$0xff]  }
 0x821   :  { %v8061_v46 = vld [vmem:[#allocation2 + $0x2c] ss:$20 sps:$4 sm:$0xff]   ;;  %v8103_v29 = vld [vmem:[#allocation4 + $0x510] sm:$0xff]  }
 0x822   :  { %4575 = vmatprep.mubr.bf16.mxu0 %v8061_v46  ;;  %v8063_v57 = vld [vmem:[#allocation2 + $0x34] ss:$20 sps:$4 sm:$0xff]   ;;  %v8071_v15 = vld [vmem:[#allocation2 + $0x38] ss:$20 sps:$4 sm:$0xff]   ;;  %7478 = vmatpush3.bf16.msra.mxu1 %v8089_v59 }
 0x823   :  { %4576 = vmatmul.mubr.bf16.gmra.mxu0 %v8065_v34  ;;  %4624 = vmatprep.mubr.bf16.mxu1 %v8063_v57 }
 0x824   :  { %7750 = vmatprep.mubr.bf16.mxu0 %v8068_v54  ;;  %4625 = vmatmul.mubr.bf16.gmra.mxu1 %v8066_v3  ;;  %v6882_v54 = vld [vmem:[%s9746_s2 + $0x6] ss:$0 sm:$0xff] }
 0x825   :  { %7745 = vmatpush3.bf16.msra.mxu0 %v8067_v13  ;;  %7479 = vmatprep.subr.bf16.mxu1 %v8092_v60 }
 0x826   :  { %7746 = vmatprep.subr.bf16.mxu0 %v8069_v42  ;;  %7480 = vmatpush3.bf16.msra.mxu1 %v8093_v7 }
 0x827   :  { %7481 = vmatprep.subr.bf16.mxu1 %v8096_v6 }
 0x829   :  { %7747 = vmatpush3.bf16.msra.mxu0 %v8069_v42 }
 0x82a   :  { %7748 = vmatprep.subr.bf16.mxu0 %v8070_v61  ;;  %7482 = vmatpush3.bf16.msra.mxu1 %v8097_v4 }
 0x82b   :  { %7483 = vmatprep.subr.bf16.mxu1 %v8100_v49 }
 0x82d   :  { %7749 = vmatpush3.bf16.msra.mxu0 %v8070_v61 }
 0x82e   :  { %7497 = vmatprep.subr.bf16.mxu0 %v8074_v33  ;;  %7484 = vmatpush3.bf16.msra.mxu1 %v8101_v10 }
 0x82f   :  { %7754 = vmatprep.subr.bf16.mxu1 %v9530_v50 }
 0x830   :  { %7751 = vmatmul.mubr.bf16.vlgmr.msra.gmra.mxu0 %v8071_v15  ;;  %v6863_v15 = vld [vmem:[%s9746_s2 + $0x7] ss:$0 sm:$0xff] }
 0x831   :  { %7498 = vmatpush3.bf16.msra.mxu0 %v8075_v27  ;;  %v3946_v55 = vadd.f32 %v6863_v15, %v3945_v28 }
 0x832   :  { %7499 = vmatprep.subr.bf16.mxu0 %v8078_v19 }
 0x835   :  { %7500 = vmatpush3.bf16.msra.mxu0 %v8079_v21  ;;  %v3954_v21 = vadd.f32 %v7732_v25, %v6863_v15 }
 0x836   :  { %7501 = vmatprep.subr.bf16.mxu0 %v8082_v22 }
 0x839   :  { %7502 = vmatpush3.bf16.msra.mxu0 %v8083_v36 }
 0x83a   :  { %7503 = vmatprep.subr.bf16.mxu0 %v8086_v20 }
 0x83d   :  { %7504 = vmatpush3.bf16.msra.mxu0 %v8087_v32 }
 0x83e   :  { %7505 = vmatprep.subr.bf16.mxu0 %v8090_v52 }
 0x841   :  { %7506 = vmatpush3.bf16.msra.mxu0 %v8091_v14  ;;  %v3957_v14 = vadd.f32 %v7733_v18, %v6863_v15 }
 0x842   :  { %7507 = vmatprep.subr.bf16.mxu0 %v8094_v44 }
 0x845   :  { %7508 = vmatpush3.bf16.msra.mxu0 %v8095_v24 }
 0x846   :  { %7509 = vmatprep.subr.bf16.mxu0 %v8098_v41  ;;  %v3949_v41 = vadd.f32 %v6863_v15, %v3948_v16 }
 0x849   :  { %7510 = vmatpush3.bf16.msra.mxu0 %v8099_v11 }
 0x84a   :  { %7511 = vmatprep.subr.bf16.mxu0 %v8102_v12 }
 0x84d   :  { %7512 = vmatpush3.bf16.msra.mxu0 %v8103_v29 }
 0x8ce   :  { %v7419_v43 = vpop.f32.mrf.mxu0 }
 0x8cf   :  { %v7447_v38 = vpop.f32.mrf.mxu1 }
 0x8d0   :  { %v7420_v37 = vpop.f32.mrf.mxu0 }
 0x8d1   :  { %v7448_v26 = vpop.f32.mrf.mxu1  ;;  %v7421_v42 = vadd.f32 %v7420_v37, %v7419_v43 }
 0x8d2   :  { %v7422_v35 = vpop.f32.mrf.mxu0  ;;  %v7449_v39 = vadd.f32 %v7448_v26, %v7447_v38 }
 0x8d3   :  { %v7450_v40 = vpop.f32.mrf.mxu1  ;;  %v4570_v8 = vadd.f32 %v7421_v42, %v6882_v54 }
 0x8d4   :  { %v7423_v56 = vpop.f32.mrf.mxu0 }
 0x8d5   :  { %v7451_v45 = vpop.f32.mrf.mxu1  ;;  %v7424_v17 = vadd.f32 %v7423_v56, %v7422_v35  ;;  %v4619_v1 = vadd.f32 %v7449_v39, %v4570_v8 }
 0x8d6   :  { %v7452_v32 = vadd.f32 %v7451_v45, %v7450_v40 }
 0x8d7   :  { %v4573_v53 = vadd.f32 %v7424_v17, %v6882_v54 }
 0x8d9   :  { %v4622_v6 = vadd.f32 %v7452_v32, %v4573_v53 }
 0x8e3   :  { %v7425_v63 = vpop.f32.mrf.mxu0 }
 0x8e4   :  { %v7453_v5 = vpop.f32.mrf.mxu1 }
 0x8e5   :  { %v7426_v51 = vpop.f32.mrf.mxu0 }
 0x8e6   :  { %v7427_v58 = vadd.f32 %v7426_v51, %v7425_v63  ;;  %v7454_v13 = vpop.f32.mrf.mxu1 }
 0x8e7   :  { %v7428_v46 = vpop.f32.mrf.mxu0  ;;  %v7455_v33 = vadd.f32 %v7454_v13, %v7453_v5 }
 0x8e8   :  { %v7456_v57 = vpop.f32.mrf.mxu1  ;;  %v4578_v3 = vadd.f32 %v7427_v58, %v6882_v54 }
 0x8e9   :  { %v7429_v34 = vpop.f32.mrf.mxu0 }
 0x8ea   :  { %v7430_v61 = vadd.f32 %v7429_v34, %v7428_v46  ;;  %v7457_v27 = vpop.f32.mrf.mxu1  ;;  %v4627_v19 = vadd.f32 %v7455_v33, %v4578_v3 }
 0x8eb   :  { %v7458_v22 = vadd.f32 %v7457_v27, %v7456_v57 }
 0x8ec   :  { %v4581_v62 = vadd.f32 %v7430_v61, %v6882_v54 }
 0x8ee   :  { %v4630_v52 = vadd.f32 %v7458_v22, %v4581_v62 }
 0x8f0   :  { %v7752_v9 = vpop.f32.mrf.mxu0 }
 0x8f1   :  { %v4676_v36 = vadd.f32 %v7752_v9, %v4627_v19 }
 0x8f2   :  { %v4667_v20 = vpop.f32.mrf.mxu0 }
 0x8f3   :  { %v9539_v47 = vadd.f32 %v4676_v36, %v3954_v21  ;;  %v4668_v59 = vadd.f32 %v4667_v20, %v4619_v1 }
 0x8f4   :  { %v7753_v60 = vpop.f32.mrf.mxu0 }
 0x8f5   :  { %v4688_v7 = vmax.f32 %v9539_v47, 0.0  ;;  %v9542_v44 = vadd.f32 %v4668_v59, %v3946_v55  ;;  %v4679_v24 = vadd.f32 %v7753_v60, %v4630_v52 }
 0x8f6   :  { %v4670_v4 = vpop.f32.mrf.mxu0 }
 0x8f7   :  { %v4785_v11 = vrot.slane %v4688_v7, 6  ;;  %v4686_v49 = vmax.f32 %v9542_v44, 0.0  ;;  %v9547_v12 = vadd.f32 %v4679_v24, %v3957_v14  ;;  %v4671_v10 = vadd.f32 %v4670_v4, %v4622_v6 }
 0x8f9   :  { %v4791_v29 = vsel %vm99_vm0, 0.0, %v4785_v11  ;;  %v4692_v25 = vrot.slane %v4686_v49, 6  ;;  %v4689_v28 = vmax.f32 %v9547_v12, 0.0  ;;  %v9553_v18 = vadd.f32 %v4671_v10, %v3949_v41 }
 0x8fa   :  { %v7152_v43 = vpack.c.bf16 %v4791_v29, %v4791_v29 }
 0x8fb   :  { %v4698_v16 = vsel %vm99_vm0, 0.0, %v4692_v25  ;;  %v4786_v38 = vrot.slane %v4689_v28, 6  ;;  %v4687_v37 = vmax.f32 %v9553_v18, 0.0 }
 0x8fc   :  { %v4808_v26 = vshrl.u32 %v7152_v43, 16  ;;  %v4811_v35 = vshll.u32 %v7152_v43, 16  ;;  %4802 = vst [vmem:[#allocation2 + $0x28] sm:$0xf] %v7152_v43  ;;  %v6941_v40 = vrot.slane %v7152_v43, 9  ;;  %v9559_v56 = vpack.c.bf16 %v4698_v16, %v4698_v16 }
 0x8fd   :  { %v4787_v45 = vsel %vm99_vm0, %v4785_v11, %v4786_v38  ;;  %v4792_v63 = vsel %vm99_vm0, %v4786_v38, 0.0  ;;  %v6942_v46 = vrot.slane %v7152_v43, 10  ;;  %v4693_v54 = vrot.slane %v4687_v37, 6 }
 0x8fe   :  { %v4810_v5 = vrot.slane %v4808_v26, 4  ;;  %v4813_v51 = vrot.slane %v4811_v35, 5  ;;  %v4846_v58 = vrot.slane %v4808_v26, 5  ;;  %v4847_v13 = vrot.slane %v4811_v35, 6  ;;  %4709 = vst [vmem:[#allocation2] sm:$0xf] %v9559_v56 }
 0x8ff   :  { %v4715_v42 = vshrl.u32 %v9559_v56, 16  ;;  %v4718_v34 = vshll.u32 %v9559_v56, 16  ;;  %v7153_v61 = vpack.c.bf16 %v4787_v45, %v4787_v45  ;;  %v7154_v15 = vpack.c.bf16 %v4792_v63, %v4792_v63 }
 0x900   :  { %v4814_v57 = vor.u32 %v4813_v51, %v4810_v5  ;;  %v4848_v3 = vor.u32 %v4847_v13, %v4846_v58  ;;  %v6936_v62 = vrot.slane %v9559_v56, 9  ;;  %v6937_v53 = vrot.slane %v9559_v56, 10 }
 0x901   :  { %v4717_v8 = vrot.slane %v4715_v42, 4  ;;  %v4720_v17 = vrot.slane %v4718_v34, 5  ;;  %v9568_v33 = vrot.slane %v4715_v42, 5  ;;  %v9570_v27 = vrot.slane %v4718_v34, 6  ;;  %4803 = vst [vmem:[#allocation2 + $0x3c] sm:$0xf] %v7153_v61 }
 0x902   :  { %v4815_v39 = vrot.slane %v4814_v57, 4  ;;  %v4817_v19 = vshll.u32 %v7153_v61, 16  ;;  %v4821_v21 = vshrl.u32 %v7153_v61, 16  ;;  %v4849_v9 = vrot.slane %v4848_v3, 4 }
 0x903   :  { %v4827_v22 = vshll.u32 %v7154_v15, 16  ;;  %v4837_v36 = vrot.slane %v7153_v61, 5  ;;  %v4721_v1 = vor.u32 %v4720_v17, %v4717_v8  ;;  %v4755_v59 = vor.u32 %v9570_v27, %v9568_v33 }
 0x904   :  { %v4819_v55 = vrot.slane %v4817_v19, 5  ;;  %v4823_v20 = vrot.slane %v4821_v21, 4  ;;  %v4850_v32 = vrot.slane %v4821_v21, 5  ;;  %v4840_v60 = vrot.slane %v7154_v15, 5 }
 0x905   :  { %v4829_v52 = vrot.slane %v4827_v22, 5  ;;  %v4838_v14 = vsel %vm8462_vm5, %v6941_v40, %v4837_v36  ;;  %v4839_v41 = vrot.slane %v4837_v36, 4  ;;  %v4851_v4 = vrot.slane %v4817_v19, 6 }
 0x906   :  { %v4820_v24 = vsel %vm8454_vm3, %v4815_v39, %v4819_v55  ;;  %v4824_v6 = vor.u32 %v4823_v20, %v4819_v55  ;;  %4844 = vst [vmem:[#allocation2 + $0x30] sm:$0xf] %v4838_v14  ;;  %v4855_v11 = vshrl.u32 %v7154_v15, 16  ;;  %v4858_v10 = vrot.slane %v4827_v22, 6 }
 0x907   :  { %v4867_v29 = vrot.slane %v7153_v61, 6  ;;  %v4870_v43 = vrot.slane %v7154_v15, 6  ;;  %4833 = vst [vmem:[#allocation2 + $0x2c] sm:$0xf] %v4820_v24  ;;  %v4841_v38 = vsel %vm8462_vm5, %v4839_v41, %v4840_v60  ;;  %v4852_v26 = vor.u32 %v4851_v4, %v4850_v32 }
 0x908   :  { %v4825_v16 = vrot.slane %v4824_v6, 4  ;;  %v4694_v35 = vsel %vm99_vm0, %v4692_v25, %v4693_v54  ;;  %v4857_v40 = vrot.slane %v4855_v11, 5  ;;  %4845 = vst [vmem:[#allocation2 + $0x44] sm:$0xf] %v4841_v38  ;;  %v4699_v5 = vsel %vm99_vm0, %v4693_v54, 0.0 }
 0x909   :  { %v4868_v45 = vsel %vm8421_vm14, %v6942_v46, %v4867_v29  ;;  %v4869_v63 = vrot.slane %v4867_v29, 4  ;;  %v4853_v58 = vsel %vm8441_vm2, %v4849_v9, %v4852_v26  ;;  %v4854_v13 = vrot.slane %v4852_v26, 4 }
 0x90a   :  { %v4830_v51 = vsel %vm8454_vm3, %v4825_v16, %v4829_v52  ;;  %4874 = vst [vmem:[#allocation2 + $0x38] sm:$0xf] %v4868_v45  ;;  %v7150_v42 = vpack.c.bf16 %v4694_v35, %v4694_v35  ;;  %v4722_v34 = vrot.slane %v4721_v1, 4  ;;  %v4859_v57 = vor.u32 %v4858_v10, %v4857_v40  ;;  %4863 = vst [vmem:[#allocation2 + $0x34] sm:$0xf] %v4853_v58  ;;  %v8115_v35 = vld [vmem:[#allocation4 + $0x5c0] sm:$0xff]  }
 0x90b   :  { %v4871_v25 = vsel %vm8421_vm14, %v4869_v63, %v4870_v43  ;;  %4834 = vst [vmem:[#allocation2 + $0x40] sm:$0xf] %v4830_v51  ;;  %v7151_v46 = vpack.c.bf16 %v4699_v5, %v4699_v5  ;;  %v4756_v22 = vrot.slane %v4755_v59, 4  ;;  %v8116_v63 = vld [vmem:[#allocation4 + $0x5b8] sm:$0xff]   ;;  %v8120_v51 = vld [vmem:[#allocation4 + $0x5b0] sm:$0xff]  }
 0x90c   :  { %4875 = vst [vmem:[#allocation2 + $0x4c] sm:$0xf] %v4871_v25  ;;  %v4724_v3 = vshll.u32 %v7150_v42, 16  ;;  %v4728_v54 = vshrl.u32 %v7150_v42, 16  ;;  %v4744_v61 = vrot.slane %v7150_v42, 5  ;;  %v4774_v15 = vrot.slane %v7150_v42, 6 }
 0x90d   :  { %4710 = vst [vmem:[#allocation2 + $0x14] sm:$0xf] %v7150_v42  ;;  %v4860_v8 = vsel %vm8441_vm2, %v4854_v13, %v4859_v57  ;;  %v4734_v17 = vshll.u32 %v7151_v46, 16  ;;  %v4747_v33 = vrot.slane %v7151_v46, 5  ;;  %v4762_v27 = vshrl.u32 %v7151_v46, 16  ;;  %v8121_v42 = vld [vmem:[#allocation4 + $0x5a8] sm:$0xff]  }
 0x90e   :  { %4864 = vst [vmem:[#allocation2 + $0x48] sm:$0xf] %v4860_v8  ;;  %v4726_v39 = vrot.slane %v4724_v3, 5  ;;  %v4730_v19 = vrot.slane %v4728_v54, 4  ;;  %v4745_v21 = vsel %vm8462_vm5, %v6936_v62, %v4744_v61  ;;  %v4746_v9 = vrot.slane %v4744_v61, 4  ;;  %v8124_v57 = vld [vmem:[#allocation4 + $0x590] sm:$0xff]  }
 0x90f   :  { %v4757_v36 = vrot.slane %v4728_v54, 5  ;;  %v4758_v1 = vrot.slane %v4724_v3, 6  ;;  %v4764_v55 = vrot.slane %v4762_v27, 5  ;;  %4751 = vst [vmem:[#allocation2 + $0x8] sm:$0xf] %v4745_v21  ;;  %v4765_v14 = vrot.slane %v4734_v17, 6 }
 0x910   :  { %v4727_v20 = vsel %vm8454_vm3, %v4722_v34, %v4726_v39  ;;  %v4731_v32 = vor.u32 %v4730_v19, %v4726_v39  ;;  %v4748_v52 = vsel %vm8462_vm5, %v4746_v9, %v4747_v33  ;;  %v4775_v62 = vsel %vm8421_vm14, %v6937_v53, %v4774_v15  ;;  %v8117_v5 = vld [vmem:[#allocation2 + $0x28] ss:$20 sps:$4 sm:$0xff]   ;;  %v8118_v58 = vld [vmem:[#allocation2 + $0x30] ss:$20 sps:$4 sm:$0xff]  }
 0x911   :  { %v4759_v60 = vor.u32 %v4758_v1, %v4757_v36  ;;  %v4776_v24 = vrot.slane %v4774_v15, 4  ;;  %v4777_v59 = vrot.slane %v7151_v46, 6  ;;  %4740 = vst [vmem:[#allocation2 + $0x4] sm:$0xf] %v4727_v20  ;;  %4752 = vst [vmem:[#allocation2 + $0x1c] sm:$0xf] %v4748_v52  ;;  %v4766_v10 = vor.u32 %v4765_v14, %v4764_v55 }
 0x912   :  { %v4732_v6 = vrot.slane %v4731_v32, 4  ;;  %v4736_v41 = vrot.slane %v4734_v17, 5  ;;  %4781 = vst [vmem:[#allocation2 + $0x10] sm:$0xf] %v4775_v62  ;;  %v8111_v40 = vld [vmem:[#allocation2 + $0x2c] ss:$20 sps:$4 sm:$0xff]  }
 0x913   :  { %v4760_v4 = vsel %vm8441_vm2, %v4756_v22, %v4759_v60  ;;  %v4761_v11 = vrot.slane %v4759_v60, 4  ;;  %v4778_v29 = vsel %vm8421_vm14, %v4776_v24, %v4777_v59  ;;  %v8122_v34 = vld [vmem:[#allocation4 + $0x5a0] sm:$0xff]   ;;  %v8125_v25 = vld [vmem:[#allocation2 + $0x38] ss:$20 sps:$4 sm:$0xff]   ;;  %v8138_v9 = vld [vmem:[#allocation4 + $0x630] sm:$0xff]  }
 0x914   :  { %v4737_v56 = vsel %vm8454_vm3, %v4732_v6, %v4736_v41  ;;  %4770 = vst [vmem:[#allocation2 + $0xc] sm:$0xf] %v4760_v4  ;;  %4782 = vst [vmem:[#allocation2 + $0x24] sm:$0xf] %v4778_v29  ;;  %v8109_v16 = vld [vmem:[#allocation2] ss:$20 sps:$4 sm:$0xff]  }
 0x915   :  { %v4767_v53 = vsel %vm8441_vm2, %v4761_v11, %v4766_v10  ;;  %4741 = vst [vmem:[#allocation2 + $0x18] sm:$0xf] %v4737_v56  ;;  %v8113_v45 = vld [vmem:[#allocation2 + $0x34] ss:$20 sps:$4 sm:$0xff]   ;;  %v8130_v15 = vld [vmem:[#allocation4 + $0x640] sm:$0xff]   ;;  %v8134_v27 = vld [vmem:[#allocation4 + $0x638] sm:$0xff]  }
 0x916   :  { %4771 = vst [vmem:[#allocation2 + $0x20] sm:$0xf] %v4767_v53  ;;  %v8126_v46 = vld [vmem:[#allocation4 + $0x648] sm:$0xff]   ;;  %v8131_v8 = vld [vmem:[#allocation4 + $0x600] sm:$0xff]   ;;  %v8135_v39 = vld [vmem:[#allocation4 + $0x5f8] sm:$0xff]  }
 0x917   :  { %7535 = vmatprep.subr.bf16.mxu0 %v8126_v46  ;;  %v8127_v3 = vld [vmem:[#allocation4 + $0x608] sm:$0xff]   ;;  %v8132_v17 = vld [vmem:[#allocation4 + $0x6c0] sm:$0xff]   ;;  %v8136_v19 = vld [vmem:[#allocation4 + $0x6b8] sm:$0xff]  }
 0x918   :  { %v8110_v26 = vld [vmem:[#allocation2 + $0x8] ss:$20 sps:$4 sm:$0xff]   ;;  %v8133_v33 = vld [vmem:[#allocation4 + $0x680] sm:$0xff]   ;;  %v8139_v22 = vld [vmem:[#allocation4 + $0x5f0] sm:$0xff]  }
 0x919   :  { %v8128_v54 = vld [vmem:[#allocation4 + $0x6c8] sm:$0xff]   ;;  %v8137_v21 = vld [vmem:[#allocation4 + $0x678] sm:$0xff]   ;;  %v8140_v36 = vld [vmem:[#allocation4 + $0x6b0] sm:$0xff]  }
 0x91a   :  { %v8129_v61 = vld [vmem:[#allocation4 + $0x688] sm:$0xff]   ;;  %v8141_v1 = vld [vmem:[#allocation4 + $0x670] sm:$0xff]   ;;  %v8146_v14 = vld [vmem:[#allocation4 + $0x620] sm:$0xff]  }
 0x91b   :  { %v8119_v13 = vld [vmem:[#allocation2 + $0x10] ss:$20 sps:$4 sm:$0xff]   ;;  %v8142_v55 = vld [vmem:[#allocation4 + $0x628] sm:$0xff]   ;;  %v8150_v59 = vld [vmem:[#allocation4 + $0x618] sm:$0xff]  }
 0x91c   :  { %v8104_v43 = vld [vmem:[#allocation2 + $0x4] ss:$20 sps:$4 sm:$0xff]   ;;  %v8143_v20 = vld [vmem:[#allocation4 + $0x5e8] sm:$0xff]   ;;  %v8154_v11 = vld [vmem:[#allocation4 + $0x610] sm:$0xff]  }
 0x91d   :  { %v8106_v38 = vld [vmem:[#allocation2 + $0xc] ss:$20 sps:$4 sm:$0xff]   ;;  %5297 = vmatprep.mubr.bf16.mxu1 %v8104_v43  ;;  %v8152_v6 = vld [vmem:[#allocation4 + $0x698] sm:$0xff]   ;;  %v8156_v10 = vld [vmem:[#allocation4 + $0x690] sm:$0xff]  }
 0x91e   :  { %5346 = vmatprep.mubr.bf16.mxu0 %v8106_v38  ;;  %5298 = vmatmul.mubr.bf16.vlgmr.msra.gmra.mxu1 %v8109_v16  ;;  %v8144_v32 = vld [vmem:[#allocation4 + $0x6a8] sm:$0xff]   ;;  %v8147_v60 = vld [vmem:[#allocation4 + $0x5e0] sm:$0xff]   ;;  %v8151_v41 = vld [vmem:[#allocation4 + $0x5d8] sm:$0xff]  }
 0x91f   :  { %5347 = vmatmul.mubr.bf16.vlgmr.msra.gmra.mxu0 %v8110_v26  ;;  %7755 = vmatpush3.bf16.msra.mxu1 %v9530_v50  ;;  %v8123_v50 = vld [vmem:[#allocation4 + $0x598] sm:$0xff]   ;;  %v8145_v52 = vld [vmem:[#allocation4 + $0x668] sm:$0xff]   ;;  %v8148_v62 = vld [vmem:[#allocation4 + $0x6a0] sm:$0xff]  }
 0x920   :  { %5305 = vmatprep.mubr.bf16.mxu1 %v8111_v40  ;;  %5354 = vmatprep.mubr.bf16.mxu0 %v8113_v45  ;;  %v8149_v24 = vld [vmem:[#allocation4 + $0x660] sm:$0xff]   ;;  %v8153_v4 = vld [vmem:[#allocation4 + $0x658] sm:$0xff]   ;;  %v8155_v29 = vld [vmem:[#allocation4 + $0x5d0] sm:$0xff]  }
 0x921   :  { %7756 = vmatprep.subr.bf16.mxu1 %v8115_v35  ;;  %7536 = vmatpush3.bf16.msra.mxu0 %v8127_v3  ;;  %v8157_v56 = vld [vmem:[#allocation4 + $0x650] sm:$0xff]   ;;  %v9613_v53 = vld [vmem:[#allocation4 + $0x708] sm:$0xff]  }
 0x922   :  { %7537 = vmatprep.subr.bf16.mxu0 %v8130_v15 }
 0x923   :  { %7757 = vmatpush3.bf16.msra.mxu1 %v8115_v35 }
 0x924   :  { %7758 = vmatprep.subr.bf16.mxu1 %v8116_v63 }
 0x925   :  { %7538 = vmatpush3.bf16.msra.mxu0 %v8131_v8 }
 0x926   :  { %5306 = vmatmul.mubr.bf16.gmra.mxu1 %v8117_v5  ;;  %7539 = vmatprep.subr.bf16.mxu0 %v8134_v27 }
 0x927   :  { %5355 = vmatmul.mubr.bf16.gmra.mxu0 %v8118_v58  ;;  %7759 = vmatpush3.bf16.msra.mxu1 %v8116_v63 }
 0x928   :  { %7770 = vmatprep.mubr.bf16.mxu1 %v8119_v13  ;;  %7760 = vmatprep.subr.bf16.mxu1 %v8120_v51 }
 0x929   :  { %7540 = vmatpush3.bf16.msra.mxu0 %v8135_v39 }
 0x92a   :  { %7541 = vmatprep.subr.bf16.mxu0 %v8138_v9 }
 0x92b   :  { %7761 = vmatpush3.bf16.msra.mxu1 %v8120_v51 }
 0x92c   :  { %7762 = vmatprep.subr.bf16.mxu1 %v8121_v42 }
 0x92d   :  { %7542 = vmatpush3.bf16.msra.mxu0 %v8139_v22 }
 0x92e   :  { %7543 = vmatprep.subr.bf16.mxu0 %v8142_v55 }
 0x92f   :  { %7763 = vmatpush3.bf16.msra.mxu1 %v8121_v42 }
 0x930   :  { %7764 = vmatprep.subr.bf16.mxu1 %v8122_v34 }
 0x931   :  { %7544 = vmatpush3.bf16.msra.mxu0 %v8143_v20 }
 0x932   :  { %7545 = vmatprep.subr.bf16.mxu0 %v8146_v14 }
 0x933   :  { %7765 = vmatpush3.bf16.msra.mxu1 %v8122_v34 }
 0x934   :  { %7766 = vmatprep.subr.bf16.mxu1 %v8123_v50 }
 0x935   :  { %7546 = vmatpush3.bf16.msra.mxu0 %v8147_v60 }
 0x936   :  { %7547 = vmatprep.subr.bf16.mxu0 %v8150_v59 }
 0x937   :  { %7767 = vmatpush3.bf16.msra.mxu1 %v8123_v50 }
 0x938   :  { %7768 = vmatprep.subr.bf16.mxu1 %v8124_v57 }
 0x939   :  { %7548 = vmatpush3.bf16.msra.mxu0 %v8151_v41 }
 0x93a   :  { %7549 = vmatprep.subr.bf16.mxu0 %v8154_v11 }
 0x93b   :  { %7769 = vmatpush3.bf16.msra.mxu1 %v8124_v57 }
 0x93c   :  { %7563 = vmatprep.subr.bf16.mxu1 %v8128_v54 }
 0x93d   :  { %7550 = vmatpush3.bf16.msra.mxu0 %v8155_v29 }
 0x93e   :  { %7771 = vmatmul.mubr.bf16.vlgmr.msra.gmra.mxu1 %v8125_v25  ;;  %7774 = vmatprep.subr.bf16.mxu0 %v9613_v53  ;;  %v6943_v25 = vld [vmem:[%s9746_s2 + $0x8] ss:$0 sm:$0xff] }
 0x93f   :  { %7564 = vmatpush3.bf16.msra.mxu1 %v8129_v61 }
 0x940   :  { %7565 = vmatprep.subr.bf16.mxu1 %v8132_v17 }
 0x943   :  { %7566 = vmatpush3.bf16.msra.mxu1 %v8133_v33 }
 0x944   :  { %7567 = vmatprep.subr.bf16.mxu1 %v8136_v19 }
 0x947   :  { %7568 = vmatpush3.bf16.msra.mxu1 %v8137_v21 }
 0x948   :  { %7569 = vmatprep.subr.bf16.mxu1 %v8140_v36 }
 0x94b   :  { %7570 = vmatpush3.bf16.msra.mxu1 %v8141_v1 }
 0x94c   :  { %7571 = vmatprep.subr.bf16.mxu1 %v8144_v32 }
 0x94f   :  { %7572 = vmatpush3.bf16.msra.mxu1 %v8145_v52 }
 0x950   :  { %7573 = vmatprep.subr.bf16.mxu1 %v8148_v62 }
 0x953   :  { %7574 = vmatpush3.bf16.msra.mxu1 %v8149_v24 }
 0x954   :  { %7575 = vmatprep.subr.bf16.mxu1 %v8152_v6 }
 0x957   :  { %7576 = vmatpush3.bf16.msra.mxu1 %v8153_v4 }
 0x958   :  { %7577 = vmatprep.subr.bf16.mxu1 %v8156_v10 }
 0x95b   :  { %7578 = vmatpush3.bf16.msra.mxu1 %v8157_v56 }
 0x95c   :  { %7794 = vmatprep.subr.bf16.mxu1 %v8273_v30 }
 0x9de   :  { %v7485_v43 = vpop.f32.mrf.mxu1 }
 0x9df   :  { %v7513_v16 = vpop.f32.mrf.mxu0 }
 0x9e0   :  { %v7486_v38 = vpop.f32.mrf.mxu1 }
 0x9e1   :  { %v7514_v35 = vpop.f32.mrf.mxu0  ;;  %v7487_v57 = vadd.f32 %v7486_v38, %v7485_v43 }
 0x9e2   :  { %v7488_v26 = vpop.f32.mrf.mxu1  ;;  %v7515_v33 = vadd.f32 %v7514_v35, %v7513_v16 }
 0x9e3   :  { %v7516_v45 = vpop.f32.mrf.mxu0  ;;  %v5300_v61 = vadd.f32 %v7487_v57, %v6943_v25 }
 0x9e4   :  { %v7489_v40 = vpop.f32.mrf.mxu1 }
 0x9e5   :  { %v7517_v5 = vpop.f32.mrf.mxu0  ;;  %v7490_v15 = vadd.f32 %v7489_v40, %v7488_v26  ;;  %v5349_v36 = vadd.f32 %v7515_v33, %v5300_v61 }
 0x9e6   :  { %v7491_v63 = vpop.f32.mrf.mxu1  ;;  %v7518_v55 = vadd.f32 %v7517_v5, %v7516_v45 }
 0x9e7   :  { %v7519_v58 = vpop.f32.mrf.mxu0  ;;  %v5303_v21 = vadd.f32 %v7490_v15, %v6943_v25 }
 0x9e8   :  { %v7492_v51 = vpop.f32.mrf.mxu1 }
 0x9e9   :  { %v7520_v42 = vpop.f32.mrf.mxu0  ;;  %v7493_v34 = vadd.f32 %v7492_v51, %v7491_v63  ;;  %v5352_v59 = vadd.f32 %v7518_v55, %v5303_v21 }
 0x9ea   :  { %v7494_v13 = vpop.f32.mrf.mxu1  ;;  %v7521_v8 = vadd.f32 %v7520_v42, %v7519_v58 }
 0x9eb   :  { %v7522_v46 = vpop.f32.mrf.mxu0  ;;  %v5308_v3 = vadd.f32 %v7493_v34, %v6943_v25 }
 0x9ec   :  { %v7495_v50 = vpop.f32.mrf.mxu1 }
 0x9ed   :  { %v7496_v54 = vadd.f32 %v7495_v50, %v7494_v13  ;;  %v7523_v17 = vpop.f32.mrf.mxu0  ;;  %v5357_v39 = vadd.f32 %v7521_v8, %v5308_v3 }
 0x9ee   :  { %v7524_v9 = vadd.f32 %v7523_v17, %v7522_v46 }
 0x9ef   :  { %v5311_v27 = vadd.f32 %v7496_v54, %v6943_v25 }
 0x9f1   :  { %v5360_v52 = vadd.f32 %v7524_v9, %v5311_v27 }
 0x9fe   :  { %v7772_v19 = vpop.f32.mrf.mxu1 }
 0x9ff   :  { %v5406_v22 = vadd.f32 %v7772_v19, %v5357_v39 }
 0xa00   :  { %v5397_v1 = vpop.f32.mrf.mxu1 }
 0xa01   :  { %v5414_v20 = vmax.f32 %v5406_v22, 0.0  ;;  %v5398_v32 = vadd.f32 %v5397_v1, %v5349_v36 }
 0xa02   :  { %v7773_v14 = vpop.f32.mrf.mxu1 }
 0xa03   :  { %v5511_v60 = vrot.slane %v5414_v20, 6  ;;  %v5412_v62 = vmax.f32 %v5398_v32, 0.0  ;;  %v5409_v24 = vadd.f32 %v7773_v14, %v5360_v52 }
 0xa04   :  { %v5400_v6 = vpop.f32.mrf.mxu1 }
 0xa05   :  { %v5517_v41 = vsel %vm99_vm0, 0.0, %v5511_v60  ;;  %v5418_v4 = vrot.slane %v5412_v62, 6  ;;  %v5415_v11 = vmax.f32 %v5409_v24, 0.0  ;;  %v5401_v10 = vadd.f32 %v5400_v6, %v5352_v59 }
 0xa06   :  { %v7158_v29 = vpack.c.bf16 %v5517_v41, %v5517_v41 }
 0xa07   :  { %v5424_v56 = vsel %vm99_vm0, 0.0, %v5418_v4  ;;  %v5512_v43 = vrot.slane %v5415_v11, 6  ;;  %v5413_v16 = vmax.f32 %v5401_v10, 0.0 }
 0xa08   :  { %v5534_v38 = vshrl.u32 %v7158_v29, 16  ;;  %v5537_v26 = vshll.u32 %v7158_v29, 16  ;;  %5528 = vst [vmem:[#allocation2 + $0x28] sm:$0xf] %v7158_v29  ;;  %v7002_v35 = vrot.slane %v7158_v29, 9  ;;  %v9622_v40 = vpack.c.bf16 %v5424_v56, %v5424_v56 }
 0xa09   :  { %v5513_v45 = vsel %vm99_vm0, %v5511_v60, %v5512_v43  ;;  %v5518_v63 = vsel %vm99_vm0, %v5512_v43, 0.0  ;;  %v7003_v42 = vrot.slane %v7158_v29, 10  ;;  %v5419_v57 = vrot.slane %v5413_v16, 6 }
 0xa0a   :  { %v5536_v5 = vrot.slane %v5534_v38, 4  ;;  %v5539_v51 = vrot.slane %v5537_v26, 5  ;;  %v5572_v58 = vrot.slane %v5534_v38, 5  ;;  %v5573_v13 = vrot.slane %v5537_v26, 6  ;;  %5435 = vst [vmem:[#allocation2] sm:$0xf] %v9622_v40 }
 0xa0b   :  { %v5441_v34 = vshrl.u32 %v9622_v40, 16  ;;  %v5444_v50 = vshll.u32 %v9622_v40, 16  ;;  %v7159_v3 = vpack.c.bf16 %v5513_v45, %v5513_v45  ;;  %v7160_v54 = vpack.c.bf16 %v5518_v63, %v5518_v63 }
 0xa0c   :  { %v5540_v25 = vor.u32 %v5539_v51, %v5536_v5  ;;  %v5574_v46 = vor.u32 %v5573_v13, %v5572_v58  ;;  %v6997_v27 = vrot.slane %v9622_v40, 9  ;;  %v6998_v9 = vrot.slane %v9622_v40, 10 }
 0xa0d   :  { %v5443_v61 = vrot.slane %v5441_v34, 4  ;;  %v5446_v15 = vrot.slane %v5444_v50, 5  ;;  %v9629_v8 = vrot.slane %v5441_v34, 5  ;;  %v9631_v17 = vrot.slane %v5444_v50, 6  ;;  %5529 = vst [vmem:[#allocation2 + $0x3c] sm:$0xf] %v7159_v3 }
 0xa0e   :  { %v5541_v33 = vrot.slane %v5540_v25, 4  ;;  %v5543_v39 = vshll.u32 %v7159_v3, 16  ;;  %v5547_v19 = vshrl.u32 %v7159_v3, 16  ;;  %v5575_v21 = vrot.slane %v5574_v46, 4 }
 0xa0f   :  { %v5553_v22 = vshll.u32 %v7160_v54, 16  ;;  %v5563_v36 = vrot.slane %v7159_v3, 5  ;;  %v5447_v1 = vor.u32 %v5446_v15, %v5443_v61  ;;  %v5481_v52 = vor.u32 %v9631_v17, %v9629_v8 }
 0xa10   :  { %v5545_v55 = vrot.slane %v5543_v39, 5  ;;  %v5549_v20 = vrot.slane %v5547_v19, 4  ;;  %v5576_v32 = vrot.slane %v5547_v19, 5  ;;  %v5566_v62 = vrot.slane %v7160_v54, 5 }
 0xa11   :  { %v5555_v14 = vrot.slane %v5553_v22, 5  ;;  %v5564_v60 = vsel %vm8462_vm5, %v7002_v35, %v5563_v36  ;;  %v5565_v6 = vrot.slane %v5563_v36, 4  ;;  %v5577_v41 = vrot.slane %v5543_v39, 6 }
 0xa12   :  { %v5546_v24 = vsel %vm8454_vm3, %v5541_v33, %v5545_v55  ;;  %v5550_v59 = vor.u32 %v5549_v20, %v5545_v55  ;;  %5570 = vst [vmem:[#allocation2 + $0x30] sm:$0xf] %v5564_v60  ;;  %v5581_v11 = vshrl.u32 %v7160_v54, 16  ;;  %v5584_v10 = vrot.slane %v5553_v22, 6 }
 0xa13   :  { %v5593_v29 = vrot.slane %v7159_v3, 6  ;;  %v5596_v56 = vrot.slane %v7160_v54, 6  ;;  %5559 = vst [vmem:[#allocation2 + $0x2c] sm:$0xf] %v5546_v24  ;;  %v5567_v16 = vsel %vm8462_vm5, %v5565_v6, %v5566_v62  ;;  %v5578_v38 = vor.u32 %v5577_v41, %v5576_v32 }
 0xa14   :  { %v5551_v43 = vrot.slane %v5550_v59, 4  ;;  %v5420_v26 = vsel %vm99_vm0, %v5418_v4, %v5419_v57  ;;  %v5583_v35 = vrot.slane %v5581_v11, 5  ;;  %5571 = vst [vmem:[#allocation2 + $0x44] sm:$0xf] %v5567_v16  ;;  %v5425_v5 = vsel %vm99_vm0, %v5419_v57, 0.0 }
 0xa15   :  { %v5594_v45 = vsel %vm8421_vm14, %v7003_v42, %v5593_v29  ;;  %v5595_v63 = vrot.slane %v5593_v29, 4  ;;  %v5579_v58 = vsel %vm8441_vm2, %v5575_v21, %v5578_v38  ;;  %v5580_v13 = vrot.slane %v5578_v38, 4  ;;  %v8169_v38 = vld [vmem:[#allocation4 + $0x700] sm:$0xff]   ;;  %v8171_v2 = vld [vmem:[#allocation2 + $0x28] ss:$20 sps:$4 sm:$0xff]  }
 0xa16   :  { %v5556_v51 = vsel %vm8454_vm3, %v5551_v43, %v5555_v14  ;;  %5600 = vst [vmem:[#allocation2 + $0x38] sm:$0xf] %v5594_v45  ;;  %v7156_v34 = vpack.c.bf16 %v5420_v26, %v5420_v26  ;;  %v5448_v50 = vrot.slane %v5447_v1, 4  ;;  %v5585_v25 = vor.u32 %v5584_v10, %v5583_v35  ;;  %5589 = vst [vmem:[#allocation2 + $0x34] sm:$0xf] %v5579_v58  ;;  %v8174_v35 = vld [vmem:[#allocation4 + $0x6f0] sm:$0xff]  }
 0xa17   :  { %v5597_v4 = vsel %vm8421_vm14, %v5595_v63, %v5596_v56  ;;  %5560 = vst [vmem:[#allocation2 + $0x40] sm:$0xf] %v5556_v51  ;;  %v7157_v42 = vpack.c.bf16 %v5425_v5, %v5425_v5  ;;  %v5482_v22 = vrot.slane %v5481_v52, 4  ;;  %v8175_v5 = vld [vmem:[#allocation4 + $0x6e8] sm:$0xff]   ;;  %v8176_v51 = vld [vmem:[#allocation4 + $0x6e0] sm:$0xff]   ;;  %v8178_v58 = vld [vmem:[#allocation4 + $0x6d0] sm:$0xff]  }
 0xa18   :  { %5601 = vst [vmem:[#allocation2 + $0x4c] sm:$0xf] %v5597_v4  ;;  %v5450_v46 = vshll.u32 %v7156_v34, 16  ;;  %v5454_v57 = vshrl.u32 %v7156_v34, 16  ;;  %v5470_v3 = vrot.slane %v7156_v34, 5  ;;  %v5500_v54 = vrot.slane %v7156_v34, 6 }
 0xa19   :  { %5436 = vst [vmem:[#allocation2 + $0x14] sm:$0xf] %v7156_v34  ;;  %v5586_v61 = vsel %vm8441_vm2, %v5580_v13, %v5585_v25  ;;  %v5460_v15 = vshll.u32 %v7157_v42, 16  ;;  %v5473_v8 = vrot.slane %v7157_v42, 5  ;;  %v5488_v17 = vshrl.u32 %v7157_v42, 16  ;;  %v8180_v34 = vld [vmem:[#allocation4 + $0x748] sm:$0xff]  }
 0xa1a   :  { %5590 = vst [vmem:[#allocation2 + $0x48] sm:$0xf] %v5586_v61  ;;  %v5452_v33 = vrot.slane %v5450_v46, 5  ;;  %v5456_v39 = vrot.slane %v5454_v57, 4  ;;  %v5471_v19 = vsel %vm8462_vm5, %v6997_v27, %v5470_v3  ;;  %v5472_v21 = vrot.slane %v5470_v3, 4  ;;  %v8182_v25 = vld [vmem:[#allocation4 + $0x738] sm:$0xff]  }
 0xa1b   :  { %v5483_v36 = vrot.slane %v5454_v57, 5  ;;  %v5484_v1 = vrot.slane %v5450_v46, 6  ;;  %v5490_v55 = vrot.slane %v5488_v17, 5  ;;  %5477 = vst [vmem:[#allocation2 + $0x8] sm:$0xf] %v5471_v19  ;;  %v5491_v60 = vrot.slane %v5460_v15, 6 }
 0xa1c   :  { %v5453_v20 = vsel %vm8454_vm3, %v5448_v50, %v5452_v33  ;;  %v5457_v32 = vor.u32 %v5456_v39, %v5452_v33  ;;  %v5474_v14 = vsel %vm8462_vm5, %v5472_v21, %v5473_v8  ;;  %v5501_v27 = vsel %vm8421_vm14, %v6998_v9, %v5500_v54  ;;  %v8172_v45 = vld [vmem:[#allocation2 + $0x30] ss:$20 sps:$4 sm:$0xff]   ;;  %v8186_v57 = vld [vmem:[#allocation4 + $0x718] sm:$0xff]   ;;  %v8191_v17 = vld [vmem:[#allocation4 + $0x768] sm:$0xff]  }
 0xa1d   :  { %v5485_v62 = vor.u32 %v5484_v1, %v5483_v36  ;;  %v5502_v24 = vrot.slane %v5500_v54, 4  ;;  %v5503_v52 = vrot.slane %v7157_v42, 6  ;;  %5466 = vst [vmem:[#allocation2 + $0x4] sm:$0xf] %v5453_v20  ;;  %5478 = vst [vmem:[#allocation2 + $0x1c] sm:$0xf] %v5474_v14  ;;  %v5492_v31 = vor.u32 %v5491_v60, %v5490_v55 }
 0xa1e   :  { %v5458_v59 = vrot.slane %v5457_v32, 4  ;;  %v5462_v6 = vrot.slane %v5460_v15, 5  ;;  %5507 = vst [vmem:[#allocation2 + $0x10] sm:$0xf] %v5501_v27  ;;  %v8165_v48 = vld [vmem:[#allocation2 + $0x2c] ss:$20 sps:$4 sm:$0xff]  }
 0xa1f   :  { %v5486_v41 = vsel %vm8441_vm2, %v5482_v22, %v5485_v62  ;;  %v5487_v11 = vrot.slane %v5485_v62, 4  ;;  %v5504_v10 = vsel %vm8421_vm14, %v5502_v24, %v5503_v52  ;;  %v8179_v13 = vld [vmem:[#allocation2 + $0x38] ss:$20 sps:$4 sm:$0xff]   ;;  %v8181_v50 = vld [vmem:[#allocation4 + $0x740] sm:$0xff]   ;;  %v8183_v4 = vld [vmem:[#allocation4 + $0x730] sm:$0xff]  }
 0xa20   :  { %v5463_v40 = vsel %vm8454_vm3, %v5458_v59, %v5462_v6  ;;  %5496 = vst [vmem:[#allocation2 + $0xc] sm:$0xf] %v5486_v41  ;;  %5508 = vst [vmem:[#allocation2 + $0x24] sm:$0xf] %v5504_v10  ;;  %v8158_v29 = vld [vmem:[#allocation2] ss:$20 sps:$4 sm:$0xff]  }
 0xa21   :  { %v5493_v9 = vsel %vm8441_vm2, %v5487_v11, %v5492_v31  ;;  %5467 = vst [vmem:[#allocation2 + $0x18] sm:$0xf] %v5463_v40  ;;  %v8167_v26 = vld [vmem:[#allocation2 + $0x34] ss:$20 sps:$4 sm:$0xff]   ;;  %v8185_v46 = vld [vmem:[#allocation4 + $0x720] sm:$0xff]   ;;  %v8189_v15 = vld [vmem:[#allocation4 + $0x778] sm:$0xff]  }
 0xa22   :  { %5497 = vst [vmem:[#allocation2 + $0x20] sm:$0xf] %v5493_v9  ;;  %v8184_v42 = vld [vmem:[#allocation4 + $0x728] sm:$0xff]   ;;  %v8187_v3 = vld [vmem:[#allocation4 + $0x710] sm:$0xff]   ;;  %v8192_v33 = vld [vmem:[#allocation4 + $0x760] sm:$0xff]  }
 0xa23   :  { %v8188_v54 = vld [vmem:[#allocation4 + $0x780] ss:$0 sps:$4 sm:$0x33]   ;;  %v8190_v8 = vld [vmem:[#allocation4 + $0x770] sm:$0xff]   ;;  %v8193_v39 = vld [vmem:[#allocation4 + $0x758] sm:$0xff]  }
 0xa24   :  { %v8161_v43 = vld [vmem:[#allocation2 + $0x8] ss:$20 sps:$4 sm:$0xff]   ;;  %v6337_v61 = vsel %vm99_vm0, %v8188_v54, 0 }
 0xa25   :  { %v7004_v41 = vld [vmem:[%s9746_s2 + $0x9] ss:$0 sm:$0xff] }
 0xa27   :  { %v8173_v63 = vld [vmem:[#allocation2 + $0x10] ss:$20 sps:$4 sm:$0xff]  }
 0xa28   :  { %v8160_v56 = vld [vmem:[#allocation2 + $0x4] ss:$20 sps:$4 sm:$0xff]  }
 0xa29   :  { %v8163_v16 = vld [vmem:[#allocation2 + $0xc] ss:$20 sps:$4 sm:$0xff]   ;;  %6023 = vmatprep.mubr.bf16.mxu0 %v8160_v56 }
 0xa2a   :  { %6072 = vmatprep.mubr.bf16.mxu1 %v8163_v16  ;;  %6024 = vmatmul.mubr.bf16.vlgmr.msra.gmra.mxu0 %v8158_v29 }
 0xa2b   :  { %6073 = vmatmul.mubr.bf16.vlgmr.msra.gmra.mxu1 %v8161_v43  ;;  %7775 = vmatpush3.bf16.msra.mxu0 %v9613_v53  ;;  %v8177_v53 = vld [vmem:[#allocation4 + $0x6d8] sm:$0xff]  }
 0xa2c   :  { %6031 = vmatprep.mubr.bf16.mxu0 %v8165_v48  ;;  %6080 = vmatprep.mubr.bf16.mxu1 %v8167_v26 }
 0xa2d   :  { %7776 = vmatprep.subr.bf16.mxu0 %v8169_v38  ;;  %7795 = vmatpush3.bf16.msra.mxu1 %v8180_v34 }
 0xa2e   :  { %7796 = vmatprep.subr.bf16.mxu1 %v8273_v30 }
 0xa2f   :  { %7777 = vmatpush3.bf16.msra.mxu0 %v8169_v38 }
 0xa30   :  { %7778 = vmatprep.subr.bf16.mxu0 %v8170_v23 }
 0xa31   :  { %7797 = vmatpush3.bf16.msra.mxu1 %v8181_v50 }
 0xa32   :  { %6032 = vmatmul.mubr.bf16.gmra.mxu0 %v8171_v2  ;;  %7798 = vmatprep.subr.bf16.mxu1 %v8273_v30 }
 0xa33   :  { %6081 = vmatmul.mubr.bf16.gmra.mxu1 %v8172_v45  ;;  %7779 = vmatpush3.bf16.msra.mxu0 %v8170_v23 }
 0xa34   :  { %7790 = vmatprep.mubr.bf16.mxu0 %v8173_v63  ;;  %7780 = vmatprep.subr.bf16.mxu0 %v8174_v35 }
 0xa35   :  { %7799 = vmatpush3.bf16.msra.mxu1 %v8182_v25  ;;  %7810 = vmatprep.mubr.msk.bf16.mxu1 %vm8274_vm4, %v8273_v30 }
 0xa36   :  { %7800 = vmatprep.subr.bf16.mxu1 %v8273_v30 }
 0xa37   :  { %7781 = vmatpush3.bf16.msra.mxu0 %v8174_v35 }
 0xa38   :  { %7782 = vmatprep.subr.bf16.mxu0 %v8175_v5 }
 0xa39   :  { %7801 = vmatpush3.bf16.msra.mxu1 %v8183_v4 }
 0xa3a   :  { %7802 = vmatprep.subr.bf16.mxu1 %v8273_v30 }
 0xa3b   :  { %7783 = vmatpush3.bf16.msra.mxu0 %v8175_v5 }
 0xa3c   :  { %7784 = vmatprep.subr.bf16.mxu0 %v8176_v51 }
 0xa3d   :  { %7803 = vmatpush3.bf16.msra.mxu1 %v8184_v42 }
 0xa3e   :  { %7804 = vmatprep.subr.bf16.mxu1 %v8273_v30 }
 0xa3f   :  { %7785 = vmatpush3.bf16.msra.mxu0 %v8176_v51 }
 0xa40   :  { %7786 = vmatprep.subr.bf16.mxu0 %v8177_v53 }
 0xa41   :  { %7805 = vmatpush3.bf16.msra.mxu1 %v8185_v46 }
 0xa42   :  { %7806 = vmatprep.subr.bf16.mxu1 %v8273_v30 }
 0xa43   :  { %7787 = vmatpush3.bf16.msra.mxu0 %v8177_v53 }
 0xa44   :  { %7788 = vmatprep.subr.bf16.mxu0 %v8178_v58 }
 0xa45   :  { %7807 = vmatpush3.bf16.msra.mxu1 %v8186_v57 }
 0xa46   :  { %7808 = vmatprep.subr.bf16.mxu1 %v8273_v30 }
 0xa47   :  { %7789 = vmatpush3.bf16.msra.mxu0 %v8178_v58 }
 0xa48   :  { %7814 = vmatprep.subr.bf16.mxu0 %v8273_v30 }
 0xa49   :  { %7809 = vmatpush3.bf16.msra.mxu1 %v8187_v3 }
 0xa4a   :  { %7791 = vmatmul.mubr.bf16.vlgmr.msra.gmra.mxu0 %v8179_v13  ;;  %7832 = vmatprep.subr.bf16.mxu1 %v8273_v30 }
 0xa4b   :  { %7828 = vmatprep.mubr.msk.bf16.mxu0 %vm8274_vm4, %v8273_v30  ;;  %7815 = vmatpush3.bf16.msra.mxu0 %v6337_v61 }
 0xa4c   :  { %7816 = vmatprep.subr.bf16.mxu0 %v8273_v30 }
 0xa4f   :  { %7817 = vmatpush3.bf16.msra.mxu0 %v8189_v15 }
 0xa50   :  { %7818 = vmatprep.subr.bf16.mxu0 %v8273_v30 }
 0xa53   :  { %7819 = vmatpush3.bf16.msra.mxu0 %v8190_v8 }
 0xa54   :  { %7820 = vmatprep.subr.bf16.mxu0 %v8273_v30 }
 0xa57   :  { %7821 = vmatpush3.bf16.msra.mxu0 %v8191_v17 }
 0xa58   :  { %7822 = vmatprep.subr.bf16.mxu0 %v8273_v30 }
 0xa5b   :  { %7823 = vmatpush3.bf16.msra.mxu0 %v8192_v33 }
 0xa5c   :  { %7824 = vmatprep.subr.bf16.mxu0 %v8273_v30 }
 0xa5f   :  { %7825 = vmatpush3.bf16.msra.mxu0 %v8193_v39 }
 0xa60   :  { %7826 = vmatprep.subr.bf16.mxu0 %v8273_v30 }
 0xaea   :  { %v7551_v19 = vpop.f32.mrf.mxu0 }
 0xaeb   :  { %v7579_v21 = vpop.f32.mrf.mxu1 }
 0xaec   :  { %v7552_v22 = vpop.f32.mrf.mxu0 }
 0xaed   :  { %v7580_v1 = vpop.f32.mrf.mxu1  ;;  %v7553_v6 = vadd.f32 %v7552_v22, %v7551_v19 }
 0xaee   :  { %v7554_v36 = vpop.f32.mrf.mxu0  ;;  %v7581_v43 = vadd.f32 %v7580_v1, %v7579_v21 }
 0xaef   :  { %v7582_v20 = vpop.f32.mrf.mxu1  ;;  %v6026_v40 = vadd.f32 %v7553_v6, %v7004_v41 }
 0xaf0   :  { %v7555_v55 = vpop.f32.mrf.mxu0 }
 0xaf1   :  { %v7583_v14 = vpop.f32.mrf.mxu1  ;;  %v7556_v9 = vadd.f32 %v7555_v55, %v7554_v36  ;;  %v6075_v35 = vadd.f32 %v7581_v43, %v6026_v40  ;;  %v6392_v55 = vsel %vm325_vm15, 4294967295, %v8272_v0 }
 0xaf2   :  { %v7557_v32 = vpop.f32.mrf.mxu0  ;;  %v7584_v63 = vadd.f32 %v7583_v14, %v7582_v20  ;;  %v8194_v20 = vld [vmem:[#allocation4 + $0x750] sm:$0xff]   ;;  %v6382_v14 = vld [vmem:[#allocation4 + $0x788] sm:$0x3] }
 0xaf3   :  { %v7585_v62 = vpop.f32.mrf.mxu1  ;;  %v6029_v26 = vadd.f32 %v7556_v9, %v7004_v41  ;;  %7827 = vmatpush3.bf16.msra.mxu0 %v8194_v20 }
 0xaf4   :  { %v7558_v60 = vpop.f32.mrf.mxu0 }
 0xaf5   :  { %v7586_v24 = vpop.f32.mrf.mxu1  ;;  %v7559_v52 = vadd.f32 %v7558_v60, %v7557_v32  ;;  %v6078_v34 = vadd.f32 %v7584_v63, %v6029_v26  ;;  %v6393_v32 = vsel %vm99_vm0, %v6392_v55, 0 }
 0xaf6   :  { %v7560_v27 = vpop.f32.mrf.mxu0  ;;  %v7587_v29 = vadd.f32 %v7586_v24, %v7585_v62  ;;  %v6395_v60 = vand.u32 %v6393_v32, %v6382_v14  ;;  %v7055_v62 = vld [vmem:[%s9746_s2 + $0xa] ss:$0 sm:$0xff] }
 0xaf7   :  { %v7588_v11 = vpop.f32.mrf.mxu1  ;;  %v6034_v31 = vadd.f32 %v7559_v52, %v7004_v41 }
 0xaf8   :  { %v7561_v59 = vpop.f32.mrf.mxu0 }
 0xaf9   :  { %v7562_v10 = vadd.f32 %v7561_v59, %v7560_v27  ;;  %v7589_v56 = vpop.f32.mrf.mxu1  ;;  %v6083_v38 = vadd.f32 %v7587_v29, %v6034_v31 }
 0xafa   :  { %v7590_v23 = vadd.f32 %v7589_v56, %v7588_v11  ;;  %v8195_v56 = vld [vmem:[#allocation4 + $0x798] ss:$0 sps:$4 sm:$0x33]  }
 0xafb   :  { %v6037_v16 = vadd.f32 %v7562_v10, %v7004_v41  ;;  %v7064_v41 = vld [vmem:[%s9746_s2 + $0xb] ss:$0 sm:$0xff]  ;;  %v6461_v43 = vsel %vm99_vm0, %v8195_v56, 0 }
 0xafd   :  { %v6086_v51 = vadd.f32 %v7590_v23, %v6037_v16  ;;  %v8196_v16 = vld [vmem:[#allocation4 + $0x790] sm:$0xff]  }
 0xb0a   :  { %v7792_v48 = vpop.f32.mrf.mxu0 }
 0xb0b   :  { %v6132_v2 = vadd.f32 %v7792_v48, %v6083_v38  ;;  %v7073_v38 = vld [vmem:[%s9746_s2 + $0xc] ss:$0 sm:$0xff] }
 0xb0c   :  { %v6123_v45 = vpop.f32.mrf.mxu0 }
 0xb0d   :  { %v6124_v5 = vadd.f32 %v6123_v45, %v6075_v35  ;;  %v6140_v58 = vadd.f32 %v6132_v2, %v4688_v7 }
 0xb0e   :  { %v7793_v53 = vpop.f32.mrf.mxu0 }
 0xb0f   :  { %v6135_v13 = vadd.f32 %v7793_v53, %v6086_v51  ;;  %v6138_v25 = vadd.f32 %v6124_v5, %v4686_v49  ;;  %v6144_v46 = vmax.f32 %v6140_v58, 0.0  ;;  %v8197_v5 = vld [vmem:[#allocation4 + $0x7a8] ss:$0 sps:$4 sm:$0x33]   ;;  %v8198_v53 = vld [vmem:[#allocation4 + $0x7a0] sm:$0xff]  }
 0xb10   :  { %v6126_v50 = vpop.f32.mrf.mxu0  ;;  %v6526_v51 = vsel %vm99_vm0, %v8197_v5, 0  ;;  %v7075_v58 = vld [vmem:[%s9746_s2 + $0xd] ss:$0 sm:$0xff] }
 0xb11   :  { %v6141_v4 = vadd.f32 %v6135_v13, %v4689_v28  ;;  %v6127_v42 = vadd.f32 %v6126_v50, %v6078_v34  ;;  %v6142_v54 = vmax.f32 %v6138_v25, 0.0 }
 0xb13   :  { %v6145_v57 = vmax.f32 %v6141_v4, 0.0  ;;  %v6139_v3 = vadd.f32 %v6127_v42, %v4687_v37 }
 0xb15   :  { %v6155_v61 = vadd.f32 %v6145_v57, %v6144_v46  ;;  %v6143_v15 = vmax.f32 %v6139_v3, 0.0 }
 0xb17   :  { %v6156_v47 = vrot.slane %v6155_v61, 4  ;;  %v6146_v7 = vadd.f32 %v6143_v15, %v6142_v54 }
 0xb19   :  { %v6157_v8 = vadd.f32 %v6156_v47, %v6155_v61  ;;  %v6147_v17 = vrot.slane %v6146_v7, 4 }
 0xb1b   :  { %v6158_v33 = vrot.slane %v6157_v8, 2  ;;  %v6148_v39 = vadd.f32 %v6147_v17, %v6146_v7 }
 0xb1d   :  { %v6159_v44 = vadd.f32 %v6158_v33, %v6157_v8  ;;  %v6149_v49 = vrot.slane %v6148_v39, 2 }
 0xb1f   :  { %v6160_v19 = vrot.slane %v6159_v44, 1  ;;  %v6150_v12 = vadd.f32 %v6149_v49, %v6148_v39 }
 0xb21   :  { %v6161_v28 = vadd.f32 %v6160_v19, %v6159_v44  ;;  %v6151_v21 = vrot.slane %v6150_v12, 1 }
 0xb23   :  { %v6152_v22 = vadd.f32 %v6151_v21, %v6150_v12  ;;  %v6162_v36 = vmul.f32 0.0625, %v6161_v28 }
 0xb25   :  { %v6154_v1 = vmul.f32 0.0625, %v6152_v22 }
 0xb27   :  { %v6163_v18 = vsel %vm325_vm15, %v6154_v1, %v6162_v36 }
 0xb28   :  { %v6164_v37 = vpack.c.bf16 %v6163_v18, %v6163_v18 }
 0xb2a   :  { %7811 = vmatmul.mubr.bf16.vlgmr.msra.gmra.mxu1 %v6164_v37 }
 0xb2b   :  { %7834 = vmatprep.mubr.msk.bf16.mxu1 %vm8274_vm4, %v8273_v30  ;;  %7833 = vmatpush3.bf16.msra.mxu1 %v6395_v60 }
 0xb2c   :  { %7838 = vmatprep.subr.bf16.mxu1 %v8273_v30 }
 0xbea   :  { %v6268_v27 = vpop.f32.mrf.mxu1 }
 0xbeb   :  { %v6269_v24 = vadd.f32 %v7055_v62, %v6268_v27 }
 0xbec   :  { %v7812_v52 = vpop.f32.mrf.mxu1 }
 0xbed   :  { %v6274_v59 = vpack.c.bf16 %v6269_v24, %v6269_v24 }
 0xbee   :  { %v6271_v6 = vpop.f32.mrf.mxu1 }
 0xbef   :  { %7829 = vmatmul.mubr.msk.bf16.vlgmr.msra.gmra.mxu0 %vm6332_vm6, %v6274_v59 }
 0xbf0   :  { %v7813_v0 = vpop.f32.mrf.mxu1 }
 0xcaf   :  { %v6373_v11 = vpop.f32.mrf.mxu0 }
 0xcb0   :  { %v6374_v31 = vadd.f32 %v7064_v41, %v6373_v11 }
 0xcb1   :  { %v7830_v10 = vpop.f32.mrf.mxu0 }
 0xcb2   :  { %v6381_v40 = vpack.c.bf16 %v6374_v31, %v6374_v31  ;;  %6380 = vst.msk [vmem:[#allocation8] sm:$0x3] %vm6379_vm9, %v6374_v31 }
 0xcb3   :  { %v6376_v9 = vpop.f32.mrf.mxu0 }
 0xcb4   :  { %7835 = vmatmul.mubr.msk.bf16.vlgmr.msra.gmra.mxu1 %vm6388_vm10, %v6381_v40 }
 0xcb5   :  { %v7831_v29 = vpop.f32.mrf.mxu0  ;;  %7842 = vmatprep.mubr.msk.bf16.mxu1 %vm8274_vm4, %v8273_v30  ;;  %7839 = vmatpush3.bf16.msra.mxu1 %v6461_v43 }
 0xcb6   :  { %7840 = vmatprep.subr.bf16.mxu1 %v8273_v30 }
 0xcb9   :  { %7841 = vmatpush3.bf16.msra.mxu1 %v8196_v16 }
 0xcba   :  { %7846 = vmatprep.subr.bf16.mxu1 %v8273_v30 }
 0xd74   :  { %v6431_v48 = vpop.f32.mrf.mxu1 }
 0xd75   :  { %v6432_v26 = vadd.f32 %v7073_v38, %v6431_v48 }
 0xd76   :  { %v7836_v23 = vpop.f32.mrf.mxu1 }
 0xd77   :  { %8199 = vtanh.f32 %v6432_v26 }
 0xd78   :  { %v6434_v2 = vpop.f32.mrf.mxu1 }
 0xd7a   :  { %v7837_v35 = vpop.f32.mrf.mxu1 }
 0xd84   :  { %v8200_v45 = vpop.eup %8199 }
 0xd85   :  { %v6438_v63 = vpack.c.bf16 %v8200_v45, %v8200_v45 }
 0xd87   :  { %7843 = vmatmul.mubr.msk.bf16.vlgmr.msra.gmra.mxu1 %vm6456_vm11, %v6438_v63 }
 0xd88   :  { %7850 = vmatprep.mubr.msk.bf16.mxu1 %vm8274_vm4, %v8273_v30  ;;  %7847 = vmatpush3.bf16.msra.mxu1 %v6526_v51 }
 0xd89   :  { %7848 = vmatprep.subr.bf16.mxu1 %v8273_v30 }
 0xd8c   :  { %7849 = vmatpush3.bf16.msra.mxu1 %v8198_v53 }
 0xe47   :  { %v6497_v13 = vpop.f32.mrf.mxu1 }
 0xe48   :  { %v6498_v34 = vadd.f32 %v7075_v58, %v6497_v13 }
 0xe49   :  { %v7844_v50 = vpop.f32.mrf.mxu1 }
 0xe4a   :  { %8201 = vtanh.f32 %v6498_v34 }
 0xe4b   :  { %v6500_v25 = vpop.f32.mrf.mxu1 }
 0xe4d   :  { %v7845_v4 = vpop.f32.mrf.mxu1 }
 0xe57   :  { %v8202_v42 = vpop.eup %8201 }
 0xe58   :  { %v6504_v46 = vpack.c.bf16 %v8202_v42, %v8202_v42 }
 0xe5a   :  { %7851 = vmatmul.mubr.msk.bf16.vlgmr.msra.gmra.mxu1 %vm6456_vm11, %v6504_v46 }
 0xe5b   :  { %8234 = shalt.err (!%p8231_p9)
}
 0xe5c   :  { %6589 = dma.vmem_to_hbm [thread:$0]  %s6587_s27, 32, %s9748_s4, [#allocation9]   ;;  %v7079_v30 = vld [vmem:[%s9746_s2 + $0xe] ss:$0 sm:$0xff]  ;;  %vm6568_vm0 = vcmask 74752  }
 0xe5d   :  { %s8276_s7 = smov [#allocation7]  }
 0xe5e   :  { %s6576_s8 = sshll.u32 %s8276_s7, 4  ;;  %s6577_s8 = int_to_ptr.vmem [resolvable:$true] %s6576_s8 }
 0xe5f   :  { %s8243_s9 = scalar_lea.vmem %s6577_s8, 32  ;;  %p8248_p11 = scmp.lt.s32.totalorder %s6577_s8, %s6577_s8 }
 0xe60   :  { %p8244_p10 = scmp.ne.s32.totalorder %s6577_s8, %s8243_s9  ;;  %p8249_p12 = scmp.lt.s32.totalorder %s8243_s9, %s8243_s9 }
 0xe62   :  { %p8250_p13 = por %p8249_p12, %p8248_p11 }
 0xe64   :  { %p8251_p0 = pnand %p8250_p13, %p8244_p10 }
 0xf1a   :  { %v6562_v57 = vpop.f32.mrf.mxu1 }
 0xf1b   :  { %v6563_v3 = vadd.f32 %v7079_v30, %v6562_v57 }
 0xf1c   :  { %v7852_v54 = vpop.f32.mrf.mxu1 }
 0xf1d   :  { %6569 = vst.msk [vmem:[#allocation7] sm:$0x3] %vm6568_vm0, %v6563_v3 }
 0xf1e   :  { %v6565_v61 = vpop.f32.mrf.mxu1 }
 0xf1f   :  { %8254 = shalt.err (!%p8251_p0)
}
 0xf20   :  { %6579 = dma.vmem_to_hbm [thread:$0]  %s6577_s8, 32, %s9747_s3, [#allocation6]   ;;  %v7853_v15 = vpop.f32.mrf.mxu1 }
 0xf21   :  { %8265 = dma.done.wait [#allocation6], 32  }
 0xf22   :  { %8266 = vsyncadd [#allocation6], 4294967264 }
 0xf23   :  { %8267 = dma.done.wait [#allocation9], 32  }
 0xf24   :  { %8268 = vsyncadd [#allocation9], 4294967264 }
 0xf25   :  { %6596 = vsyncpa [#allocation5], 1 }
 0xf26   :  { %6597 = vsyncpa [#allocation6], 1 }
 0xf27   :  { %6598 = vsyncpa [#allocation9], 1 }

</bundles_post_ra>
